<compile_context>
chip_gen: v6e
topology: v6e:2x2x1
jax: 0.10.0
libtpu: 0.0.40
codegen_flags: <defaults>
</compile_context>

<pallas_src>
import math
import numpy as np

import jax
import jax.numpy as jnp
from jax import lax
from jax.experimental import pallas as pl
from jax.experimental.pallas import tpu as pltpu

# ---------------- small, Swin-consistent config ----------------
B = 2
H = W = 8                  # input resolution of this stage
C = 32                     # embedding dim of this stage
NUM_HEADS = 4
HEAD_DIM = C // NUM_HEADS
WINDOW = 4                 # window_size
N = WINDOW * WINDOW        # tokens per window (16)
P_TOK = H * W              # tokens per image (64)  -- one grid step
T = B * P_TOK              # total tokens (128)
MLP_HIDDEN = 4 * C         # mlp_ratio = 4
EPS = 1e-5                 # layer_norm_eps
NEG_INF = -1e9             # cross-window mask value (underflows to exact 0 prob)
F32 = jnp.float32


# ---------------- helpers ----------------
def _layernorm(x, g, b):
    mu = jnp.mean(x, axis=-1, keepdims=True)
    xc = x - mu
    var = jnp.mean(xc * xc, axis=-1, keepdims=True)
    return xc * lax.rsqrt(var + EPS) * g + b


def _layernorm_noaffine(x):
    # affine (gamma/beta) is folded into the following matmul weights host-side
    mu = jnp.mean(x, axis=-1, keepdims=True)
    xc = x - mu
    var = jnp.mean(xc * xc, axis=-1, keepdims=True)
    return xc * lax.rsqrt(var + EPS)


def _gelu_tanh(x):
    # tanh-approximate GELU (== jax.nn.gelu(approximate=True)); tanh runs on the EUP.
    # TODO(synk): HF Swin uses exact erf-GELU; deviation < ~1e-3 abs (negligible here).
    c = math.sqrt(2.0 / math.pi)
    return 0.5 * x * (1.0 + jnp.tanh(c * (x + 0.044715 * x * x * x)))


# ---------------- the fused kernel (one image / grid step) ----------------
def swin_block_kernel(x_ref, wqkv_ref, bqkv_ref, wo_ref, bo_ref, bias_ref,
                      w1_ref, b1_ref, w2_ref, b2_ref, wred_ref, bred_ref, sel_ref,
                      o_ref, ctx_sc, x4_sc):
    x = x_ref[...].astype(F32)                                            # (64, C)

    # ---- LN1 (affine folded) + fused, pre-scaled QKV projection ----
    xn = _layernorm_noaffine(x)
    qkv = jnp.dot(xn, wqkv_ref[...], preferred_element_type=F32) + bqkv_ref[...]   # (64, 3C)

    # ---- window attention as masked per-image attention, one head at a time ----
    for h in range(NUM_HEADS):                                            # static unroll
        lo = h * HEAD_DIM
        qh = qkv[:, lo:lo + HEAD_DIM]                                     # (64, d) (already scaled)
        kh = qkv[:, C + lo:C + lo + HEAD_DIM]
        vh = qkv[:, 2 * C + lo:2 * C + lo + HEAD_DIM]
        # q @ k^T without materializing a transpose: contract last dims of both.
        s = lax.dot_general(qh, kh, (((1,), (1,)), ((), ())),
                            preferred_element_type=F32)                   # (64, 64)
        s = s + bias_ref[h]                                               # rel-pos bias + window mask
        s = s - jnp.max(s, axis=-1, keepdims=True)
        p = jnp.exp(s)
        ctx = jnp.dot(p, vh, preferred_element_type=F32)                  # unnormalized (64, d)
        inv = pl.reciprocal(jnp.sum(p, axis=-1, keepdims=True), approx=True)
        ctx_sc[:, lo:lo + HEAD_DIM] = ctx * inv                           # lane-offset masked store

    # single K=32 output projection over the concatenated heads
    attn = jnp.dot(ctx_sc[...], wo_ref[...], preferred_element_type=F32) + bo_ref[...]

    # ---- residual 1, LN2 (affine folded), MLP, residual 2 (dropout identity in eval) ----
    h1 = x + attn
    y = _layernorm_noaffine(h1)
    z = jnp.dot(y, w1_ref[...], preferred_element_type=F32) + b1_ref[...]  # (64, 4C)
    z = _gelu_tanh(z)
    z = jnp.dot(z, w2_ref[...], preferred_element_type=F32) + b2_ref[...]  # (64, C)
    out = h1 + z                                                           # (64, C)

    # ---- SwinPatchMerging: 2x2 gather via 0/1 selection matmuls, lane-offset stores ----
    for g in range(4):                                                     # static unroll
        x4_sc[:, g * C:(g + 1) * C] = jnp.dot(sel_ref[g], out,
                                              preferred_element_type=F32)  # (16, C)
    x4 = _layernorm_noaffine(x4_sc[...])                                   # (16, 4C)
    o_ref[...] = (jnp.dot(x4, wred_ref[...], preferred_element_type=F32)
                  + bred_ref[...]).astype(o_ref.dtype)                     # (16, 2C)


# ---------------- wrapper: single pallas_call, grid over images ----------------
def swin_block_forward(hidden_states, kp):
    Bh, L, Ch = hidden_states.shape
    assert (Bh, L, Ch) == (B, P_TOK, C), "kernel is specialized to the configured shapes"

    full2 = lambda shape: pl.BlockSpec(shape, lambda b: (0, 0))
    full3 = lambda shape: pl.BlockSpec(shape, lambda b: (0, 0, 0))

    out = pl.pallas_call(
        swin_block_kernel,
        out_shape=jax.ShapeDtypeStruct((Bh * (P_TOK // 4), 2 * C), hidden_states.dtype),
        grid_spec=pltpu.PrefetchScalarGridSpec(
            num_scalar_prefetch=0,
            grid=(Bh,),
            in_specs=[
                pl.BlockSpec((P_TOK, C), lambda b: (b, 0)),          # x (per image)
                full2((C, 3 * C)),                                   # wqkv  (LN1+scale folded)
                full2((1, 3 * C)),                                   # bqkv
                full2((C, C)),                                       # wo
                full2((1, C)),                                       # bo
                full3((NUM_HEADS, P_TOK, P_TOK)),                    # rel-pos bias + window mask
                full2((C, MLP_HIDDEN)),                              # w1 (LN2 folded)
                full2((1, MLP_HIDDEN)),                              # b1
                full2((MLP_HIDDEN, C)),                              # w2
                full2((1, C)),                                       # b2
                full2((4 * C, 2 * C)),                               # w_red (downsample LN folded)
                full2((1, 2 * C)),                                   # b_red
                full3((4, P_TOK // 4, P_TOK)),                       # 2x2 merge selection
            ],
            out_specs=pl.BlockSpec((P_TOK // 4, 2 * C), lambda b: (b, 0)),
            scratch_shapes=[
                pltpu.VMEM((P_TOK, C), F32),            # concatenated per-head contexts
                pltpu.VMEM((P_TOK // 4, 4 * C), F32),   # lane-dense merged patches
            ],
        ),
        compiler_params=pltpu.CompilerParams(dimension_semantics=("parallel",)),
        cost_estimate=pl.CostEstimate(flops=6_000_000, transcendentals=50_000,
                                      bytes_accessed=250_000),
    )(
        hidden_states.reshape(T, C),
        kp["wqkv"], kp["bqkv"], kp["wo"], kp["bo"], kp["bias_mask"],
        kp["w1"], kp["b1"], kp["w2"], kp["b2"], kp["w_red"], kp["b_red"], kp["sel"],
    )
    return out.reshape(Bh, (H // 2) * (W // 2), 2 * C)


# ---------------- host-side constant tables ----------------
def _relative_position_index():
    coords = np.stack(np.meshgrid(np.arange(WINDOW), np.arange(WINDOW), indexing="ij"))
    coords = coords.reshape(2, -1)
    rel = coords[:, :, None] - coords[:, None, :]          # (2, N, N)
    rel = rel.transpose(1, 2, 0).astype(np.int64)
    rel[:, :, 0] += WINDOW - 1
    rel[:, :, 1] += WINDOW - 1
    rel[:, :, 0] *= 2 * WINDOW - 1
    return rel.sum(-1)                                     # (N, N)


def _attention_bias_mask(rel_bias):
    """(NUM_HEADS, P_TOK, P_TOK): rel-pos bias for same-window pairs, NEG_INF elsewhere.
    Per-image (windows never cross the batch boundary), shared by both grid steps."""
    rb = np.asarray(rel_bias)                              # (nH, N, N)
    t = np.arange(P_TOK)
    hh = t // W
    ww = t % W
    win = (hh // WINDOW) * (W // WINDOW) + (ww // WINDOW)
    loc = (hh % WINDOW) * WINDOW + (ww % WINDOW)
    same = win[:, None] == win[None, :]
    bias = np.where(same[None, :, :], rb[:, loc[:, None], loc[None, :]],
                    np.float32(NEG_INF))
    return jnp.asarray(bias, dtype=F32)


def _merge_select():
    """(4, P_TOK//4, P_TOK) 0/1 matrices implementing the HF SwinPatchMerging 2x2 gather
    (per image)."""
    P = (H // 2) * (W // 2)
    sel = np.zeros((4, P, P_TOK), np.float32)
    for h2 in range(H // 2):
        for w2 in range(W // 2):
            prow = h2 * (W // 2) + w2
            for wp in range(2):
                for hp in range(2):
                    g = hp + 2 * wp          # HF concat order [x0, x1, x2, x3]
                    r = (2 * h2 + hp) * W + (2 * w2 + wp)
                    sel[g, prow, r] = 1.0
    return jnp.asarray(sel)


# ---------------- deterministic base parameters (HF-layout, unfused) ----------------
def init_params(key):
    ks = jax.random.split(key, 20)
    nrm = lambda k, shape, sc=0.02: sc * jax.random.normal(k, shape, dtype=F32)
    p = {
        "ln1_g": 1.0 + nrm(ks[0], (1, C), 0.1), "ln1_b": nrm(ks[1], (1, C), 0.05),
        "wq": nrm(ks[2], (C, C)), "wk": nrm(ks[3], (C, C)), "wv": nrm(ks[4], (C, C)),
        "bq": nrm(ks[5], (1, C), 0.02), "bk": nrm(ks[6], (1, C), 0.02),
        "bv": nrm(ks[7], (1, C), 0.02),
        "wo": nrm(ks[8], (C, C)), "bo": nrm(ks[9], (1, C), 0.02),
        "ln2_g": 1.0 + nrm(ks[10], (1, C), 0.1), "ln2_b": nrm(ks[11], (1, C), 0.05),
        "w1": nrm(ks[12], (C, MLP_HIDDEN)), "b1": nrm(ks[13], (1, MLP_HIDDEN), 0.02),
        "w2": nrm(ks[14], (MLP_HIDDEN, C)), "b2": nrm(ks[15], (1, C), 0.02),
        "dn_g": 1.0 + nrm(ks[16], (1, 4 * C), 0.1), "dn_b": nrm(ks[17], (1, 4 * C), 0.05),
        "w_red": nrm(ks[18], (4 * C, 2 * C)),
    }
    # relative position bias: table ((2w-1)^2, nH) gathered by index -> (nH, N, N)
    table = nrm(ks[19], ((2 * WINDOW - 1) ** 2, NUM_HEADS))
    idx = jnp.asarray(_relative_position_index())
    p["rel_bias"] = (table[idx.reshape(-1)]
                     .reshape(N, N, NUM_HEADS).transpose(2, 0, 1).astype(F32))
    return p


# ---------------- host-side algebraic folds (exact up to f32 rounding) ----------------
def fuse_params(p):
    scale = 1.0 / math.sqrt(HEAD_DIM)
    g1 = p["ln1_g"].reshape(C, 1)
    b1v = p["ln1_b"]
    # LN1 affine folded into QKV; 1/sqrt(d) folded into the q columns (weights AND bias).
    wq = (g1 * p["wq"]) * scale
    wk = g1 * p["wk"]
    wv = g1 * p["wv"]
    bq = (b1v @ p["wq"] + p["bq"]) * scale
    bk = b1v @ p["wk"] + p["bk"]
    bv = b1v @ p["wv"] + p["bv"]
    # LN2 affine folded into the first MLP matmul.
    g2 = p["ln2_g"].reshape(C, 1)
    b2v = p["ln2_b"]
    w1 = g2 * p["w1"]
    b1 = b2v @ p["w1"] + p["b1"]
    # downsample-LN affine folded into the (bias-free) reduction linear.
    gd = p["dn_g"].reshape(4 * C, 1)
    bd = p["dn_b"]
    w_red = gd * p["w_red"]
    b_red = bd @ p["w_red"]
    return {
        "wqkv": jnp.concatenate([wq, wk, wv], axis=1),          # (C, 3C)
        "bqkv": jnp.concatenate([bq, bk, bv], axis=1),          # (1, 3C)
        "wo": p["wo"], "bo": p["bo"],
        "bias_mask": _attention_bias_mask(p["rel_bias"]),       # (nH, 64, 64)
        "w1": w1, "b1": b1, "w2": p["w2"], "b2": p["b2"],
        "w_red": w_red, "b_red": b_red,
        "sel": _merge_select(),                                  # (4, 16, 64)
    }


# ---------------- pure-JAX reference (HF-faithful windowed attention, unfused params) ----------------
def swin_block_reference(x, p):
    hp = lax.Precision.HIGHEST
    Bh, L, Ch = x.shape
    xt = x.reshape(Bh * L, Ch)
    xn = _layernorm(xt, p["ln1_g"], p["ln1_b"])
    xw = xn.reshape(Bh, H // WINDOW, WINDOW, W // WINDOW, WINDOW, Ch)
    xw = xw.transpose(0, 1, 3, 2, 4, 5).reshape(-1, N, Ch)                # (nW, N, C)

    def heads(t):
        return t.reshape(-1, N, NUM_HEADS, HEAD_DIM).transpose(0, 2, 1, 3)

    q = heads(jnp.dot(xw, p["wq"], precision=hp) + p["bq"])
    k = heads(jnp.dot(xw, p["wk"], precision=hp) + p["bk"])
    v = heads(jnp.dot(xw, p["wv"], precision=hp) + p["bv"])
    s = jnp.einsum("whnd,whmd->whnm", q, k, precision=hp) / math.sqrt(HEAD_DIM)
    s = s + p["rel_bias"][None]
    pr = jax.nn.softmax(s, axis=-1)
    ctx = jnp.einsum("whnm,whmd->whnd", pr, v, precision=hp)
    ctx = ctx.transpose(0, 2, 1, 3).reshape(-1, N, Ch)
    attn = jnp.dot(ctx, p["wo"], precision=hp) + p["bo"]
    attn = attn.reshape(Bh, H // WINDOW, W // WINDOW, WINDOW, WINDOW, Ch)
    attn = attn.transpose(0, 1, 3, 2, 4, 5).reshape(Bh * L, Ch)
    h1 = xt + attn
    y = _layernorm(h1, p["ln2_g"], p["ln2_b"])
    z = _gelu_tanh(jnp.dot(y, p["w1"], precision=hp) + p["b1"])
    z = jnp.dot(z, p["w2"], precision=hp) + p["b2"]
    out = (h1 + z).reshape(Bh, H, W, Ch)
    x0 = out[:, 0::2, 0::2]
    x1 = out[:, 1::2, 0::2]
    x2 = out[:, 0::2, 1::2]
    x3 = out[:, 1::2, 1::2]
    x4 = jnp.concatenate([x0, x1, x2, x3], axis=-1).reshape(-1, 4 * Ch)
    x4 = _layernorm(x4, p["dn_g"], p["dn_b"])
    merged = jnp.dot(x4, p["w_red"], precision=hp)
    return merged.reshape(Bh, (H // 2) * (W // 2), 2 * Ch)


if __name__ == "__main__":
    key = jax.random.PRNGKey(0)
    kx, kp = jax.random.split(key)
    x = jax.random.normal(kx, (B, H * W, C), dtype=F32)
    base_params = init_params(kp)
    kernel_params = fuse_params(base_params)

    fwd = jax.jit(lambda xx: swin_block_forward(xx, kernel_params))
    out = fwd(x)
    jax.block_until_ready(out)

    assert out.shape == (B, (H // 2) * (W // 2), 2 * C), out.shape
    assert bool(jnp.all(jnp.isfinite(out)))

    ref = swin_block_reference(x, base_params)
    err = float(jnp.max(jnp.abs(out - ref)))
    assert err < 2e-2, f"kernel/reference mismatch: max abs err {err}"

    print("KERNEL_OK")
</pallas_src>

<mosaic_0001>
module attributes {stable_mosaic.version = 11 : i64} {
  func.func @swin_block_kernel(%arg0: i32, %arg1: memref<64x32xf32, #tpu.memory_space<vmem>>, %arg2: memref<32x96xf32, #tpu.memory_space<vmem>>, %arg3: memref<1x96xf32, #tpu.memory_space<vmem>>, %arg4: memref<32x32xf32, #tpu.memory_space<vmem>>, %arg5: memref<1x32xf32, #tpu.memory_space<vmem>>, %arg6: memref<4x64x64xf32, #tpu.memory_space<vmem>>, %arg7: memref<32x128xf32, #tpu.memory_space<vmem>>, %arg8: memref<1x128xf32, #tpu.memory_space<vmem>>, %arg9: memref<128x32xf32, #tpu.memory_space<vmem>>, %arg10: memref<1x32xf32, #tpu.memory_space<vmem>>, %arg11: memref<128x64xf32, #tpu.memory_space<vmem>>, %arg12: memref<1x64xf32, #tpu.memory_space<vmem>>, %arg13: memref<4x16x64xf32, #tpu.memory_space<vmem>>, %arg14: memref<16x64xf32, #tpu.memory_space<vmem>>, %arg15: memref<64x32xf32, #tpu.memory_space<vmem>>, %arg16: memref<16x128xf32, #tpu.memory_space<vmem>>) attributes {dimension_semantics = [#tpu.dimension_semantics<parallel>], iteration_bounds = array<i64: 2>, scalar_prefetch = 0 : i64, scratch_operands = 2 : i64, tpu.core_type = #tpu.core_type<tc>, window_params = [{transform_indices = @transform_0, window_bounds = array<i64: 64, 32>}, {pipeline_mode = #tpu.pipeline_mode<synchronous>, transform_indices = @transform_1, window_bounds = array<i64: 32, 96>}, {pipeline_mode = #tpu.pipeline_mode<synchronous>, transform_indices = @transform_2, window_bounds = array<i64: 1, 96>}, {pipeline_mode = #tpu.pipeline_mode<synchronous>, transform_indices = @transform_3, window_bounds = array<i64: 32, 32>}, {pipeline_mode = #tpu.pipeline_mode<synchronous>, transform_indices = @transform_4, window_bounds = array<i64: 1, 32>}, {pipeline_mode = #tpu.pipeline_mode<synchronous>, transform_indices = @transform_5, window_bounds = array<i64: 4, 64, 64>}, {pipeline_mode = #tpu.pipeline_mode<synchronous>, transform_indices = @transform_6, window_bounds = array<i64: 32, 128>}, {pipeline_mode = #tpu.pipeline_mode<synchronous>, transform_indices = @transform_7, window_bounds = array<i64: 1, 128>}, {pipeline_mode = #tpu.pipeline_mode<synchronous>, transform_indices = @transform_8, window_bounds = array<i64: 128, 32>}, {pipeline_mode = #tpu.pipeline_mode<synchronous>, transform_indices = @transform_9, window_bounds = array<i64: 1, 32>}, {pipeline_mode = #tpu.pipeline_mode<synchronous>, transform_indices = @transform_10, window_bounds = array<i64: 128, 64>}, {pipeline_mode = #tpu.pipeline_mode<synchronous>, transform_indices = @transform_11, window_bounds = array<i64: 1, 64>}, {pipeline_mode = #tpu.pipeline_mode<synchronous>, transform_indices = @transform_12, window_bounds = array<i64: 4, 16, 64>}, {transform_indices = @transform_13, window_bounds = array<i64: 16, 64>}]} {
    %c0 = arith.constant 0 : index
    %c0_0 = arith.constant 0 : index
    %0 = vector.load %arg1[%c0, %c0_0] : memref<64x32xf32, #tpu.memory_space<vmem>>, vector<64x32xf32>
    %cst = arith.constant dense<0.000000e+00> : vector<64xf32>
    %1 = vector.multi_reduction <add>, %0, %cst [1] : vector<64x32xf32> to vector<64xf32>
    %2 = vector.shape_cast %1 : vector<64xf32> to vector<64x1xf32>
    %cst_1 = arith.constant 3.200000e+01 : f32
    %3 = vector.broadcast %cst_1 : f32 to vector<64x1xf32>
    %4 = arith.divf %2, %3 : vector<64x1xf32>
    %5 = vector.broadcast %4 : vector<64x1xf32> to vector<64x32xf32>
    %6 = arith.subf %0, %5 : vector<64x32xf32>
    %7 = arith.mulf %6, %6 : vector<64x32xf32>
    %cst_2 = arith.constant dense<0.000000e+00> : vector<64xf32>
    %8 = vector.multi_reduction <add>, %7, %cst_2 [1] : vector<64x32xf32> to vector<64xf32>
    %9 = vector.shape_cast %8 : vector<64xf32> to vector<64x1xf32>
    %cst_3 = arith.constant 3.200000e+01 : f32
    %10 = vector.broadcast %cst_3 : f32 to vector<64x1xf32>
    %11 = arith.divf %9, %10 : vector<64x1xf32>
    %cst_4 = arith.constant 9.99999974E-6 : f32
    %12 = vector.broadcast %cst_4 : f32 to vector<64x1xf32>
    %13 = arith.addf %11, %12 : vector<64x1xf32>
    %14 = math.rsqrt %13 : vector<64x1xf32>
    %15 = vector.broadcast %14 : vector<64x1xf32> to vector<64x32xf32>
    %16 = arith.mulf %6, %15 : vector<64x32xf32>
    %c0_5 = arith.constant 0 : index
    %c0_6 = arith.constant 0 : index
    %17 = vector.load %arg2[%c0_5, %c0_6] : memref<32x96xf32, #tpu.memory_space<vmem>>, vector<32x96xf32>
    %cst_7 = arith.constant dense<0.000000e+00> : vector<64x96xf32>
    %18 = tpu.matmul %16, %17, %cst_7 {dimension_numbers = #tpu.dot_dimension_numbers<[1], [0], [0], [1], [0, 0, 1, 1], [], []>} : vector<64x32xf32>, vector<32x96xf32>, vector<64x96xf32> -> vector<64x96xf32>
    %c0_8 = arith.constant 0 : index
    %c0_9 = arith.constant 0 : index
    %19 = vector.load %arg3[%c0_8, %c0_9] : memref<1x96xf32, #tpu.memory_space<vmem>>, vector<1x96xf32>
    %20 = vector.broadcast %19 : vector<1x96xf32> to vector<64x96xf32>
    %21 = arith.addf %18, %20 : vector<64x96xf32>
    %22 = vector.extract_strided_slice %21 {offsets = [0, 0], sizes = [64, 8], strides = [1, 1]} : vector<64x96xf32> to vector<64x8xf32>
    %23 = vector.extract_strided_slice %21 {offsets = [0, 32], sizes = [64, 8], strides = [1, 1]} : vector<64x96xf32> to vector<64x8xf32>
    %24 = vector.extract_strided_slice %21 {offsets = [0, 64], sizes = [64, 8], strides = [1, 1]} : vector<64x96xf32> to vector<64x8xf32>
    %cst_10 = arith.constant dense<0.000000e+00> : vector<64x64xf32>
    %25 = tpu.matmul %22, %23, %cst_10 {dimension_numbers = #tpu.dot_dimension_numbers<[1], [1], [0], [0], [0, 0, 1, 0], [], []>} : vector<64x8xf32>, vector<64x8xf32>, vector<64x64xf32> -> vector<64x64xf32>
    %c0_11 = arith.constant 0 : index
    %c0_12 = arith.constant 0 : index
    %c0_13 = arith.constant 0 : index
    %26 = vector.load %arg6[%c0_11, %c0_12, %c0_13] : memref<4x64x64xf32, #tpu.memory_space<vmem>>, vector<1x64x64xf32>
    %27 = vector.shape_cast %26 : vector<1x64x64xf32> to vector<64x64xf32>
    %28 = arith.addf %25, %27 : vector<64x64xf32>
    %cst_14 = arith.constant dense<0xFF800000> : vector<64xf32>
    %29 = vector.multi_reduction <maximumf>, %28, %cst_14 [1] : vector<64x64xf32> to vector<64xf32>
    %30 = vector.shape_cast %29 : vector<64xf32> to vector<64x1xf32>
    %31 = vector.broadcast %30 : vector<64x1xf32> to vector<64x64xf32>
    %32 = arith.subf %28, %31 : vector<64x64xf32>
    %33 = math.exp %32 : vector<64x64xf32>
    %cst_15 = arith.constant dense<0.000000e+00> : vector<64x8xf32>
    %34 = tpu.matmul %33, %24, %cst_15 {dimension_numbers = #tpu.dot_dimension_numbers<[1], [0], [0], [1], [0, 0, 1, 1], [], []>} : vector<64x64xf32>, vector<64x8xf32>, vector<64x8xf32> -> vector<64x8xf32>
    %cst_16 = arith.constant dense<0.000000e+00> : vector<64xf32>
    %35 = vector.multi_reduction <add>, %33, %cst_16 [1] : vector<64x64xf32> to vector<64xf32>
    %36 = vector.shape_cast %35 : vector<64xf32> to vector<64x1xf32>
    %37 = tpu.reciprocal %36 {approx = true} : vector<64x1xf32> -> vector<64x1xf32>
    %38 = vector.broadcast %37 : vector<64x1xf32> to vector<64x8xf32>
    %39 = arith.mulf %34, %38 : vector<64x8xf32>
    %c0_17 = arith.constant 0 : index
    %c0_18 = arith.constant 0 : index
    %40 = vector.load %arg15[%c0_17, %c0_18] : memref<64x32xf32, #tpu.memory_space<vmem>>, vector<64x8xf32>
    tpu.vector_store %arg15[%c0_17, %c0_18], %39 {strides = array<i32>} : memref<64x32xf32, #tpu.memory_space<vmem>>, vector<64x8xf32>,
    %41 = vector.extract_strided_slice %21 {offsets = [0, 8], sizes = [64, 8], strides = [1, 1]} : vector<64x96xf32> to vector<64x8xf32>
    %42 = vector.extract_strided_slice %21 {offsets = [0, 40], sizes = [64, 8], strides = [1, 1]} : vector<64x96xf32> to vector<64x8xf32>
    %43 = vector.extract_strided_slice %21 {offsets = [0, 72], sizes = [64, 8], strides = [1, 1]} : vector<64x96xf32> to vector<64x8xf32>
    %cst_19 = arith.constant dense<0.000000e+00> : vector<64x64xf32>
    %44 = tpu.matmul %41, %42, %cst_19 {dimension_numbers = #tpu.dot_dimension_numbers<[1], [1], [0], [0], [0, 0, 1, 0], [], []>} : vector<64x8xf32>, vector<64x8xf32>, vector<64x64xf32> -> vector<64x64xf32>
    %c1 = arith.constant 1 : index
    %c0_20 = arith.constant 0 : index
    %c0_21 = arith.constant 0 : index
    %45 = vector.load %arg6[%c1, %c0_20, %c0_21] : memref<4x64x64xf32, #tpu.memory_space<vmem>>, vector<1x64x64xf32>
    %46 = vector.shape_cast %45 : vector<1x64x64xf32> to vector<64x64xf32>
    %47 = arith.addf %44, %46 : vector<64x64xf32>
    %cst_22 = arith.constant dense<0xFF800000> : vector<64xf32>
    %48 = vector.multi_reduction <maximumf>, %47, %cst_22 [1] : vector<64x64xf32> to vector<64xf32>
    %49 = vector.shape_cast %48 : vector<64xf32> to vector<64x1xf32>
    %50 = vector.broadcast %49 : vector<64x1xf32> to vector<64x64xf32>
    %51 = arith.subf %47, %50 : vector<64x64xf32>
    %52 = math.exp %51 : vector<64x64xf32>
    %cst_23 = arith.constant dense<0.000000e+00> : vector<64x8xf32>
    %53 = tpu.matmul %52, %43, %cst_23 {dimension_numbers = #tpu.dot_dimension_numbers<[1], [0], [0], [1], [0, 0, 1, 1], [], []>} : vector<64x64xf32>, vector<64x8xf32>, vector<64x8xf32> -> vector<64x8xf32>
    %cst_24 = arith.constant dense<0.000000e+00> : vector<64xf32>
    %54 = vector.multi_reduction <add>, %52, %cst_24 [1] : vector<64x64xf32> to vector<64xf32>
    %55 = vector.shape_cast %54 : vector<64xf32> to vector<64x1xf32>
    %56 = tpu.reciprocal %55 {approx = true} : vector<64x1xf32> -> vector<64x1xf32>
    %57 = vector.broadcast %56 : vector<64x1xf32> to vector<64x8xf32>
    %58 = arith.mulf %53, %57 : vector<64x8xf32>
    %c0_25 = arith.constant 0 : index
    %c8 = arith.constant 8 : index
    %59 = vector.load %arg15[%c0_25, %c8] : memref<64x32xf32, #tpu.memory_space<vmem>>, vector<64x8xf32>
    tpu.vector_store %arg15[%c0_25, %c8], %58 {strides = array<i32>} : memref<64x32xf32, #tpu.memory_space<vmem>>, vector<64x8xf32>,
    %60 = vector.extract_strided_slice %21 {offsets = [0, 16], sizes = [64, 8], strides = [1, 1]} : vector<64x96xf32> to vector<64x8xf32>
    %61 = vector.extract_strided_slice %21 {offsets = [0, 48], sizes = [64, 8], strides = [1, 1]} : vector<64x96xf32> to vector<64x8xf32>
    %62 = vector.extract_strided_slice %21 {offsets = [0, 80], sizes = [64, 8], strides = [1, 1]} : vector<64x96xf32> to vector<64x8xf32>
    %cst_26 = arith.constant dense<0.000000e+00> : vector<64x64xf32>
    %63 = tpu.matmul %60, %61, %cst_26 {dimension_numbers = #tpu.dot_dimension_numbers<[1], [1], [0], [0], [0, 0, 1, 0], [], []>} : vector<64x8xf32>, vector<64x8xf32>, vector<64x64xf32> -> vector<64x64xf32>
    %c2 = arith.constant 2 : index
    %c0_27 = arith.constant 0 : index
    %c0_28 = arith.constant 0 : index
    %64 = vector.load %arg6[%c2, %c0_27, %c0_28] : memref<4x64x64xf32, #tpu.memory_space<vmem>>, vector<1x64x64xf32>
    %65 = vector.shape_cast %64 : vector<1x64x64xf32> to vector<64x64xf32>
    %66 = arith.addf %63, %65 : vector<64x64xf32>
    %cst_29 = arith.constant dense<0xFF800000> : vector<64xf32>
    %67 = vector.multi_reduction <maximumf>, %66, %cst_29 [1] : vector<64x64xf32> to vector<64xf32>
    %68 = vector.shape_cast %67 : vector<64xf32> to vector<64x1xf32>
    %69 = vector.broadcast %68 : vector<64x1xf32> to vector<64x64xf32>
    %70 = arith.subf %66, %69 : vector<64x64xf32>
    %71 = math.exp %70 : vector<64x64xf32>
    %cst_30 = arith.constant dense<0.000000e+00> : vector<64x8xf32>
    %72 = tpu.matmul %71, %62, %cst_30 {dimension_numbers = #tpu.dot_dimension_numbers<[1], [0], [0], [1], [0, 0, 1, 1], [], []>} : vector<64x64xf32>, vector<64x8xf32>, vector<64x8xf32> -> vector<64x8xf32>
    %cst_31 = arith.constant dense<0.000000e+00> : vector<64xf32>
    %73 = vector.multi_reduction <add>, %71, %cst_31 [1] : vector<64x64xf32> to vector<64xf32>
    %74 = vector.shape_cast %73 : vector<64xf32> to vector<64x1xf32>
    %75 = tpu.reciprocal %74 {approx = true} : vector<64x1xf32> -> vector<64x1xf32>
    %76 = vector.broadcast %75 : vector<64x1xf32> to vector<64x8xf32>
    %77 = arith.mulf %72, %76 : vector<64x8xf32>
    %c0_32 = arith.constant 0 : index
    %c16 = arith.constant 16 : index
    %78 = vector.load %arg15[%c0_32, %c16] : memref<64x32xf32, #tpu.memory_space<vmem>>, vector<64x8xf32>
    tpu.vector_store %arg15[%c0_32, %c16], %77 {strides = array<i32>} : memref<64x32xf32, #tpu.memory_space<vmem>>, vector<64x8xf32>,
    %79 = vector.extract_strided_slice %21 {offsets = [0, 24], sizes = [64, 8], strides = [1, 1]} : vector<64x96xf32> to vector<64x8xf32>
    %80 = vector.extract_strided_slice %21 {offsets = [0, 56], sizes = [64, 8], strides = [1, 1]} : vector<64x96xf32> to vector<64x8xf32>
    %81 = vector.extract_strided_slice %21 {offsets = [0, 88], sizes = [64, 8], strides = [1, 1]} : vector<64x96xf32> to vector<64x8xf32>
    %cst_33 = arith.constant dense<0.000000e+00> : vector<64x64xf32>
    %82 = tpu.matmul %79, %80, %cst_33 {dimension_numbers = #tpu.dot_dimension_numbers<[1], [1], [0], [0], [0, 0, 1, 0], [], []>} : vector<64x8xf32>, vector<64x8xf32>, vector<64x64xf32> -> vector<64x64xf32>
    %c3 = arith.constant 3 : index
    %c0_34 = arith.constant 0 : index
    %c0_35 = arith.constant 0 : index
    %83 = vector.load %arg6[%c3, %c0_34, %c0_35] : memref<4x64x64xf32, #tpu.memory_space<vmem>>, vector<1x64x64xf32>
    %84 = vector.shape_cast %83 : vector<1x64x64xf32> to vector<64x64xf32>
    %85 = arith.addf %82, %84 : vector<64x64xf32>
    %cst_36 = arith.constant dense<0xFF800000> : vector<64xf32>
    %86 = vector.multi_reduction <maximumf>, %85, %cst_36 [1] : vector<64x64xf32> to vector<64xf32>
    %87 = vector.shape_cast %86 : vector<64xf32> to vector<64x1xf32>
    %88 = vector.broadcast %87 : vector<64x1xf32> to vector<64x64xf32>
    %89 = arith.subf %85, %88 : vector<64x64xf32>
    %90 = math.exp %89 : vector<64x64xf32>
    %cst_37 = arith.constant dense<0.000000e+00> : vector<64x8xf32>
    %91 = tpu.matmul %90, %81, %cst_37 {dimension_numbers = #tpu.dot_dimension_numbers<[1], [0], [0], [1], [0, 0, 1, 1], [], []>} : vector<64x64xf32>, vector<64x8xf32>, vector<64x8xf32> -> vector<64x8xf32>
    %cst_38 = arith.constant dense<0.000000e+00> : vector<64xf32>
    %92 = vector.multi_reduction <add>, %90, %cst_38 [1] : vector<64x64xf32> to vector<64xf32>
    %93 = vector.shape_cast %92 : vector<64xf32> to vector<64x1xf32>
    %94 = tpu.reciprocal %93 {approx = true} : vector<64x1xf32> -> vector<64x1xf32>
    %95 = vector.broadcast %94 : vector<64x1xf32> to vector<64x8xf32>
    %96 = arith.mulf %91, %95 : vector<64x8xf32>
    %c0_39 = arith.constant 0 : index
    %c24 = arith.constant 24 : index
    %97 = vector.load %arg15[%c0_39, %c24] : memref<64x32xf32, #tpu.memory_space<vmem>>, vector<64x8xf32>
    tpu.vector_store %arg15[%c0_39, %c24], %96 {strides = array<i32>} : memref<64x32xf32, #tpu.memory_space<vmem>>, vector<64x8xf32>,
    %c0_40 = arith.constant 0 : index
    %c0_41 = arith.constant 0 : index
    %98 = vector.load %arg15[%c0_40, %c0_41] : memref<64x32xf32, #tpu.memory_space<vmem>>, vector<64x32xf32>
    %c0_42 = arith.constant 0 : index
    %c0_43 = arith.constant 0 : index
    %99 = vector.load %arg4[%c0_42, %c0_43] : memref<32x32xf32, #tpu.memory_space<vmem>>, vector<32x32xf32>
    %cst_44 = arith.constant dense<0.000000e+00> : vector<64x32xf32>
    %100 = tpu.matmul %98, %99, %cst_44 {dimension_numbers = #tpu.dot_dimension_numbers<[1], [0], [0], [1], [0, 0, 1, 1], [], []>} : vector<64x32xf32>, vector<32x32xf32>, vector<64x32xf32> -> vector<64x32xf32>
    %c0_45 = arith.constant 0 : index
    %c0_46 = arith.constant 0 : index
    %101 = vector.load %arg5[%c0_45, %c0_46] : memref<1x32xf32, #tpu.memory_space<vmem>>, vector<1x32xf32>
    %102 = vector.broadcast %101 : vector<1x32xf32> to vector<64x32xf32>
    %103 = arith.addf %100, %102 : vector<64x32xf32>
    %104 = arith.addf %0, %103 : vector<64x32xf32>
    %cst_47 = arith.constant dense<0.000000e+00> : vector<64xf32>
    %105 = vector.multi_reduction <add>, %104, %cst_47 [1] : vector<64x32xf32> to vector<64xf32>
    %106 = vector.shape_cast %105 : vector<64xf32> to vector<64x1xf32>
    %cst_48 = arith.constant 3.200000e+01 : f32
    %107 = vector.broadcast %cst_48 : f32 to vector<64x1xf32>
    %108 = arith.divf %106, %107 : vector<64x1xf32>
    %109 = vector.broadcast %108 : vector<64x1xf32> to vector<64x32xf32>
    %110 = arith.subf %104, %109 : vector<64x32xf32>
    %111 = arith.mulf %110, %110 : vector<64x32xf32>
    %cst_49 = arith.constant dense<0.000000e+00> : vector<64xf32>
    %112 = vector.multi_reduction <add>, %111, %cst_49 [1] : vector<64x32xf32> to vector<64xf32>
    %113 = vector.shape_cast %112 : vector<64xf32> to vector<64x1xf32>
    %cst_50 = arith.constant 3.200000e+01 : f32
    %114 = vector.broadcast %cst_50 : f32 to vector<64x1xf32>
    %115 = arith.divf %113, %114 : vector<64x1xf32>
    %cst_51 = arith.constant 9.99999974E-6 : f32
    %116 = vector.broadcast %cst_51 : f32 to vector<64x1xf32>
    %117 = arith.addf %115, %116 : vector<64x1xf32>
    %118 = math.rsqrt %117 : vector<64x1xf32>
    %119 = vector.broadcast %118 : vector<64x1xf32> to vector<64x32xf32>
    %120 = arith.mulf %110, %119 : vector<64x32xf32>
    %c0_52 = arith.constant 0 : index
    %c0_53 = arith.constant 0 : index
    %121 = vector.load %arg7[%c0_52, %c0_53] : memref<32x128xf32, #tpu.memory_space<vmem>>, vector<32x128xf32>
    %cst_54 = arith.constant dense<0.000000e+00> : vector<64x128xf32>
    %122 = tpu.matmul %120, %121, %cst_54 {dimension_numbers = #tpu.dot_dimension_numbers<[1], [0], [0], [1], [0, 0, 1, 1], [], []>} : vector<64x32xf32>, vector<32x128xf32>, vector<64x128xf32> -> vector<64x128xf32>
    %c0_55 = arith.constant 0 : index
    %c0_56 = arith.constant 0 : index
    %123 = vector.load %arg8[%c0_55, %c0_56] : memref<1x128xf32, #tpu.memory_space<vmem>>, vector<1x128xf32>
    %124 = vector.broadcast %123 : vector<1x128xf32> to vector<64x128xf32>
    %125 = arith.addf %122, %124 : vector<64x128xf32>
    %cst_57 = arith.constant 5.000000e-01 : f32
    %126 = vector.broadcast %cst_57 : f32 to vector<64x128xf32>
    %127 = arith.mulf %126, %125 : vector<64x128xf32>
    %cst_58 = arith.constant 4.471500e-02 : f32
    %128 = vector.broadcast %cst_58 : f32 to vector<64x128xf32>
    %129 = arith.mulf %128, %125 : vector<64x128xf32>
    %130 = arith.mulf %129, %125 : vector<64x128xf32>
    %131 = arith.mulf %130, %125 : vector<64x128xf32>
    %132 = arith.addf %125, %131 : vector<64x128xf32>
    %cst_59 = arith.constant 0.797884583 : f32
    %133 = vector.broadcast %cst_59 : f32 to vector<64x128xf32>
    %134 = arith.mulf %133, %132 : vector<64x128xf32>
    %135 = math.tanh %134 : vector<64x128xf32>
    %cst_60 = arith.constant 1.000000e+00 : f32
    %136 = vector.broadcast %cst_60 : f32 to vector<64x128xf32>
    %137 = arith.addf %136, %135 : vector<64x128xf32>
    %138 = arith.mulf %127, %137 : vector<64x128xf32>
    %c0_61 = arith.constant 0 : index
    %c0_62 = arith.constant 0 : index
    %139 = vector.load %arg9[%c0_61, %c0_62] : memref<128x32xf32, #tpu.memory_space<vmem>>, vector<128x32xf32>
    %cst_63 = arith.constant dense<0.000000e+00> : vector<64x32xf32>
    %140 = tpu.matmul %138, %139, %cst_63 {dimension_numbers = #tpu.dot_dimension_numbers<[1], [0], [0], [1], [0, 0, 1, 1], [], []>} : vector<64x128xf32>, vector<128x32xf32>, vector<64x32xf32> -> vector<64x32xf32>
    %c0_64 = arith.constant 0 : index
    %c0_65 = arith.constant 0 : index
    %141 = vector.load %arg10[%c0_64, %c0_65] : memref<1x32xf32, #tpu.memory_space<vmem>>, vector<1x32xf32>
    %142 = vector.broadcast %141 : vector<1x32xf32> to vector<64x32xf32>
    %143 = arith.addf %140, %142 : vector<64x32xf32>
    %144 = arith.addf %104, %143 : vector<64x32xf32>
    %c0_66 = arith.constant 0 : index
    %c0_67 = arith.constant 0 : index
    %c0_68 = arith.constant 0 : index
    %145 = vector.load %arg13[%c0_66, %c0_67, %c0_68] : memref<4x16x64xf32, #tpu.memory_space<vmem>>, vector<1x16x64xf32>
    %146 = vector.shape_cast %145 : vector<1x16x64xf32> to vector<16x64xf32>
    %cst_69 = arith.constant dense<0.000000e+00> : vector<16x32xf32>
    %147 = tpu.matmul %146, %144, %cst_69 {dimension_numbers = #tpu.dot_dimension_numbers<[1], [0], [0], [1], [0, 0, 1, 1], [], []>} : vector<16x64xf32>, vector<64x32xf32>, vector<16x32xf32> -> vector<16x32xf32>
    %c0_70 = arith.constant 0 : index
    %c0_71 = arith.constant 0 : index
    %148 = vector.load %arg16[%c0_70, %c0_71] : memref<16x128xf32, #tpu.memory_space<vmem>>, vector<16x32xf32>
    tpu.vector_store %arg16[%c0_70, %c0_71], %147 {strides = array<i32>} : memref<16x128xf32, #tpu.memory_space<vmem>>, vector<16x32xf32>,
    %c1_72 = arith.constant 1 : index
    %c0_73 = arith.constant 0 : index
    %c0_74 = arith.constant 0 : index
    %149 = vector.load %arg13[%c1_72, %c0_73, %c0_74] : memref<4x16x64xf32, #tpu.memory_space<vmem>>, vector<1x16x64xf32>
    %150 = vector.shape_cast %149 : vector<1x16x64xf32> to vector<16x64xf32>
    %cst_75 = arith.constant dense<0.000000e+00> : vector<16x32xf32>
    %151 = tpu.matmul %150, %144, %cst_75 {dimension_numbers = #tpu.dot_dimension_numbers<[1], [0], [0], [1], [0, 0, 1, 1], [], []>} : vector<16x64xf32>, vector<64x32xf32>, vector<16x32xf32> -> vector<16x32xf32>
    %c0_76 = arith.constant 0 : index
    %c32 = arith.constant 32 : index
    %152 = vector.load %arg16[%c0_76, %c32] : memref<16x128xf32, #tpu.memory_space<vmem>>, vector<16x32xf32>
    tpu.vector_store %arg16[%c0_76, %c32], %151 {strides = array<i32>} : memref<16x128xf32, #tpu.memory_space<vmem>>, vector<16x32xf32>,
    %c2_77 = arith.constant 2 : index
    %c0_78 = arith.constant 0 : index
    %c0_79 = arith.constant 0 : index
    %153 = vector.load %arg13[%c2_77, %c0_78, %c0_79] : memref<4x16x64xf32, #tpu.memory_space<vmem>>, vector<1x16x64xf32>
    %154 = vector.shape_cast %153 : vector<1x16x64xf32> to vector<16x64xf32>
    %cst_80 = arith.constant dense<0.000000e+00> : vector<16x32xf32>
    %155 = tpu.matmul %154, %144, %cst_80 {dimension_numbers = #tpu.dot_dimension_numbers<[1], [0], [0], [1], [0, 0, 1, 1], [], []>} : vector<16x64xf32>, vector<64x32xf32>, vector<16x32xf32> -> vector<16x32xf32>
    %c0_81 = arith.constant 0 : index
    %c64 = arith.constant 64 : index
    %156 = vector.load %arg16[%c0_81, %c64] : memref<16x128xf32, #tpu.memory_space<vmem>>, vector<16x32xf32>
    tpu.vector_store %arg16[%c0_81, %c64], %155 {strides = array<i32>} : memref<16x128xf32, #tpu.memory_space<vmem>>, vector<16x32xf32>,
    %c3_82 = arith.constant 3 : index
    %c0_83 = arith.constant 0 : index
    %c0_84 = arith.constant 0 : index
    %157 = vector.load %arg13[%c3_82, %c0_83, %c0_84] : memref<4x16x64xf32, #tpu.memory_space<vmem>>, vector<1x16x64xf32>
    %158 = vector.shape_cast %157 : vector<1x16x64xf32> to vector<16x64xf32>
    %cst_85 = arith.constant dense<0.000000e+00> : vector<16x32xf32>
    %159 = tpu.matmul %158, %144, %cst_85 {dimension_numbers = #tpu.dot_dimension_numbers<[1], [0], [0], [1], [0, 0, 1, 1], [], []>} : vector<16x64xf32>, vector<64x32xf32>, vector<16x32xf32> -> vector<16x32xf32>
    %c0_86 = arith.constant 0 : index
    %c96 = arith.constant 96 : index
    %160 = vector.load %arg16[%c0_86, %c96] : memref<16x128xf32, #tpu.memory_space<vmem>>, vector<16x32xf32>
    tpu.vector_store %arg16[%c0_86, %c96], %159 {strides = array<i32>} : memref<16x128xf32, #tpu.memory_space<vmem>>, vector<16x32xf32>,
    %c0_87 = arith.constant 0 : index
    %c0_88 = arith.constant 0 : index
    %161 = vector.load %arg16[%c0_87, %c0_88] : memref<16x128xf32, #tpu.memory_space<vmem>>, vector<16x128xf32>
    %cst_89 = arith.constant dense<0.000000e+00> : vector<16xf32>
    %162 = vector.multi_reduction <add>, %161, %cst_89 [1] : vector<16x128xf32> to vector<16xf32>
    %163 = vector.shape_cast %162 : vector<16xf32> to vector<16x1xf32>
    %cst_90 = arith.constant 1.280000e+02 : f32
    %164 = vector.broadcast %cst_90 : f32 to vector<16x1xf32>
    %165 = arith.divf %163, %164 : vector<16x1xf32>
    %166 = vector.broadcast %165 : vector<16x1xf32> to vector<16x128xf32>
    %167 = arith.subf %161, %166 : vector<16x128xf32>
    %168 = arith.mulf %167, %167 : vector<16x128xf32>
    %cst_91 = arith.constant dense<0.000000e+00> : vector<16xf32>
    %169 = vector.multi_reduction <add>, %168, %cst_91 [1] : vector<16x128xf32> to vector<16xf32>
    %170 = vector.shape_cast %169 : vector<16xf32> to vector<16x1xf32>
    %cst_92 = arith.constant 1.280000e+02 : f32
    %171 = vector.broadcast %cst_92 : f32 to vector<16x1xf32>
    %172 = arith.divf %170, %171 : vector<16x1xf32>
    %cst_93 = arith.constant 9.99999974E-6 : f32
    %173 = vector.broadcast %cst_93 : f32 to vector<16x1xf32>
    %174 = arith.addf %172, %173 : vector<16x1xf32>
    %175 = math.rsqrt %174 : vector<16x1xf32>
    %176 = vector.broadcast %175 : vector<16x1xf32> to vector<16x128xf32>
    %177 = arith.mulf %167, %176 : vector<16x128xf32>
    %c0_94 = arith.constant 0 : index
    %c0_95 = arith.constant 0 : index
    %178 = vector.load %arg11[%c0_94, %c0_95] : memref<128x64xf32, #tpu.memory_space<vmem>>, vector<128x64xf32>
    %cst_96 = arith.constant dense<0.000000e+00> : vector<16x64xf32>
    %179 = tpu.matmul %177, %178, %cst_96 {dimension_numbers = #tpu.dot_dimension_numbers<[1], [0], [0], [1], [0, 0, 1, 1], [], []>} : vector<16x128xf32>, vector<128x64xf32>, vector<16x64xf32> -> vector<16x64xf32>
    %c0_97 = arith.constant 0 : index
    %c0_98 = arith.constant 0 : index
    %180 = vector.load %arg12[%c0_97, %c0_98] : memref<1x64xf32, #tpu.memory_space<vmem>>, vector<1x64xf32>
    %181 = vector.broadcast %180 : vector<1x64xf32> to vector<16x64xf32>
    %182 = arith.addf %179, %181 : vector<16x64xf32>
    %c0_99 = arith.constant 0 : index
    %c0_100 = arith.constant 0 : index
    %183 = vector.load %arg14[%c0_99, %c0_100] : memref<16x64xf32, #tpu.memory_space<vmem>>, vector<16x64xf32>
    tpu.vector_store %arg14[%c0_99, %c0_100], %182 {strides = array<i32>} : memref<16x64xf32, #tpu.memory_space<vmem>>, vector<16x64xf32>,
    return
  }
  func.func @transform_0(%arg0: i32) -> (i32, i32) {
    %c0_i32 = arith.constant 0 : i32
    %c0_i32_0 = arith.constant 0 : i32
    return %arg0, %c0_i32 : i32, i32
  }
  func.func @transform_1(%arg0: i32) -> (i32, i32) {
    %c0_i32 = arith.constant 0 : i32
    %c0_i32_0 = arith.constant 0 : i32
    %c0_i32_1 = arith.constant 0 : i32
    return %c0_i32, %c0_i32_0 : i32, i32
  }
  func.func @transform_2(%arg0: i32) -> (i32, i32) {
    %c0_i32 = arith.constant 0 : i32
    %c0_i32_0 = arith.constant 0 : i32
    %c0_i32_1 = arith.constant 0 : i32
    return %c0_i32, %c0_i32_0 : i32, i32
  }
  func.func @transform_3(%arg0: i32) -> (i32, i32) {
    %c0_i32 = arith.constant 0 : i32
    %c0_i32_0 = arith.constant 0 : i32
    %c0_i32_1 = arith.constant 0 : i32
    return %c0_i32, %c0_i32_0 : i32, i32
  }
  func.func @transform_4(%arg0: i32) -> (i32, i32) {
    %c0_i32 = arith.constant 0 : i32
    %c0_i32_0 = arith.constant 0 : i32
    %c0_i32_1 = arith.constant 0 : i32
    return %c0_i32, %c0_i32_0 : i32, i32
  }
  func.func @transform_5(%arg0: i32) -> (i32, i32, i32) {
    %c0_i32 = arith.constant 0 : i32
    %c0_i32_0 = arith.constant 0 : i32
    %c0_i32_1 = arith.constant 0 : i32
    %c0_i32_2 = arith.constant 0 : i32
    return %c0_i32, %c0_i32_0, %c0_i32_1 : i32, i32, i32
  }
  func.func @transform_6(%arg0: i32) -> (i32, i32) {
    %c0_i32 = arith.constant 0 : i32
    %c0_i32_0 = arith.constant 0 : i32
    %c0_i32_1 = arith.constant 0 : i32
    return %c0_i32, %c0_i32_0 : i32, i32
  }
  func.func @transform_7(%arg0: i32) -> (i32, i32) {
    %c0_i32 = arith.constant 0 : i32
    %c0_i32_0 = arith.constant 0 : i32
    %c0_i32_1 = arith.constant 0 : i32
    return %c0_i32, %c0_i32_0 : i32, i32
  }
  func.func @transform_8(%arg0: i32) -> (i32, i32) {
    %c0_i32 = arith.constant 0 : i32
    %c0_i32_0 = arith.constant 0 : i32
    %c0_i32_1 = arith.constant 0 : i32
    return %c0_i32, %c0_i32_0 : i32, i32
  }
  func.func @transform_9(%arg0: i32) -> (i32, i32) {
    %c0_i32 = arith.constant 0 : i32
    %c0_i32_0 = arith.constant 0 : i32
    %c0_i32_1 = arith.constant 0 : i32
    return %c0_i32, %c0_i32_0 : i32, i32
  }
  func.func @transform_10(%arg0: i32) -> (i32, i32) {
    %c0_i32 = arith.constant 0 : i32
    %c0_i32_0 = arith.constant 0 : i32
    %c0_i32_1 = arith.constant 0 : i32
    return %c0_i32, %c0_i32_0 : i32, i32
  }
  func.func @transform_11(%arg0: i32) -> (i32, i32) {
    %c0_i32 = arith.constant 0 : i32
    %c0_i32_0 = arith.constant 0 : i32
    %c0_i32_1 = arith.constant 0 : i32
    return %c0_i32, %c0_i32_0 : i32, i32
  }
  func.func @transform_12(%arg0: i32) -> (i32, i32, i32) {
    %c0_i32 = arith.constant 0 : i32
    %c0_i32_0 = arith.constant 0 : i32
    %c0_i32_1 = arith.constant 0 : i32
    %c0_i32_2 = arith.constant 0 : i32
    return %c0_i32, %c0_i32_0, %c0_i32_1 : i32, i32, i32
  }
  func.func @transform_13(%arg0: i32) -> (i32, i32) {
    %c0_i32 = arith.constant 0 : i32
    %c0_i32_0 = arith.constant 0 : i32
    return %arg0, %c0_i32 : i32, i32
  }
}

</mosaic_0001>

<bundles_post_ra>
// kernel: _lambda_.1
= control target key start
LH: loop header
LB: loop body
LE: loop exit
PB: predicated region body
PF: predicated region fallthrough
CT: control target
= control target key end

     0   :  { %s6589_s0 = inlined_call_operand.vmem [shape: f32[128,32], index: 0, kind: input, shape index: {}]   ;;  %s6590_s1 = inlined_call_operand.hbm [shape: f32[32,96], index: 1, kind: input, shape index: {}]   ;;  %s6591_s2 = inlined_call_operand.vmem [shape: f32[1,96], index: 2, kind: input, shape index: {}]   ;;  %s6592_s3 = inlined_call_operand.hbm [shape: f32[32,32], index: 3, kind: input, shape index: {}]   ;;  %s6593_s4 = inlined_call_operand.vmem [shape: f32[1,32], index: 4, kind: input, shape index: {}]   ;;  %s6594_s5 = inlined_call_operand.hbm [shape: f32[4,64,64], index: 5, kind: input, shape index: {}]   ;;  %s6595_s6 = inlined_call_operand.hbm [shape: f32[32,128], index: 6, kind: input, shape index: {}]   ;;  %s6596_s7 = inlined_call_operand.vmem [shape: f32[1,128], index: 7, kind: input, shape index: {}]   ;;  %s6597_s8 = inlined_call_operand.hbm [shape: f32[128,32], index: 8, kind: input, shape index: {}]   ;;  %s6598_s9 = inlined_call_operand.vmem [shape: f32[1,32], index: 9, kind: input, shape index: {}]   ;;  %s6599_s10 = inlined_call_operand.vmem [shape: f32[128,64], index: 10, kind: input, shape index: {}]   ;;  %s6600_s11 = inlined_call_operand.vmem [shape: f32[1,64], index: 11, kind: input, shape index: {}]   ;;  %s6601_s12 = inlined_call_operand.vmem [shape: f32[4,16,64], index: 12, kind: input, shape index: {}]   ;;  %s6602_s13 = inlined_call_operand.hbm [shape: f32[32,64], index: 13, kind: output, shape index: {}]  }
   0x1   :  { %6609 = sst [smem:[#allocation26_spill]] %s6592_s3 }
   0x2   :  { %18 = vsyncpa [#allocation5], 0 }
   0x3   :  { %19 = vsyncpa [#allocation8], 0 }
   0x4   :  { %20 = vsyncpa [#allocation11], 0 }
   0x5   :  { %21 = vsyncpa [#allocation6], 0 }
   0x6   :  { %23 = vsyncpa [#allocation6 + $0x1], 0  ;;  %s5239_s25 = smov 0   ;;  %s5241_s26 = smov 0  }
   0x7   :  { %s5243_s27 = smov 0   ;;  %s5245_s28 = smov 0  }
   0x8 LB: > { %6610 = sst [smem:[#allocation18_spill]] %s5131_s25  ;;  %s5260_s29 = sadd.s32 4294967295, %s5143_s28   ;;  %s5143_s28 = sphi %s5245_s28, %s6635_s28   ;;  %s5139_s27 = sphi %s5243_s27, %s6637_s27   ;;  %s5135_s26 = sphi %s5241_s26, %s6639_s26   ;;  %s5131_s25 = sphi %s5239_s25, %s6638_s25  }
   0x9   : > { %6611 = sst [smem:[#allocation19_spill]] %s5139_s27  ;;  %s3798_s30 = sadd.s32 4294967294, %s5143_s28  }
   0xa   : > { %s5264_s14 = sadd.s32 1, %s5143_s28   ;;  %s314_s15 = sadd.s32 1, %s5139_s27 }
   0xb   : > { %6612 = sst [smem:[#allocation20_spill]] %s5264_s14  ;;  %s311_s16 = ssub.s32 %s5143_s28, %s5264_s14 }
   0xc   : > { %p324_p0 = scmp.ne.s32.totalorder %s5139_s27, %s5135_s26  ;;  %p312_p1 = scmp.eq.s32.totalorder %s311_s16, 0 }
   0xd   : > { %p325_p2 = scmp.eq.s32.totalorder %s5260_s29, 1  ;;  %p330_p3 = scmp.ne.s32.totalorder %s5135_s26, %s5131_s25 }
   0xe   : > { %p331_p4 = scmp.eq.s32.totalorder %s3798_s30, 1  ;;  %p3799_p7 = scmp.ge.s32.totalorder %s5143_s28, 1 }
   0xf   : > { %s5275_s17 = scalar_select %p312_p1, %s5139_s27, %s314_s15  }
  0x10   : > { %p5277_p5 = por %p325_p2, %p324_p0  ;;  %p5281_p6 = por %p331_p4, %p330_p3 }
  0x11   : > { %6613 = sst [smem:[#allocation21_spill]] %s5275_s17  ;;  %p338_p8 = scmp.lt.s32.totalorder %s5143_s28, 3 }
  0x12   : > { %s6615_s19 = scalar_select %p5281_p6, 1, 0 }
  0x13   : > { %p6608_p9 = scmp.eq.s32.totalorder %s5260_s29, 0  ;;  %p5288_p10 = pnand %p3799_p7, %p338_p8 }
  0x14   : > { %6616 = sst [smem:[#allocation22_spill]] %s6615_s19  ;;  %s5145_s21 = smov [#allocation7]  }
  0x15   : > { %p4667_p11 = pneg %p5288_p10  ;;  %s366_s22 = sshll.u32 %s5145_s21, 4  ;;  %s367_s22 = int_to_ptr.vmem [resolvable:$true] %s366_s22 }
  0x16   : > { %s5146_s24 = smov [#allocation10]   ;;  %s5147_s15 = smov [#allocation4]  }
  0x17   : > { %p5296_p12 = pnand %p6608_p9, %p4667_p11  ;;  %s395_s30 = sshll.u32 %s5146_s24, 4  ;;  %s396_s30 = int_to_ptr.vmem [resolvable:$true] %s395_s30 }
  0x18   : > { %s350_s16 = sshll.u32 %s5147_s15, 4  ;;  %s4952_s27 = scalar_lea.vmem %s367_s22, 512  ;;  %s351_s16 = int_to_ptr.vmem [resolvable:$true] %s350_s16 }
  0x19   : > { %p5302_p13 = pneg %p5296_p12  ;;  %p4953_p0 = scmp.ne.s32.totalorder %s367_s22, %s4952_s27 }
  0x1a   : > { %p4960_p3 = scmp.lt.s32.totalorder %s367_s22, %s367_s22  ;;  %p4961_p4 = scmp.lt.s32.totalorder %s4952_s27, %s4952_s27 }
  0x1b   : > { %p4955_p1 = pnand %p4953_p0, %p5302_p13 }
  0x1c   : > { %p4962_p7 = por %p4961_p4, %p4960_p3 }
  0x1d   : > { %p4956_p2 = pneg %p4955_p1 }
  0x1f   : > { %p4963_p8 = pnand %p4962_p7, %p4956_p2 }
  0x21   : > { %4966 = shalt.err (!%p4963_p8)
}
  0x22   : > { %s5148_s21 = smov 128   ;;  %s5149_s24 = smov 8  }
  0x23   : > { %s6620_s3 = sld [smem:[#allocation26_spill]]  ;;  %s4978_s19 = scalar_lea.vmem %s396_s30, 512 }
  0x24   : > { %p4979_p11 = scmp.ne.s32.totalorder %s396_s30, %s4978_s19  ;;  %p4986_p3 = scmp.lt.s32.totalorder %s396_s30, %s396_s30 }
  0x25   : > { %p4987_p2 = scmp.lt.s32.totalorder %s4978_s19, %s4978_s19 }
  0x26   : > { %p4981_p0 = pnand %p4979_p11, %p5302_p13 }
  0x27   : > { %p4988_p4 = por %p4987_p2, %p4986_p3 }
  0x28   : > { %p4982_p1 = pneg %p4981_p0 }
  0x29   : > { %4673 = dma.hbm_to_vmem [thread:$0]  (!%p5296_p12), %s6620_s3, 512, %s367_s22, [#allocation8], %s5148_s21, %s5148_s21, %s5149_s24  }
  0x2a   : > { %p4989_p7 = pnand %p4988_p4, %p4982_p1 }
  0x2c   : > { %4992 = shalt.err (!%p4989_p7)
}
  0x2d   : > { %4679 = dma.hbm_to_vmem [thread:$0]  (!%p5296_p12), %s6595_s6, 512, %s396_s30, [#allocation11], %s5148_s21, %s5148_s21, %s5149_s24  }
  0x2e   : > { %s5004_s14 = scalar_lea.vmem %s351_s16, 512  ;;  %p5012_p9 = scmp.lt.s32.totalorder %s351_s16, %s351_s16 }
  0x2f   : > { %p5005_p8 = scmp.ne.s32.totalorder %s351_s16, %s5004_s14  ;;  %p5013_p3 = scmp.lt.s32.totalorder %s5004_s14, %s5004_s14 }
  0x31   : > { %p5007_p11 = pnand %p5005_p8, %p5302_p13  ;;  %p5014_p1 = por %p5013_p3, %p5012_p9 }
  0x33   : > { %p5008_p0 = pneg %p5007_p11 }
  0x35   : > { %p5015_p2 = pnand %p5014_p1, %p5008_p0 }
  0x37   : > { %5018 = shalt.err (!%p5015_p2)
}
  0x38   : > { %4670 = dma.hbm_to_vmem [thread:$0]  (!%p5296_p12), %s6590_s1, 512, %s351_s16, [#allocation5], %s5148_s21, %s5148_s21, %s5149_s24  }
  0x39   : > { %s5150_s22 = smov [#allocation9]   ;;  %s5151_s15 = smov [#allocation12]  }
  0x3a   : > { %s382_s30 = sshll.u32 %s5150_s22, 4  ;;  %s411_s27 = sshll.u32 %s5151_s15, 4  ;;  %s383_s30 = int_to_ptr.vmem [resolvable:$true] %s382_s30  ;;  %s412_s27 = int_to_ptr.vmem [resolvable:$true] %s411_s27 }
  0x3b   : > { %s5030_s3 = scalar_lea.vmem %s383_s30, 4096  ;;  %p5038_p8 = scmp.lt.s32.totalorder %s383_s30, %s383_s30 }
  0x3c   : > { %p5031_p4 = scmp.ne.s32.totalorder %s383_s30, %s5030_s3  ;;  %p5039_p11 = scmp.lt.s32.totalorder %s5030_s3, %s5030_s3 }
  0x3e   : > { %p5033_p9 = pnand %p5031_p4, %p5302_p13  ;;  %p5040_p0 = por %p5039_p11, %p5038_p8 }
  0x40   : > { %p5034_p7 = pneg %p5033_p9 }
  0x42   : > { %p5041_p3 = pnand %p5040_p0, %p5034_p7 }
  0x44   : > { %5044 = shalt.err (!%p5041_p3)
}
  0x45   : > { %4676 = dma.hbm_to_vmem [thread:$0]  (!%p5296_p12), %s6594_s5, 4096, %s383_s30, [#allocation8], %s5148_s21, %s5148_s21, %s5149_s24  }
  0x46   : > { %s5056_s19 = scalar_lea.vmem %s412_s27, 2048  ;;  %p5064_p9 = scmp.lt.s32.totalorder %s412_s27, %s412_s27 }
  0x47   : > { %p5057_p1 = scmp.ne.s32.totalorder %s412_s27, %s5056_s19  ;;  %p5065_p8 = scmp.lt.s32.totalorder %s5056_s19, %s5056_s19 }
  0x49   : > { %p5059_p2 = pnand %p5057_p1, %p5302_p13  ;;  %p5066_p7 = por %p5065_p8, %p5064_p9 }
  0x4b   : > { %p5060_p4 = pneg %p5059_p2 }
  0x4d   : > { %p5067_p11 = pnand %p5066_p7, %p5060_p4 }
  0x4f   : > { %5070 = shalt.err (!%p5067_p11)
}
  0x50   : > { %4682 = dma.hbm_to_vmem [thread:$0]  (!%p5296_p12), %s6597_s8, 2048, %s412_s27, [#allocation11], %s5148_s21, %s5148_s21, %s5149_s24  }
  0x51   : > { %448 = sbr.rel (%p5288_p10) target bundleno = 4155 (0x103b), region = 72 }
  0x56   : > { %p6621_p13 = scmp.eq.s32.totalorder %s5260_s29, 0 }
  0x58   : > { %5114 = dma.done.wait (%p6621_p13), [#allocation5], 512   ;;  %p6622_p0 = pmov %p6621_p13 }
  0x5a   : > { %5116 = vsyncadd (%p6622_p0), [#allocation5], 4294966784  ;;  %p6623_p3 = pmov %p6622_p0 }
  0x5b   : > { %p6624_p1 = pmov %p6622_p0 }
  0x5c   : > { %5118 = dma.done.wait (%p6623_p3), [#allocation8], 4608  }
  0x5d   : > { %5120 = vsyncadd (%p6624_p1), [#allocation8], 4294962688  ;;  %p6625_p2 = pmov %p6622_p0 }
  0x5e   : > { %p6626_p12 = pmov %p6622_p0 }
  0x5f   : > { %5122 = dma.done.wait (%p6625_p2), [#allocation11], 2560  }
  0x60   : > { %5124 = vsyncadd (%p6626_p12), [#allocation11], 4294964736  ;;  %s3813_s17 = sshll.u32 %s5260_s29, 3  ;;  %vm523_vm0 = vcmask 261120   ;;  %v632_v56 = vld [vmem:[#allocation4 + $0x18] sm:$0xff]  ;;  %v631_v57 = vld [vmem:[#allocation4 + $0x10] sm:$0xff] }
  0x61   : > { %p509_p10 = scmp.lt.s32.totalorder %s3813_s17, 15  ;;  %4206 = vmatprep.subr.mxu0 %v632_v56  ;;  %v630_v58 = vld [vmem:[#allocation4 + $0x8] sm:$0xff]  ;;  %v629_v59 = vld [vmem:[#allocation4] sm:$0xff]  ;;  %vm801_vm1 = vcmask 64512   ;;  %s5152_s15 = smov 96   ;;  %vm939_vm2 = vcmask 523264  }
  0x62   : > { %4207 = vmatpush3.msra.mxu0 %v632_v56  ;;  %s5153_s27 = smov 64   ;;  %s5154_s16 = smov 88   ;;  %vm1640_vm3 = vcmask 130112   ;;  %vm2100_vm4 = vcmask 195712   ;;  %vm2560_vm5 = vcmask 261312   ;;  %vm3354_vm6 = vcmask 523520  }
  0x63   : > { %s6641_s17 = smov (!%p509_p10, %s3813_s17), 15  ;;  %4208 = vmatprep.subr.mxu0 %v631_v57  ;;  %s5155_s14 = smov 80   ;;  %vm3449_vm7 = vcmask 785920   ;;  %vm3544_vm8 = vcmask 1048320  }
  0x64   : > { %s3814_s20 = sshll.u32 %s6641_s17, 3  ;;  %4209 = vmatpush3.msra.mxu0 %v631_v57  ;;  %s5156_s19 = smov 120  }
  0x65   : > { %s5374_s24 = scalar_lea.vmem %s6589_s0, %s3814_s20  ;;  %4210 = vmatprep.subr.mxu0 %v630_v58  ;;  %s5157_s3 = smov 112  }
  0x66   : > { %v515_v0 = vld [vmem:[%s5374_s24] sm:$0xff]  ;;  %v517_v1 = vld [vmem:[%s5374_s24 + $0x10] sm:$0xff]  ;;  %v516_v2 = vld [vmem:[%s5374_s24 + $0x8] sm:$0xff]  ;;  %4211 = vmatpush3.msra.mxu0 %v630_v58  ;;  %s5158_s25 = smov 56   ;;  %s5159_s17 = smov 48  }
  0x67   : > { %v524_v3 = vsel %vm523_vm0, %v515_v0, 0.0  ;;  %v530_v4 = vsel %vm523_vm0, %v517_v1, 0.0  ;;  %v518_v5 = vld [vmem:[%s5374_s24 + $0x18] sm:$0xff]  ;;  %v527_v6 = vsel %vm523_vm0, %v516_v2, 0.0  ;;  %v519_v8 = vld [vmem:[%s5374_s24 + $0x20] sm:$0xff]  ;;  %v520_v9 = vld [vmem:[%s5374_s24 + $0x28] sm:$0xff]  ;;  %4212 = vmatprep.subr.mxu0 %v629_v59 }
  0x68   : > { %525 = vadd.xlane.f32.xlu0 %v524_v3  ;;  %531 = vadd.xlane.f32.xlu1 %v530_v4  ;;  %v533_v7 = vsel %vm523_vm0, %v518_v5, 0.0  ;;  %v536_v10 = vsel %vm523_vm0, %v519_v8, 0.0  ;;  %v539_v11 = vsel %vm523_vm0, %v520_v9, 0.0  ;;  %v521_v12 = vld [vmem:[%s5374_s24 + $0x30] sm:$0xff]  ;;  %v522_v13 = vld [vmem:[%s5374_s24 + $0x38] sm:$0xff]  ;;  %s5160_s20 = smov 72  }
  0x69   : > { %v542_v14 = vsel %vm523_vm0, %v521_v12, 0.0  ;;  %v545_v15 = vsel %vm523_vm0, %v522_v13, 0.0  ;;  %4213 = vmatpush3.msra.mxu0 %v629_v59  ;;  %s5161_s23 = smov 104   ;;  %s5162_s21 = smov 40  }
  0x6a   : > { %s5163_s22 = smov 8   ;;  %s5164_s30 = smov 16  }
  0x6c   : > { %528 = vadd.xlane.f32.xlu0 %v527_v6  ;;  %534 = vadd.xlane.f32.xlu1 %v533_v7 }
  0x70   : > { %537 = vadd.xlane.f32.xlu0 %v536_v10  ;;  %540 = vadd.xlane.f32.xlu1 %v539_v11 }
  0x74   : > { %543 = vadd.xlane.f32.xlu0 %v542_v14  ;;  %546 = vadd.xlane.f32.xlu1 %v545_v15 }
  0xf1   : > { %v526_v16 = vpop.xlane.xlu0 %525  ;;  %v532_v17 = vpop.xlane.xlu1 %531 }
  0xf2   : > { %v549_v18 = vmul.f32 0.03125, %v526_v16  ;;  %v551_v19 = vmul.f32 0.03125, %v532_v17 }
  0xf4   : > { %v5392_v20 = vsub.f32 %v515_v0, %v549_v18  ;;  %v5394_v21 = vsub.f32 %v517_v1, %v551_v19 }
  0xf5   : > { %v529_v22 = vpop.xlane.xlu0 %528  ;;  %v535_v23 = vpop.xlane.xlu1 %534 }
  0xf6   : > { %v550_v24 = vmul.f32 0.03125, %v529_v22  ;;  %v552_v25 = vmul.f32 0.03125, %v535_v23  ;;  %v565_v26 = vmul.f32 %v5392_v20, %v5392_v20  ;;  %v567_v27 = vmul.f32 %v5394_v21, %v5394_v21 }
  0xf8   : > { %v5400_v28 = vsub.f32 %v516_v2, %v550_v24  ;;  %v5402_v29 = vsub.f32 %v518_v5, %v552_v25  ;;  %v573_v30 = vsel %vm523_vm0, %v565_v26, 0.0  ;;  %v579_v33 = vsel %vm523_vm0, %v567_v27, 0.0 }
  0xf9   : > { %574 = vadd.xlane.f32.xlu0 %v573_v30  ;;  %v538_v31 = vpop.xlane.xlu0 %537  ;;  %v541_v32 = vpop.xlane.xlu1 %540 }
  0xfa   : > { %v553_v34 = vmul.f32 0.03125, %v538_v31  ;;  %v554_v35 = vmul.f32 0.03125, %v541_v32  ;;  %v566_v36 = vmul.f32 %v5400_v28, %v5400_v28  ;;  %v568_v37 = vmul.f32 %v5402_v29, %v5402_v29 }
  0xfc   : > { %v5410_v38 = vsub.f32 %v519_v8, %v553_v34  ;;  %v5412_v39 = vsub.f32 %v520_v9, %v554_v35  ;;  %v576_v40 = vsel %vm523_vm0, %v566_v36, 0.0  ;;  %v582_v43 = vsel %vm523_vm0, %v568_v37, 0.0  ;;  %v3815_v37 = vld [vmem:[%s6591_s2] ss:$0 sm:$0xff] }
  0xfd   : > { %580 = vadd.xlane.f32.xlu0 %v579_v33  ;;  %577 = vadd.xlane.f32.xlu1 %v576_v40  ;;  %v544_v41 = vpop.xlane.xlu0 %543  ;;  %v547_v42 = vpop.xlane.xlu1 %546 }
  0xfe   : > { %v555_v44 = vmul.f32 0.03125, %v544_v41  ;;  %v556_v45 = vmul.f32 0.03125, %v547_v42  ;;  %v569_v46 = vmul.f32 %v5410_v38, %v5410_v38  ;;  %v570_v47 = vmul.f32 %v5412_v39, %v5412_v39 }
 0x100   : > { %v5420_v48 = vsub.f32 %v521_v12, %v555_v44  ;;  %v5422_v49 = vsub.f32 %v522_v13, %v556_v45  ;;  %v585_v50 = vsel %vm523_vm0, %v569_v46, 0.0  ;;  %v588_v51 = vsel %vm523_vm0, %v570_v47, 0.0 }
 0x101   : > { %583 = vadd.xlane.f32.xlu1 %v582_v43  ;;  %586 = vadd.xlane.f32.xlu0 %v585_v50 }
 0x102   : > { %v571_v52 = vmul.f32 %v5420_v48, %v5420_v48  ;;  %v572_v53 = vmul.f32 %v5422_v49, %v5422_v49 }
 0x104   : > { %v591_v54 = vsel %vm523_vm0, %v571_v52, 0.0  ;;  %v594_v55 = vsel %vm523_vm0, %v572_v53, 0.0 }
 0x105   : > { %589 = vadd.xlane.f32.xlu1 %v588_v51  ;;  %592 = vadd.xlane.f32.xlu0 %v591_v54 }
 0x109   : > { %595 = vadd.xlane.f32.xlu1 %v594_v55 }
 0x182   : > { %v575_v60 = vpop.xlane.xlu0 %574 }
 0x183   : > { %v597_v61 = vmul.f32 0.03125, %v575_v60 }
 0x185   : > { %v605_v62 = vadd.f32 1e-05, %v597_v61 }
 0x186   : > { %v578_v63 = vpop.xlane.xlu1 %577  ;;  %v581_v0 = vpop.xlane.xlu0 %580 }
 0x187   : > { %4753 = vrsqrt.f32 %v605_v62  ;;  %v598_v1 = vmul.f32 0.03125, %v578_v63  ;;  %v599_v2 = vmul.f32 0.03125, %v581_v0 }
 0x189   : > { %v606_v3 = vadd.f32 1e-05, %v598_v1  ;;  %v607_v4 = vadd.f32 1e-05, %v599_v2 }
 0x18a   : > { %v584_v5 = vpop.xlane.xlu1 %583  ;;  %v587_v6 = vpop.xlane.xlu0 %586 }
 0x18b   : > { %4755 = vrsqrt.f32 %v606_v3  ;;  %v600_v7 = vmul.f32 0.03125, %v584_v5  ;;  %v601_v8 = vmul.f32 0.03125, %v587_v6 }
 0x18c   : > { %4757 = vrsqrt.f32 %v607_v4 }
 0x18d   : > { %v608_v9 = vadd.f32 1e-05, %v600_v7  ;;  %v609_v10 = vadd.f32 1e-05, %v601_v8 }
 0x18e   : > { %v590_v11 = vpop.xlane.xlu1 %589  ;;  %v593_v12 = vpop.xlane.xlu0 %592 }
 0x18f   : > { %4759 = vrsqrt.f32 %v608_v9  ;;  %v602_v13 = vmul.f32 0.03125, %v590_v11  ;;  %v603_v14 = vmul.f32 0.03125, %v593_v12  ;;  %v770_v12 = vld [vmem:[#allocation9 + $0x8] sm:$0xff] }
 0x190   : > { %4761 = vrsqrt.f32 %v609_v10 }
 0x191   : > { %v610_v15 = vadd.f32 1e-05, %v602_v13  ;;  %v611_v16 = vadd.f32 1e-05, %v603_v14  ;;  %v769_v14 = vld [vmem:[#allocation9] sm:$0xff] }
 0x192   : > { %v596_v17 = vpop.xlane.xlu1 %595 }
 0x193   : > { %4763 = vrsqrt.f32 %v610_v15  ;;  %v604_v18 = vmul.f32 0.03125, %v596_v17 }
 0x194   : > { %v4754_v19 = vpop.eup %4753  ;;  %4765 = vrsqrt.f32 %v611_v16 }
 0x195   : > { %v612_v22 = vadd.f32 1e-05, %v604_v18  ;;  %v621_v23 = vmul.f32 %v4754_v19, %v5392_v20 }
 0x197   : > { %4767 = vrsqrt.f32 %v612_v22  ;;  %4214 = vmatprep.mubr.msk.f32.mxu0 %vm523_vm0, %v621_v23 }
 0x198   : > { %v4756_v24 = vpop.eup %4755 }
 0x199   : > { %v4758_v25 = vpop.eup %4757  ;;  %v622_v26 = vmul.f32 %v4756_v24, %v5400_v28  ;;  %v771_v24 = vld [vmem:[#allocation9 + $0x10] sm:$0xff] }
 0x19a   : > { %v623_v27 = vmul.f32 %v4758_v25, %v5394_v21 }
 0x19b   : > { %4215 = vmatmul.mubr.msk.f32.vlgmr.msra.gmra.mxu0 %vm523_vm0, %v622_v26  ;;  %v772_v26 = vld [vmem:[#allocation9 + $0x18] sm:$0xff] }
 0x19c   : > { %v4760_v30 = vpop.eup %4759  ;;  %4217 = vmatprep.mubr.msk.f32.mxu0 %vm523_vm0, %v623_v27 }
 0x19d   : > { %v4762_v31 = vpop.eup %4761  ;;  %v624_v32 = vmul.f32 %v4760_v30, %v5402_v29 }
 0x19e   : > { %v625_v33 = vmul.f32 %v4762_v31, %v5410_v38  ;;  %v773_v31 = vld [vmem:[#allocation9 + $0x20] sm:$0xff] }
 0x19f   : > { %4218 = vmatmul.mubr.msk.f32.gmra.mxu0 %vm523_vm0, %v624_v32 }
 0x1a0   : > { %v4764_v20 = vpop.eup %4763  ;;  %4220 = vmatprep.mubr.msk.f32.mxu0 %vm523_vm0, %v625_v33  ;;  %v774_v33 = vld [vmem:[#allocation9 + $0x28] sm:$0xff] }
 0x1a1   : > { %v4766_v34 = vpop.eup %4765  ;;  %v626_v28 = vmul.f32 %v4764_v20, %v5412_v39 }
 0x1a2   : > { %v627_v21 = vmul.f32 %v4766_v34, %v5420_v48 }
 0x1a3   : > { %4221 = vmatmul.mubr.msk.f32.gmra.mxu0 %vm523_vm0, %v626_v28 }
 0x1a4   : > { %v4768_v35 = vpop.eup %4767  ;;  %4223 = vmatprep.mubr.msk.f32.mxu0 %vm523_vm0, %v627_v21 }
 0x1a5   : > { %v628_v36 = vmul.f32 %v4768_v35, %v5422_v49  ;;  %v776_v35 = vld [vmem:[#allocation9 + $0x38] sm:$0xff] }
 0x1a7   : > { %4224 = vmatmul.mubr.msk.f32.gmra.mxu0 %vm523_vm0, %v628_v36 }
 0x25b   : > { %v4216_v29 = vpop.f32.mrf.mxu0 }
 0x25c   : > { %v5469_v50 = vadd.f32 %v4216_v29, %v3815_v37 }
 0x25d   : > { %v730_v38 = vpop.f32.mrf.mxu0 }
 0x25e   : > { %v5451_v40 = vadd.f32 %v3815_v37, %v730_v38 }
 0x25f   : > { %v4219_v39 = vpop.f32.mrf.mxu0 }
 0x260   : > { %4242 = vmatprep.mubr.msk.f32.mxu1 %vm801_vm1, %v5451_v40  ;;  %v5461_v48 = vadd.f32 %v4219_v39, %v3815_v37 }
 0x261   : > { %v740_v41 = vpop.f32.mrf.mxu0 }
 0x262   : > { %v5479_v52 = vadd.f32 %v3815_v37, %v740_v41 }
 0x263   : > { %v4222_v42 = vpop.f32.mrf.mxu0 }
 0x264   : > { %v5465_v49 = vadd.f32 %v4222_v42, %v3815_v37  ;;  %v775_v42 = vld [vmem:[#allocation9 + $0x30] sm:$0xff] }
 0x265   : > { %v750_v43 = vpop.f32.mrf.mxu0 }
 0x266   : > { %v5473_v51 = vadd.f32 %v3815_v37, %v750_v43 }
 0x267   : > { %v4225_v44 = vpop.f32.mrf.mxu0 }
 0x268   : > { %v5455_v45 = vadd.f32 %v4225_v44, %v3815_v37 }
 0x269   : > { %v760_v46 = vpop.f32.mrf.mxu0 }
 0x26a   : > { %v5457_v47 = vadd.f32 %v3815_v37, %v760_v46  ;;  %799 = vrot.lane.b32.xlu0 %v5455_v45, %s5152_s15 }
 0x26c   : > { %797 = vrot.lane.b32.xlu1 %v5457_v47, %s5152_s15 }
 0x26e   : > { %791 = vrot.lane.b32.xlu0 %v5461_v48, %s5152_s15 }
 0x270   : > { %795 = vrot.lane.b32.xlu1 %v5465_v49, %s5152_s15 }
 0x272   : > { %787 = vrot.lane.b32.xlu0 %v5469_v50, %s5152_s15 }
 0x274   : > { %793 = vrot.lane.b32.xlu1 %v5473_v51, %s5152_s15 }
 0x276   : > { %1002 = vrot.lane.b32.xlu0 %v5455_v45, %s5153_s27 }
 0x278   : > { %789 = vrot.lane.b32.xlu1 %v5479_v52, %s5152_s15 }
 0x27a   : > { %998 = vrot.lane.b32.xlu0 %v5465_v49, %s5153_s27 }
 0x27c   : > { %785 = vrot.lane.b32.xlu1 %v5451_v40, %s5152_s15 }
 0x27e   : > { %996 = vrot.lane.b32.xlu0 %v5473_v51, %s5153_s27 }
 0x280   : > { %994 = vrot.lane.b32.xlu1 %v5461_v48, %s5153_s27 }
 0x282   : > { %992 = vrot.lane.b32.xlu0 %v5479_v52, %s5153_s27 }
 0x284   : > { %990 = vrot.lane.b32.xlu1 %v5469_v50, %s5153_s27 }
 0x286   : > { %988 = vrot.lane.b32.xlu0 %v5451_v40, %s5153_s27 }
 0x288   : > { %1228 = vrot.lane.b32.xlu1 %v5455_v45, %s5154_s16 }
 0x28a   : > { %1224 = vrot.lane.b32.xlu0 %v5465_v49, %s5154_s16 }
 0x28c   : > { %1222 = vrot.lane.b32.xlu1 %v5473_v51, %s5154_s16 }
 0x28e   : > { %1220 = vrot.lane.b32.xlu0 %v5461_v48, %s5154_s16 }
 0x290   : > { %1688 = vrot.lane.b32.xlu1 %v5455_v45, %s5155_s14 }
 0x292   : > { %1218 = vrot.lane.b32.xlu0 %v5479_v52, %s5154_s16 }
 0x294   : > { %1684 = vrot.lane.b32.xlu1 %v5465_v49, %s5155_s14 }
 0x296   : > { %1216 = vrot.lane.b32.xlu0 %v5469_v50, %s5154_s16 }
 0x298   : > { %1682 = vrot.lane.b32.xlu1 %v5473_v51, %s5155_s14 }
 0x29a   : > { %1214 = vrot.lane.b32.xlu0 %v5451_v40, %s5154_s16 }
 0x29c   : > { %1000 = vrot.lane.b32.xlu1 %v5457_v47, %s5153_s27 }
 0x2a0   : > { %1226 = vrot.lane.b32.xlu1 %v5457_v47, %s5154_s16  ;;  %s5165_s16 = smov 24  }
 0x2a4   : > { %1686 = vrot.lane.b32.xlu1 %v5457_v47, %s5155_s14 }
 0x2dc   : > { %v800_v53 = vpop.permute.xlu0 %799 }
 0x2dd   : > { %4226 = vmatprep.subr.msk.mxu1 %vm801_vm1, %v800_v53 }
 0x2de   : > { %4227 = vmatpush3.xpose.msk.msra.mxu1 %vm801_vm1, %v800_v53  ;;  %v798_v54 = vpop.permute.xlu1 %797 }
 0x2df   : > { %4228 = vmatprep.subr.msk.mxu1 %vm801_vm1, %v798_v54 }
 0x2e0   : > { %v792_v55 = vpop.permute.xlu0 %791 }
 0x2e2   : > { %4229 = vmatpush3.xpose.msk.msra.mxu1 %vm801_vm1, %v798_v54  ;;  %v796_v56 = vpop.permute.xlu1 %795 }
 0x2e3   : > { %4230 = vmatprep.subr.msk.mxu1 %vm801_vm1, %v796_v56 }
 0x2e4   : > { %v788_v57 = vpop.permute.xlu0 %787 }
 0x2e6   : > { %4231 = vmatpush3.xpose.msk.msra.mxu1 %vm801_vm1, %v796_v56  ;;  %v794_v58 = vpop.permute.xlu1 %793 }
 0x2e7   : > { %4232 = vmatprep.subr.msk.mxu1 %vm801_vm1, %v794_v58 }
 0x2e8   : > { %v1003_v59 = vpop.permute.xlu0 %1002 }
 0x2e9   : > { %4254 = vmatprep.subr.mxu0 %v1003_v59 }
 0x2ea   : > { %4233 = vmatpush3.xpose.msk.msra.mxu1 %vm801_vm1, %v794_v58  ;;  %4255 = vmatpush3.msra.mxu0 %v1003_v59  ;;  %v790_v60 = vpop.permute.xlu1 %789 }
 0x2eb   : > { %4234 = vmatprep.subr.msk.mxu1 %vm801_vm1, %v792_v55 }
 0x2ec   : > { %v999_v4 = vpop.permute.xlu0 %998 }
 0x2ee   : > { %4235 = vmatpush3.xpose.msk.msra.mxu1 %vm801_vm1, %v792_v55  ;;  %v786_v61 = vpop.permute.xlu1 %785 }
 0x2ef   : > { %4236 = vmatprep.subr.msk.mxu1 %vm801_vm1, %v790_v60 }
 0x2f0   : > { %v997_v6 = vpop.permute.xlu0 %996 }
 0x2f2   : > { %4237 = vmatpush3.xpose.msk.msra.mxu1 %vm801_vm1, %v790_v60  ;;  %v995_v62 = vpop.permute.xlu1 %994 }
 0x2f3   : > { %4238 = vmatprep.subr.msk.mxu1 %vm801_vm1, %v788_v57 }
 0x2f4   : > { %v993_v9 = vpop.permute.xlu0 %992 }
 0x2f6   : > { %4239 = vmatpush3.xpose.msk.msra.mxu1 %vm801_vm1, %v788_v57  ;;  %v991_v63 = vpop.permute.xlu1 %990 }
 0x2f7   : > { %4240 = vmatprep.subr.msk.mxu1 %vm801_vm1, %v786_v61 }
 0x2f8   : > { %v989_v11 = vpop.permute.xlu0 %988 }
 0x2fa   : > { %4241 = vmatpush3.xpose.msk.msra.mxu1 %vm801_vm1, %v786_v61  ;;  %v5533_v0 = vpop.permute.xlu1 %1228 }
 0x2fc   : > { %v1225_v46 = vpop.permute.xlu0 %1224 }
 0x2fd   : > { %4243 = vmatmul.mubr.msk.f32.vlgmr.msra.gmra.mxu1 %vm801_vm1, %v5469_v50 }
 0x2fe   : > { %4245 = vmatprep.mubr.msk.f32.mxu1 %vm801_vm1, %v5479_v52  ;;  %v5539_v1 = vpop.permute.xlu1 %1222 }
 0x300   : > { %v1221_v53 = vpop.permute.xlu0 %1220 }
 0x301   : > { %4246 = vmatmul.mubr.msk.f32.gmra.mxu1 %vm801_vm1, %v5461_v48 }
 0x302   : > { %4248 = vmatprep.mubr.msk.f32.mxu1 %vm801_vm1, %v5473_v51  ;;  %v1689_v2 = vpop.permute.xlu1 %1688 }
 0x303   : > { %4338 = vmatprep.subr.msk.mxu1 %vm801_vm1, %v1689_v2 }
 0x304   : > { %4339 = vmatpush3.xpose.msk.msra.mxu1 %vm801_vm1, %v1689_v2  ;;  %v1219_v54 = vpop.permute.xlu0 %1218 }
 0x305   : > { %4249 = vmatmul.mubr.msk.f32.gmra.mxu1 %vm801_vm1, %v5465_v49 }
 0x306   : > { %4251 = vmatprep.mubr.msk.f32.mxu1 %vm801_vm1, %v5457_v47  ;;  %v1685_v3 = vpop.permute.xlu1 %1684 }
 0x308   : > { %v1217_v55 = vpop.permute.xlu0 %1216 }
 0x309   : > { %4252 = vmatmul.mubr.msk.f32.gmra.mxu1 %vm801_vm1, %v5455_v45 }
 0x30a   : > { %v1683_v5 = vpop.permute.xlu1 %1682 }
 0x30c   : > { %v1215_v56 = vpop.permute.xlu0 %1214 }
 0x30e   : > { %v1001_v7 = vpop.permute.xlu1 %1000 }
 0x30f   : > { %4256 = vmatprep.subr.mxu0 %v1001_v7 }
 0x310   : > { %4257 = vmatpush3.msra.mxu0 %v1001_v7 }
 0x311   : > { %4258 = vmatprep.subr.mxu0 %v999_v4 }
 0x312   : > { %4259 = vmatpush3.msra.mxu0 %v999_v4  ;;  %v5553_v8 = vpop.permute.xlu1 %1226 }
 0x313   : > { %4260 = vmatprep.subr.mxu0 %v997_v6 }
 0x314   : > { %4261 = vmatpush3.msra.mxu0 %v997_v6 }
 0x315   : > { %4262 = vmatprep.subr.mxu0 %v995_v62 }
 0x316   : > { %4263 = vmatpush3.msra.mxu0 %v995_v62  ;;  %v1687_v10 = vpop.permute.xlu1 %1686 }
 0x317   : > { %4264 = vmatprep.subr.mxu0 %v993_v9  ;;  %4340 = vmatprep.subr.msk.mxu1 %vm801_vm1, %v1687_v10 }
 0x318   : > { %4265 = vmatpush3.msra.mxu0 %v993_v9  ;;  %4341 = vmatpush3.xpose.msk.msra.mxu1 %vm801_vm1, %v1687_v10 }
 0x319   : > { %4266 = vmatprep.subr.mxu0 %v991_v63  ;;  %4342 = vmatprep.subr.msk.mxu1 %vm801_vm1, %v1685_v3 }
 0x31a   : > { %4267 = vmatpush3.msra.mxu0 %v991_v63 }
 0x31b   : > { %4268 = vmatprep.subr.mxu0 %v989_v11 }
 0x31c   : > { %4269 = vmatpush3.msra.mxu0 %v989_v11  ;;  %4343 = vmatpush3.xpose.msk.msra.mxu1 %vm801_vm1, %v1685_v3 }
 0x31d   : > { %4282 = vmatprep.subr.msk.mxu0 %vm801_vm1, %v5533_v0  ;;  %4344 = vmatprep.subr.msk.mxu1 %vm801_vm1, %v1683_v5 }
 0x320   : > { %4345 = vmatpush3.xpose.msk.msra.mxu1 %vm801_vm1, %v1683_v5 }
 0x3bd   : > { %v4244_v13 = vpop.f32.mrf.mxu1 }
 0x3be   : > { %v5563_v15 = vadd.f32 %v4244_v13, %v770_v12 }
 0x3bf   : > { %v900_v16 = vpop.f32.mrf.mxu1 }
 0x3c0   : > { %v5565_v17 = vadd.f32 %v900_v16, %v769_v14  ;;  %v943_v18 = vsel %vm939_vm2, %v5563_v15, -inf }
 0x3c1   : > { %944 = vmax.xlane.f32.xlu1 %v943_v18  ;;  %v4247_v22 = vpop.f32.mrf.mxu1 }
 0x3c2   : > { %v940_v19 = vsel %vm939_vm2, %v5565_v17, -inf  ;;  %v5577_v32 = vadd.f32 %v4247_v22, %v772_v26 }
 0x3c3   : > { %941 = vmax.xlane.f32.xlu0 %v940_v19  ;;  %v910_v23 = vpop.f32.mrf.mxu1 }
 0x3c4   : > { %v5575_v27 = vadd.f32 %v910_v23, %v771_v24  ;;  %v949_v21 = vsel %vm939_vm2, %v5577_v32, -inf }
 0x3c5   : > { %v4250_v25 = vpop.f32.mrf.mxu1 }
 0x3c6   : > { %v946_v34 = vsel %vm939_vm2, %v5575_v27, -inf  ;;  %v5583_v28 = vadd.f32 %v4250_v25, %v774_v33 }
 0x3c7   : > { %v920_v30 = vpop.f32.mrf.mxu1 }
 0x3c8   : > { %v5579_v20 = vadd.f32 %v920_v30, %v773_v31  ;;  %v955_v38 = vsel %vm939_vm2, %v5583_v28, -inf }
 0x3c9   : > { %v4253_v36 = vpop.f32.mrf.mxu1 }
 0x3ca   : > { %v952_v29 = vsel %vm939_vm2, %v5579_v20, -inf  ;;  %v5589_v37 = vadd.f32 %v4253_v36, %v776_v35 }
 0x3cb   : > { %v930_v41 = vpop.f32.mrf.mxu1 }
 0x3cc   : > { %v961_v39 = vsel %vm939_vm2, %v5589_v37, -inf  ;;  %v5607_v43 = vadd.f32 %v930_v41, %v775_v42 }
 0x3ce   : > { %v958_v44 = vsel %vm939_vm2, %v5607_v43, -inf }
 0x3d2   : > { %1200 = vrot.lane.b32.xlu1 %v5469_v50, %s5156_s19 }
 0x3d9   : > { %1198 = vrot.lane.b32.xlu0 %v5451_v40, %s5156_s19 }
 0x3f6   : > { %947 = vmax.xlane.f32.xlu1 %v946_v34 }
 0x3f8   : > { %950 = vmax.xlane.f32.xlu0 %v949_v21 }
 0x3fa   : > { %953 = vmax.xlane.f32.xlu1 %v952_v29 }
 0x3fc   : > { %956 = vmax.xlane.f32.xlu0 %v955_v38 }
 0x400   : > { %962 = vmax.xlane.f32.xlu0 %v961_v39 }
 0x40b   : > { %1202 = vrot.lane.b32.xlu1 %v5479_v52, %s5156_s19 }
 0x416   : > { %1680 = vrot.lane.b32.xlu0 %v5461_v48, %s5155_s14 }
 0x41a   : > { %1204 = vrot.lane.b32.xlu0 %v5461_v48, %s5156_s19 }
 0x41e   : > { %1206 = vrot.lane.b32.xlu0 %v5473_v51, %s5156_s19 }
 0x422   : > { %1676 = vrot.lane.b32.xlu0 %v5469_v50, %s5155_s14 }
 0x426   : > { %1212 = vrot.lane.b32.xlu0 %v5455_v45, %s5156_s19 }
 0x42a   : > { %1658 = vrot.lane.b32.xlu0 %v5451_v40, %s5157_s3 }
 0x42e   : > { %1662 = vrot.lane.b32.xlu0 %v5479_v52, %s5157_s3 }
 0x42f   : > { %959 = vmax.xlane.f32.xlu1 %v958_v44 }
 0x432   : > { %1666 = vrot.lane.b32.xlu0 %v5473_v51, %s5157_s3 }
 0x436   : > { %1670 = vrot.lane.b32.xlu0 %v5457_v47, %s5157_s3 }
 0x43a   : > { %1429 = vrot.lane.b32.xlu0 %v5455_v45, %s5158_s25 }
 0x43e   : > { %1425 = vrot.lane.b32.xlu0 %v5465_v49, %s5158_s25 }
 0x440   : > { %1678 = vrot.lane.b32.xlu1 %v5479_v52, %s5155_s14 }
 0x442   : > { %1417 = vrot.lane.b32.xlu0 %v5469_v50, %s5158_s25 }
 0x444   : > { %1208 = vrot.lane.b32.xlu1 %v5465_v49, %s5156_s19 }
 0x446   : > { %1889 = vrot.lane.b32.xlu0 %v5455_v45, %s5159_s17 }
 0x448   : > { %1210 = vrot.lane.b32.xlu1 %v5457_v47, %s5156_s19 }
 0x44a   : > { %1885 = vrot.lane.b32.xlu0 %v5465_v49, %s5159_s17  ;;  %v945_v57 = vpop.xlane.xlu1 %944 }
 0x44b   : > { %v965_v58 = vsub.f32 %v5563_v15, %v945_v57 }
 0x44c   : > { %1674 = vrot.lane.b32.xlu1 %v5451_v40, %s5155_s14  ;;  %v942_v59 = vpop.xlane.xlu0 %941  ;;  %s5166_s14 = smov 32  }
 0x44d   : > { %v964_v60 = vsub.f32 %v5565_v17, %v942_v59  ;;  %v974_v61 = vmul.f32 1.442695, %v965_v58 }
 0x44e   : > { %1883 = vrot.lane.b32.xlu0 %v5473_v51, %s5159_s17 }
 0x44f   : > { %v972_v62 = vmul.f32 1.442695, %v964_v60 }
 0x450   : > { %1660 = vrot.lane.b32.xlu1 %v5469_v50, %s5157_s3 }
 0x451   : > { %4769 = vpow2.f32 %v972_v62 }
 0x452   : > { %4771 = vpow2.f32 %v974_v61  ;;  %1879 = vrot.lane.b32.xlu0 %v5479_v52, %s5159_s17 }
 0x454   : > { %1664 = vrot.lane.b32.xlu1 %v5461_v48, %s5157_s3 }
 0x458   : > { %1668 = vrot.lane.b32.xlu1 %v5465_v49, %s5157_s3 }
 0x45c   : > { %1672 = vrot.lane.b32.xlu1 %v5455_v45, %s5157_s3  ;;  %s5167_s3 = smov [#allocation13]  }
 0x45e   : > { %v5651_v63 = vpop.eup %4769 }
 0x45f   : > { %v5653_v2 = vpop.eup %4771  ;;  %4270 = vmatprep.mubr.msk.f32.mxu0 %vm939_vm2, %v5651_v63 }
 0x460   : > { %1427 = vrot.lane.b32.xlu1 %v5457_v47, %s5158_s25  ;;  %4271 = vmatmul.mubr.msk.f32.vlgmr.msra.gmra.mxu0 %vm939_vm2, %v5653_v2 }
 0x461   : > { %4283 = vmatpush3.xpose.msk.msra.mxu0 %vm801_vm1, %v5533_v0  ;;  %v5692_v0 = vpop.permute.xlu1 %1200 }
 0x462   : > { %4284 = vmatprep.subr.msk.mxu0 %vm801_vm1, %v5553_v8 }
 0x464   : > { %1423 = vrot.lane.b32.xlu1 %v5473_v51, %s5158_s25 }
 0x465   : > { %4285 = vmatpush3.xpose.msk.msra.mxu0 %vm801_vm1, %v5553_v8 }
 0x466   : > { %4286 = vmatprep.subr.msk.mxu0 %vm801_vm1, %v1225_v46 }
 0x468   : > { %1421 = vrot.lane.b32.xlu1 %v5461_v48, %s5158_s25 }
 0x469   : > { %4287 = vmatpush3.xpose.msk.msra.mxu0 %vm801_vm1, %v1225_v46 }
 0x46a   : > { %4288 = vmatprep.subr.msk.mxu0 %vm801_vm1, %v5539_v1 }
 0x46c   : > { %1419 = vrot.lane.b32.xlu1 %v5479_v52, %s5158_s25 }
 0x46d   : > { %4289 = vmatpush3.xpose.msk.msra.mxu0 %vm801_vm1, %v5539_v1  ;;  %v5696_v1 = vpop.permute.xlu0 %1198 }
 0x46e   : > { %4290 = vmatprep.subr.msk.mxu0 %vm801_vm1, %v1221_v53 }
 0x470   : > { %1415 = vrot.lane.b32.xlu1 %v5451_v40, %s5158_s25  ;;  %s5075_s25 = sshll.u32 %s5167_s3, 4  ;;  %s5076_s25 = int_to_ptr.vmem [resolvable:$false] %s5075_s25 }
 0x471   : > { %4291 = vmatpush3.xpose.msk.msra.mxu0 %vm801_vm1, %v1221_v53 }
 0x472   : > { %4292 = vmatprep.subr.msk.mxu0 %vm801_vm1, %v1219_v54 }
 0x474   : > { %1887 = vrot.lane.b32.xlu1 %v5457_v47, %s5159_s17 }
 0x475   : > { %4293 = vmatpush3.xpose.msk.msra.mxu0 %vm801_vm1, %v1219_v54 }
 0x476   : > { %4294 = vmatprep.subr.msk.mxu0 %vm801_vm1, %v1217_v55 }
 0x478   : > { %1881 = vrot.lane.b32.xlu1 %v5461_v48, %s5159_s17 }
 0x479   : > { %4295 = vmatpush3.xpose.msk.msra.mxu0 %vm801_vm1, %v1217_v55 }
 0x47a   : > { %4296 = vmatprep.subr.msk.mxu0 %vm801_vm1, %v1215_v56 }
 0x47c   : > { %1877 = vrot.lane.b32.xlu1 %v5469_v50, %s5159_s17 }
 0x47d   : > { %4297 = vmatpush3.xpose.msk.msra.mxu0 %vm801_vm1, %v1215_v56 }
 0x47f   : > { %v948_v3 = vpop.xlane.xlu1 %947 }
 0x480   : > { %v966_v4 = vsub.f32 %v5575_v27, %v948_v3 }
 0x481   : > { %v951_v5 = vpop.xlane.xlu0 %950 }
 0x482   : > { %v976_v6 = vmul.f32 1.442695, %v966_v4  ;;  %v967_v7 = vsub.f32 %v5577_v32, %v951_v5 }
 0x483   : > { %v954_v8 = vpop.xlane.xlu1 %953 }
 0x484   : > { %4773 = vpow2.f32 %v976_v6  ;;  %v978_v9 = vmul.f32 1.442695, %v967_v7  ;;  %v968_v10 = vsub.f32 %v5579_v20, %v954_v8  ;;  %v1651_v6 = vld [vmem:[#allocation9 + $0x88] sm:$0xff] }
 0x485   : > { %v957_v11 = vpop.xlane.xlu0 %956 }
 0x486   : > { %4775 = vpow2.f32 %v978_v9  ;;  %v980_v12 = vmul.f32 1.442695, %v968_v10  ;;  %v969_v13 = vsub.f32 %v5583_v28, %v957_v11  ;;  %v1650_v9 = vld [vmem:[#allocation9 + $0x80] sm:$0xff] }
 0x487   : > { %v1203_v20 = vpop.permute.xlu1 %1202 }
 0x488   : > { %4777 = vpow2.f32 %v980_v12  ;;  %v982_v14 = vmul.f32 1.442695, %v969_v13 }
 0x489   : > { %v963_v15 = vpop.xlane.xlu0 %962 }
 0x48a   : > { %4779 = vpow2.f32 %v982_v14  ;;  %v971_v34 = vsub.f32 %v5589_v37, %v963_v15 }
 0x48c   : > { %v986_v35 = vmul.f32 1.442695, %v971_v34  ;;  %v1190_v34 = vld [vmem:[#allocation9 + $0x40] sm:$0xff] }
 0x48d   : > { %v1681_v16 = vpop.permute.xlu0 %1680 }
 0x48e   : > { %4346 = vmatprep.subr.msk.mxu1 %vm801_vm1, %v1681_v16 }
 0x48f   : > { %4347 = vmatpush3.xpose.msk.msra.mxu1 %vm801_vm1, %v1681_v16  ;;  %v1653_v16 = vld [vmem:[#allocation9 + $0x98] sm:$0xff] }
 0x491   : > { %v5705_v17 = vpop.eup %4773  ;;  %v1205_v18 = vpop.permute.xlu0 %1204 }
 0x492   : > { %4273 = vmatprep.mubr.msk.f32.mxu0 %vm939_vm2, %v5705_v17 }
 0x493   : > { %v5709_v19 = vpop.eup %4775 }
 0x494   : > { %4274 = vmatmul.mubr.msk.f32.gmra.mxu0 %vm939_vm2, %v5709_v19 }
 0x495   : > { %v5713_v22 = vpop.eup %4777  ;;  %v1207_v23 = vpop.permute.xlu0 %1206 }
 0x496   : > { %4276 = vmatprep.mubr.msk.f32.mxu0 %vm939_vm2, %v5713_v22 }
 0x497   : > { %v5717_v24 = vpop.eup %4779 }
 0x498   : > { %4277 = vmatmul.mubr.msk.f32.gmra.mxu0 %vm939_vm2, %v5717_v24 }
 0x499   : > { %v1677_v25 = vpop.permute.xlu0 %1676 }
 0x49d   : > { %v1213_v26 = vpop.permute.xlu0 %1212 }
 0x4a1   : > { %v1659_v27 = vpop.permute.xlu0 %1658 }
 0x4a2   : > { %4354 = vmatprep.mubr.msk.f32.mxu1 %vm801_vm1, %v1659_v27 }
 0x4a5   : > { %v1663_v30 = vpop.permute.xlu0 %1662 }
 0x4a9   : > { %v1667_v31 = vpop.permute.xlu0 %1666 }
 0x4ad   : > { %v1671_v32 = vpop.permute.xlu0 %1670 }
 0x4b1   : > { %v1430_v33 = vpop.permute.xlu0 %1429 }
 0x4b2   : > { %4310 = vmatprep.subr.mxu0 %v1430_v33 }
 0x4b5   : > { %v1426_v55 = vpop.permute.xlu0 %1425 }
 0x4b8   : > { %v960_v28 = vpop.xlane.xlu1 %959 }
 0x4b9   : > { %v970_v21 = vsub.f32 %v5607_v43, %v960_v28  ;;  %v1418_v58 = vpop.permute.xlu0 %1417 }
 0x4bb   : > { %v984_v36 = vmul.f32 1.442695, %v970_v21 }
 0x4bc   : > { %v1679_v29 = vpop.permute.xlu1 %1678 }
 0x4bd   : > { %4781 = vpow2.f32 %v984_v36  ;;  %4348 = vmatprep.subr.msk.mxu1 %vm801_vm1, %v1679_v29  ;;  %v5755_v61 = vpop.permute.xlu0 %1889 }
 0x4be   : > { %4783 = vpow2.f32 %v986_v35  ;;  %4349 = vmatpush3.xpose.msk.msra.mxu1 %vm801_vm1, %v1679_v29  ;;  %v1654_v35 = vld [vmem:[#allocation9 + $0xa0] sm:$0xff] }
 0x4bf   : > { %4350 = vmatprep.subr.msk.mxu1 %vm801_vm1, %v1677_v25 }
 0x4c0   : > { %v1209_v38 = vpop.permute.xlu1 %1208 }
 0x4c2   : > { %4351 = vmatpush3.xpose.msk.msra.mxu1 %vm801_vm1, %v1677_v25 }
 0x4c4   : > { %v1211_v39 = vpop.permute.xlu1 %1210 }
 0x4c8   : > { %v1675_v41 = vpop.permute.xlu1 %1674 }
 0x4c9   : > { %4352 = vmatprep.subr.msk.mxu1 %vm801_vm1, %v1675_v41 }
 0x4ca   : > { %v5729_v37 = vpop.eup %4781  ;;  %4353 = vmatpush3.xpose.msk.msra.mxu1 %vm801_vm1, %v1675_v41 }
 0x4cb   : > { %v5732_v42 = vpop.eup %4783  ;;  %4279 = vmatprep.mubr.msk.f32.mxu0 %vm939_vm2, %v5729_v37 }
 0x4cc   : > { %4280 = vmatmul.mubr.msk.f32.gmra.mxu0 %vm939_vm2, %v5732_v42  ;;  %v1661_v43 = vpop.permute.xlu1 %1660 }
 0x4cd   : > { %4298 = vmatprep.mubr.msk.f32.mxu0 %vm801_vm1, %v5696_v1  ;;  %4355 = vmatmul.mubr.msk.f32.vlgmr.msra.gmra.mxu1 %vm801_vm1, %v1661_v43 }
 0x4ce   : > { %4357 = vmatprep.mubr.msk.f32.mxu1 %vm801_vm1, %v1663_v30 }
 0x4d0   : > { %4299 = vmatmul.mubr.msk.f32.vlgmr.msra.gmra.mxu0 %vm801_vm1, %v5692_v0  ;;  %v1665_v44 = vpop.permute.xlu1 %1664 }
 0x4d1   : > { %4311 = vmatpush3.msra.mxu0 %v1430_v33  ;;  %4301 = vmatprep.mubr.msk.f32.mxu0 %vm801_vm1, %v1203_v20 }
 0x4d2   : > { %4358 = vmatmul.mubr.msk.f32.gmra.mxu1 %vm801_vm1, %v1665_v44 }
 0x4d3   : > { %4360 = vmatprep.mubr.msk.f32.mxu1 %vm801_vm1, %v1667_v31 }
 0x4d4   : > { %4302 = vmatmul.mubr.msk.f32.gmra.mxu0 %vm801_vm1, %v1205_v18  ;;  %v1669_v46 = vpop.permute.xlu1 %1668 }
 0x4d5   : > { %4304 = vmatprep.mubr.msk.f32.mxu0 %vm801_vm1, %v1207_v23 }
 0x4d6   : > { %4361 = vmatmul.mubr.msk.f32.gmra.mxu1 %vm801_vm1, %v1669_v46  ;;  %v1193_v46 = vld [vmem:[#allocation9 + $0x58] sm:$0xff] }
 0x4d7   : > { %4363 = vmatprep.mubr.msk.f32.mxu1 %vm801_vm1, %v1671_v32  ;;  %v1655_v32 = vld [vmem:[#allocation9 + $0xa8] sm:$0xff] }
 0x4d8   : > { %4305 = vmatmul.mubr.msk.f32.gmra.mxu0 %vm801_vm1, %v1209_v38  ;;  %v1673_v53 = vpop.permute.xlu1 %1672  ;;  %v1191_v38 = vld [vmem:[#allocation9 + $0x48] sm:$0xff] }
 0x4d9   : > { %4307 = vmatprep.mubr.msk.f32.mxu0 %vm801_vm1, %v1211_v39 }
 0x4da   : > { %4364 = vmatmul.mubr.msk.f32.gmra.mxu1 %vm801_vm1, %v1673_v53 }
 0x4dc   : > { %4308 = vmatmul.mubr.msk.f32.gmra.mxu0 %vm801_vm1, %v1213_v26  ;;  %v1428_v54 = vpop.permute.xlu1 %1427  ;;  %v1652_v26 = vld [vmem:[#allocation9 + $0x90] sm:$0xff] }
 0x4dd   : > { %4312 = vmatprep.subr.mxu0 %v1428_v54 }
 0x4de   : > { %4313 = vmatpush3.msra.mxu0 %v1428_v54 }
 0x4df   : > { %4314 = vmatprep.subr.mxu0 %v1426_v55 }
 0x4e0   : > { %4315 = vmatpush3.msra.mxu0 %v1426_v55  ;;  %v1424_v56 = vpop.permute.xlu1 %1423 }
 0x4e1   : > { %4316 = vmatprep.subr.mxu0 %v1424_v56 }
 0x4e2   : > { %4317 = vmatpush3.msra.mxu0 %v1424_v56 }
 0x4e4   : > { %v1422_v57 = vpop.permute.xlu1 %1421 }
 0x4e5   : > { %4318 = vmatprep.subr.mxu0 %v1422_v57 }
 0x4e6   : > { %4319 = vmatpush3.msra.mxu0 %v1422_v57 }
 0x4e8   : > { %v1420_v59 = vpop.permute.xlu1 %1419 }
 0x4e9   : > { %4320 = vmatprep.subr.mxu0 %v1420_v59 }
 0x4ea   : > { %4321 = vmatpush3.msra.mxu0 %v1420_v59 }
 0x4eb   : > { %4322 = vmatprep.subr.mxu0 %v1418_v58 }
 0x4ec   : > { %4323 = vmatpush3.msra.mxu0 %v1418_v58  ;;  %v1416_v60 = vpop.permute.xlu1 %1415  ;;  %v1656_v58 = vld [vmem:[#allocation9 + $0xb0] sm:$0xff] }
 0x4ed   : > { %4324 = vmatprep.subr.mxu0 %v1416_v60 }
 0x4ee   : > { %4325 = vmatpush3.msra.mxu0 %v1416_v60 }
 0x4ef   : > { %4366 = vmatprep.subr.mxu0 %v5755_v61 }
 0x520   : > { %v5758_v62 = vpop.f32.mrf.mxu0 }
 0x522   : > { %v5760_v0 = vpop.f32.mrf.mxu0 }
 0x554   : > { %v5762_v1 = vpop.f32.mrf.mxu0 }
 0x556   : > { %v5764_v3 = vpop.f32.mrf.mxu0 }
 0x558   : > { %v5766_v4 = vpop.f32.mrf.mxu0 }
 0x55a   : > { %v5768_v5 = vpop.f32.mrf.mxu0 }
 0x55b   : > { %6627 = vst [vmem:[#allocation23_spill] sm:$0xff] %v5768_v5 }
 0x58c   : > { %v5770_v7 = vpop.f32.mrf.mxu0 }
 0x58d   : > { %6628 = vst [vmem:[#allocation24_spill] sm:$0xff] %v5770_v7  ;;  %v4356_v8 = vpop.f32.mrf.mxu1 }
 0x58e   : > { %v5772_v10 = vadd.f32 %v4356_v8, %v1651_v6  ;;  %v5774_v11 = vpop.f32.mrf.mxu0  ;;  %v1192_v6 = vld [vmem:[#allocation9 + $0x50] sm:$0xff] }
 0x58f   : > { %6629 = vst [vmem:[#allocation25_spill] sm:$0xff] %v5774_v11  ;;  %v1788_v12 = vpop.f32.mrf.mxu1 }
 0x590   : > { %v5776_v13 = vadd.f32 %v1788_v12, %v1650_v9  ;;  %v4300_v14 = vpop.f32.mrf.mxu0  ;;  %v1830_v15 = vsel %vm939_vm2, %v5772_v10, -inf }
 0x591   : > { %1831 = vmax.xlane.f32.xlu0 %v1830_v15  ;;  %v5798_v55 = vadd.f32 %v4300_v14, %v1191_v38  ;;  %v1195_v14 = vld [vmem:[#allocation9 + $0x68] sm:$0xff]  ;;  %v1657_v38 = vld [vmem:[#allocation9 + $0xb8] sm:$0xff] }
 0x592   : > { %v4359_v18 = vpop.f32.mrf.mxu1  ;;  %v1328_v23 = vpop.f32.mrf.mxu0  ;;  %v1827_v25 = vsel %vm939_vm2, %v5776_v13, -inf }
 0x593   : > { %v5782_v27 = vadd.f32 %v4359_v18, %v1653_v16  ;;  %1828 = vmax.xlane.f32.xlu1 %v1827_v25  ;;  %v5792_v41 = vadd.f32 %v1328_v23, %v1190_v34  ;;  %v1370_v12 = vsel %vm939_vm2, %v5798_v55, -inf  ;;  %v1194_v18 = vld [vmem:[#allocation9 + $0x60] sm:$0xff]  ;;  %v1196_v34 = vld [vmem:[#allocation9 + $0x70] sm:$0xff] }
 0x594   : > { %v1798_v30 = vpop.f32.mrf.mxu1  ;;  %v4303_v31 = vpop.f32.mrf.mxu0 }
 0x595   : > { %v5784_v33 = vadd.f32 %v1798_v30, %v1652_v26  ;;  %v1836_v20 = vsel %vm939_vm2, %v5782_v27, -inf  ;;  %v5802_v59 = vadd.f32 %v4303_v31, %v1193_v46  ;;  %v1367_v60 = vsel %vm939_vm2, %v5792_v41, -inf  ;;  %v1197_v30 = vld [vmem:[#allocation9 + $0x78] sm:$0xff] }
 0x596   : > { %1837 = vmax.xlane.f32.xlu0 %v1836_v20  ;;  %v4362_v28 = vpop.f32.mrf.mxu1  ;;  %v1338_v21 = vpop.f32.mrf.mxu0 }
 0x597   : > { %v5788_v36 = vadd.f32 %v4362_v28, %v1655_v32  ;;  %v1833_v29 = vsel %vm939_vm2, %v5784_v33, -inf  ;;  %v5810_v15 = vadd.f32 %v1338_v21, %v1192_v6  ;;  %v1376_v16 = vsel %vm939_vm2, %v5802_v59, -inf }
 0x598   : > { %1834 = vmax.xlane.f32.xlu1 %v1833_v29  ;;  %v1808_v39 = vpop.f32.mrf.mxu1  ;;  %v4306_v53 = vpop.f32.mrf.mxu0 }
 0x599   : > { %v5794_v43 = vadd.f32 %v1808_v39, %v1654_v35  ;;  %v1842_v44 = vsel %vm939_vm2, %v5788_v36, -inf  ;;  %v5814_v25 = vadd.f32 %v4306_v53, %v1195_v14  ;;  %v1373_v32 = vsel %vm939_vm2, %v5810_v15, -inf }
 0x59a   : > { %1843 = vmax.xlane.f32.xlu0 %v1842_v44  ;;  %v4365_v54 = vpop.f32.mrf.mxu1  ;;  %v1348_v8 = vpop.f32.mrf.mxu0 }
 0x59b   : > { %v1839_v56 = vsel %vm939_vm2, %v5794_v43, -inf  ;;  %v5818_v31 = vadd.f32 %v1348_v8, %v1194_v18  ;;  %v1382_v21 = vsel %vm939_vm2, %v5814_v25, -inf  ;;  %v5832_v44 = vadd.f32 %v4365_v54, %v1657_v38  ;;  %v5868_v54 = vpop.permute.xlu0 %1885 }
 0x59c   : > { %1840 = vmax.xlane.f32.xlu1 %v1839_v56  ;;  %v1818_v57 = vpop.f32.mrf.mxu1  ;;  %v4309_v23 = vpop.f32.mrf.mxu0 }
 0x59d   : > { %v5806_v9 = vadd.f32 %v1818_v57, %v1656_v58  ;;  %v5822_v28 = vadd.f32 %v4309_v23, %v1197_v30  ;;  %v1379_v29 = vsel %vm939_vm2, %v5818_v31, -inf  ;;  %v1848_v53 = vsel %vm939_vm2, %v5832_v44, -inf  ;;  %v1888_v56 = vpop.permute.xlu1 %1887 }
 0x59e   : > { %1368 = vmax.xlane.f32.xlu0 %v1367_v60  ;;  %v1358_v20 = vpop.f32.mrf.mxu0 }
 0x59f   : > { %v1845_v26 = vsel %vm939_vm2, %v5806_v9, -inf  ;;  %v5826_v35 = vadd.f32 %v1358_v20, %v1196_v34  ;;  %v1388_v39 = vsel %vm939_vm2, %v5822_v28, -inf  ;;  %v5870_v57 = vpop.permute.xlu0 %1883 }
 0x5a0   : > { %1371 = vmax.xlane.f32.xlu1 %v1370_v12 }
 0x5a1   : > { %v1385_v46 = vsel %vm939_vm2, %v5826_v35, -inf }
 0x5a2   : > { %1377 = vmax.xlane.f32.xlu0 %v1376_v16 }
 0x5a4   : > { %1846 = vmax.xlane.f32.xlu1 %v1845_v26 }
 0x5a6   : > { %1374 = vmax.xlane.f32.xlu0 %v1373_v32 }
 0x5a8   : > { %1383 = vmax.xlane.f32.xlu1 %v1382_v21 }
 0x5aa   : > { %1380 = vmax.xlane.f32.xlu0 %v1379_v29 }
 0x5ac   : > { %1389 = vmax.xlane.f32.xlu1 %v1388_v39 }
 0x5ae   : > { %1386 = vmax.xlane.f32.xlu0 %v1385_v46 }
 0x5b2   : > { %1849 = vmax.xlane.f32.xlu0 %v1848_v53 }
 0x5bd   : > { %2148 = vrot.lane.b32.xlu1 %v5455_v45, %s5160_s20 }
 0x5c1   : > { %2146 = vrot.lane.b32.xlu1 %v5457_v47, %s5160_s20 }
 0x5c5   : > { %2142 = vrot.lane.b32.xlu1 %v5473_v51, %s5160_s20 }
 0x5c8   : > { %1875 = vrot.lane.b32.xlu0 %v5451_v40, %s5159_s17  ;;  %s505_s17 = sand.u32 1, %s5135_s26  }
 0x5c9   : > { %2138 = vrot.lane.b32.xlu1 %v5479_v52, %s5160_s20 }
 0x5cc   : > { %2144 = vrot.lane.b32.xlu0 %v5465_v49, %s5160_s20 }
 0x5cd   : > { %2134 = vrot.lane.b32.xlu1 %v5451_v40, %s5160_s20 }
 0x5d0   : > { %2140 = vrot.lane.b32.xlu0 %v5461_v48, %s5160_s20 }
 0x5d1   : > { %2120 = vrot.lane.b32.xlu1 %v5469_v50, %s5161_s23 }
 0x5d4   : > { %2136 = vrot.lane.b32.xlu0 %v5469_v50, %s5160_s20  ;;  %s3812_s20 = sshll.u32 %s505_s17, 4 }
 0x5d5   : > { %2124 = vrot.lane.b32.xlu1 %v5461_v48, %s5161_s23 }
 0x5d8   : > { %2118 = vrot.lane.b32.xlu0 %v5451_v40, %s5161_s23 }
 0x5d9   : > { %2128 = vrot.lane.b32.xlu1 %v5465_v49, %s5161_s23 }
 0x5dc   : > { %2122 = vrot.lane.b32.xlu0 %v5479_v52, %s5161_s23 }
 0x5dd   : > { %2132 = vrot.lane.b32.xlu1 %v5455_v45, %s5161_s23 }
 0x5e0   : > { %2126 = vrot.lane.b32.xlu0 %v5473_v51, %s5161_s23 }
 0x5e1   : > { %2347 = vrot.lane.b32.xlu1 %v5457_v47, %s5162_s21 }
 0x5e4   : > { %2130 = vrot.lane.b32.xlu0 %v5457_v47, %s5161_s23  ;;  %v5872_v47 = vpop.permute.xlu1 %1881 }
 0x5e5   : > { %2345 = vrot.lane.b32.xlu1 %v5465_v49, %s5162_s21  ;;  %v5874_v49 = vpop.permute.xlu0 %1879 }
 0x5e8   : > { %2349 = vrot.lane.b32.xlu0 %v5455_v45, %s5162_s21  ;;  %v5876_v58 = vpop.permute.xlu1 %1877 }
 0x5e9   : > { %2343 = vrot.lane.b32.xlu1 %v5473_v51, %s5162_s21 }
 0x5ec   : > { %2341 = vrot.lane.b32.xlu0 %v5461_v48, %s5162_s21 }
 0x5ed   : > { %2339 = vrot.lane.b32.xlu1 %v5479_v52, %s5162_s21 }
 0x61a   : > { %v1832_v45 = vpop.xlane.xlu0 %1831 }
 0x61c   : > { %v1829_v60 = vpop.xlane.xlu1 %1828 }
 0x61f   : > { %v1838_v51 = vpop.xlane.xlu0 %1837 }
 0x621   : > { %v1835_v6 = vpop.xlane.xlu1 %1834 }
 0x623   : > { %v5878_v8 = vpop.xlane.xlu0 %1843 }
 0x625   : > { %v5880_v48 = vpop.xlane.xlu1 %1840 }
 0x627   : > { %v1369_v52 = vpop.xlane.xlu0 %1368 }
 0x628   : > { %v1391_v12 = vsub.f32 %v5792_v41, %v1369_v52 }
 0x629   : > { %v1372_v14 = vpop.xlane.xlu1 %1371 }
 0x62a   : > { %v1399_v16 = vmul.f32 1.442695, %v1391_v12  ;;  %v1392_v18 = vsub.f32 %v5798_v55, %v1372_v14 }
 0x62b   : > { %v1378_v23 = vpop.xlane.xlu0 %1377 }
 0x62c   : > { %4785 = vpow2.f32 %v1399_v16  ;;  %v1401_v26 = vmul.f32 1.442695, %v1392_v18  ;;  %v1394_v32 = vsub.f32 %v5802_v59, %v1378_v23  ;;  %v1851_v59 = vsub.f32 %v5776_v13, %v1829_v60 }
 0x62d   : > { %v5884_v30 = vpop.xlane.xlu1 %1846  ;;  %v1853_v13 = vsub.f32 %v5784_v33, %v1835_v6 }
 0x62e   : > { %4787 = vpow2.f32 %v1401_v26  ;;  %v1405_v29 = vmul.f32 1.442695, %v1394_v32 }
 0x62f   : > { %v1375_v20 = vpop.xlane.xlu0 %1374  ;;  %v1863_v32 = vmul.f32 1.442695, %v1853_v13 }
 0x630   : > { %v1393_v34 = vsub.f32 %v5810_v15, %v1375_v20  ;;  %v1855_v20 = vsub.f32 %v5794_v43, %v5880_v48 }
 0x631   : > { %v1384_v21 = vpop.xlane.xlu1 %1383 }
 0x632   : > { %v1403_v38 = vmul.f32 1.442695, %v1393_v34  ;;  %v1396_v41 = vsub.f32 %v5814_v25, %v1384_v21  ;;  %v1852_v25 = vsub.f32 %v5772_v10, %v1832_v45  ;;  %v1854_v45 = vsub.f32 %v5782_v27, %v1838_v51 }
 0x633   : > { %v1381_v39 = vpop.xlane.xlu0 %1380  ;;  %v1856_v27 = vsub.f32 %v5788_v36, %v5878_v8  ;;  %v1857_v51 = vsub.f32 %v5806_v9, %v5884_v30 }
 0x634   : > { %4789 = vpow2.f32 %v1403_v38  ;;  %v1395_v55 = vsub.f32 %v5818_v31, %v1381_v39  ;;  %v1409_v53 = vmul.f32 1.442695, %v1396_v41  ;;  %v1861_v10 = vmul.f32 1.442695, %v1852_v25 }
 0x635   : > { %v1390_v46 = vpop.xlane.xlu1 %1389  ;;  %4791 = vpow2.f32 %v1405_v29  ;;  %v1865_v34 = vmul.f32 1.442695, %v1854_v45  ;;  %v1869_v48 = vmul.f32 1.442695, %v1856_v27 }
 0x636   : > { %v1407_v52 = vmul.f32 1.442695, %v1395_v55  ;;  %v1398_v12 = vsub.f32 %v5822_v28, %v1390_v46  ;;  %v1859_v28 = vmul.f32 1.442695, %v1851_v59 }
 0x637   : > { %v1387_v14 = vpop.xlane.xlu0 %1386 }
 0x638   : > { %4793 = vpow2.f32 %v1407_v52  ;;  %v1397_v15 = vsub.f32 %v5826_v35, %v1387_v14  ;;  %v1413_v31 = vmul.f32 1.442695, %v1398_v12 }
 0x639   : > { %v5893_v16 = vpop.eup %4785  ;;  %v5895_v18 = vpop.permute.xlu1 %2148  ;;  %4795 = vpow2.f32 %v1409_v53 }
 0x63a   : > { %v1411_v23 = vmul.f32 1.442695, %v1397_v15  ;;  %4326 = vmatprep.mubr.msk.f32.mxu0 %vm939_vm2, %v5893_v16 }
 0x63b   : > { %v5900_v26 = vpop.eup %4787  ;;  %v1850_v60 = vpop.xlane.xlu0 %1849 }
 0x63c   : > { %4797 = vpow2.f32 %v1411_v23  ;;  %4327 = vmatmul.mubr.msk.f32.vlgmr.msra.gmra.mxu0 %vm939_vm2, %v5900_v26  ;;  %v1858_v21 = vsub.f32 %v5832_v44, %v1850_v60 }
 0x63d   : > { %4367 = vmatpush3.msra.mxu0 %v5755_v61  ;;  %v5906_v35 = vpop.permute.xlu1 %2146  ;;  %4799 = vpow2.f32 %v1413_v31 }
 0x63e   : > { %4368 = vmatprep.subr.mxu0 %v1888_v56  ;;  %4801 = vpow2.f32 %v1859_v28  ;;  %v1873_v29 = vmul.f32 1.442695, %v1858_v21 }
 0x63f   : > { %4369 = vmatpush3.msra.mxu0 %v1888_v56  ;;  %v1876_v33 = vpop.permute.xlu0 %1875  ;;  %4803 = vpow2.f32 %v1861_v10  ;;  %v1867_v56 = vmul.f32 1.442695, %v1855_v20 }
 0x640   : > { %4370 = vmatprep.subr.mxu0 %v5868_v54  ;;  %4805 = vpow2.f32 %v1863_v32 }
 0x641   : > { %v5912_v6 = vpop.eup %4789  ;;  %4371 = vmatpush3.msra.mxu0 %v5868_v54  ;;  %v5915_v61 = vpop.permute.xlu1 %2142  ;;  %4807 = vpow2.f32 %v1865_v34 }
 0x642   : > { %4372 = vmatprep.subr.mxu0 %v5870_v57  ;;  %4329 = vmatprep.mubr.msk.f32.mxu0 %vm939_vm2, %v5912_v6  ;;  %v5922_v43 = vpop.eup %4791  ;;  %4809 = vpow2.f32 %v1867_v56 }
 0x643   : > { %4373 = vmatpush3.msra.mxu0 %v5870_v57  ;;  %v2145_v54 = vpop.permute.xlu0 %2144  ;;  %v1871_v57 = vmul.f32 1.442695, %v1857_v51  ;;  %4811 = vpow2.f32 %v1869_v48 }
 0x644   : > { %4330 = vmatmul.mubr.msk.f32.gmra.mxu0 %vm939_vm2, %v5922_v43  ;;  %4374 = vmatprep.subr.mxu0 %v5872_v47 }
 0x645   : > { %v5930_v36 = vpop.eup %4793  ;;  %4375 = vmatpush3.msra.mxu0 %v5872_v47  ;;  %v5933_v8 = vpop.permute.xlu1 %2138  ;;  %4813 = vpow2.f32 %v1871_v57 }
 0x646   : > { %4376 = vmatprep.subr.mxu0 %v5874_v49  ;;  %4332 = vmatprep.mubr.msk.f32.mxu0 %vm939_vm2, %v5930_v36  ;;  %v5939_v9 = vpop.eup %4795  ;;  %4815 = vpow2.f32 %v1873_v29 }
 0x647   : > { %4377 = vmatpush3.msra.mxu0 %v5874_v49  ;;  %v2141_v30 = vpop.permute.xlu0 %2140 }
 0x648   : > { %4333 = vmatmul.mubr.msk.f32.gmra.mxu0 %vm939_vm2, %v5939_v9  ;;  %4378 = vmatprep.subr.mxu0 %v5876_v58 }
 0x649   : > { %v5945_v47 = vpop.eup %4797  ;;  %4379 = vmatpush3.msra.mxu0 %v5876_v58  ;;  %v5948_v44 = vpop.permute.xlu1 %2134 }
 0x64a   : > { %4380 = vmatprep.subr.mxu0 %v1876_v33  ;;  %4335 = vmatprep.mubr.msk.f32.mxu0 %vm939_vm2, %v5945_v47  ;;  %v5952_v38 = vpop.eup %4799 }
 0x64b   : > { %4381 = vmatpush3.msra.mxu0 %v1876_v33  ;;  %v2137_v49 = vpop.permute.xlu0 %2136  ;;  %v5954_v41 = vpop.eup %4801 }
 0x64c   : > { %4336 = vmatmul.mubr.msk.f32.gmra.mxu0 %vm939_vm2, %v5952_v38  ;;  %4394 = vmatprep.subr.msk.mxu0 %vm801_vm1, %v5895_v18  ;;  %v5962_v39 = vpop.eup %4803 }
 0x64d   : > { %4382 = vmatprep.mubr.msk.f32.mxu0 %vm939_vm2, %v5954_v41  ;;  %v2121_v58 = vpop.permute.xlu1 %2120  ;;  %v5964_v46 = vpop.eup %4805 }
 0x64e   : > { %v5974_v52 = vpop.eup %4807 }
 0x64f   : > { %v2119_v55 = vpop.permute.xlu0 %2118  ;;  %v5976_v59 = vpop.eup %4809 }
 0x650   : > { %4383 = vmatmul.mubr.msk.f32.vlgmr.msra.gmra.mxu0 %vm939_vm2, %v5962_v39  ;;  %v5985_v15 = vpop.eup %4811 }
 0x651   : > { %4395 = vmatpush3.xpose.msk.msra.mxu0 %vm801_vm1, %v5895_v18  ;;  %4385 = vmatprep.mubr.msk.f32.mxu0 %vm939_vm2, %v5964_v46  ;;  %v2125_v53 = vpop.permute.xlu1 %2124 }
 0x652   : > { %4396 = vmatprep.subr.msk.mxu0 %vm801_vm1, %v5906_v35  ;;  %v5987_v25 = vpop.eup %4813 }
 0x653   : > { %v2123_v12 = vpop.permute.xlu0 %2122  ;;  %v5996_v23 = vpop.eup %4815 }
 0x654   : > { %4386 = vmatmul.mubr.msk.f32.gmra.mxu0 %vm939_vm2, %v5974_v52 }
 0x655   : > { %4397 = vmatpush3.xpose.msk.msra.mxu0 %vm801_vm1, %v5906_v35  ;;  %4388 = vmatprep.mubr.msk.f32.mxu0 %vm939_vm2, %v5976_v59  ;;  %v2129_v14 = vpop.permute.xlu1 %2128 }
 0x656   : > { %4398 = vmatprep.subr.msk.mxu0 %vm801_vm1, %v2145_v54 }
 0x657   : > { %v2127_v18 = vpop.permute.xlu0 %2126 }
 0x658   : > { %4389 = vmatmul.mubr.msk.f32.gmra.mxu0 %vm939_vm2, %v5985_v15 }
 0x659   : > { %4399 = vmatpush3.xpose.msk.msra.mxu0 %vm801_vm1, %v2145_v54  ;;  %4391 = vmatprep.mubr.msk.f32.mxu0 %vm939_vm2, %v5987_v25  ;;  %v2133_v31 = vpop.permute.xlu1 %2132 }
 0x65a   : > { %4400 = vmatprep.subr.msk.mxu0 %vm801_vm1, %v5915_v61 }
 0x65b   : > { %v2131_v28 = vpop.permute.xlu0 %2130 }
 0x65c   : > { %4392 = vmatmul.mubr.msk.f32.gmra.mxu0 %vm939_vm2, %v5996_v23 }
 0x65d   : > { %4401 = vmatpush3.xpose.msk.msra.mxu0 %vm801_vm1, %v5915_v61  ;;  %4410 = vmatprep.mubr.msk.f32.mxu0 %vm801_vm1, %v2119_v55  ;;  %v2348_v13 = vpop.permute.xlu1 %2347 }
 0x65e   : > { %4402 = vmatprep.subr.msk.mxu0 %vm801_vm1, %v2141_v30 }
 0x65f   : > { %v2350_v60 = vpop.permute.xlu0 %2349 }
 0x660   : > { %4422 = vmatprep.subr.mxu1 %v2350_v60 }
 0x661   : > { %4403 = vmatpush3.xpose.msk.msra.mxu0 %vm801_vm1, %v2141_v30  ;;  %4423 = vmatpush3.msra.mxu1 %v2350_v60  ;;  %v2346_v35 = vpop.permute.xlu1 %2345 }
 0x662   : > { %4404 = vmatprep.subr.msk.mxu0 %vm801_vm1, %v5933_v8  ;;  %4424 = vmatprep.subr.mxu1 %v2348_v13 }
 0x663   : > { %4425 = vmatpush3.msra.mxu1 %v2348_v13  ;;  %v2342_v45 = vpop.permute.xlu0 %2341 }
 0x664   : > { %4426 = vmatprep.subr.mxu1 %v2346_v35 }
 0x665   : > { %4405 = vmatpush3.xpose.msk.msra.mxu0 %vm801_vm1, %v5933_v8  ;;  %4427 = vmatpush3.msra.mxu1 %v2346_v35  ;;  %v2344_v10 = vpop.permute.xlu1 %2343 }
 0x666   : > { %4406 = vmatprep.subr.msk.mxu0 %vm801_vm1, %v2137_v49  ;;  %4428 = vmatprep.subr.mxu1 %v2344_v10 }
 0x667   : > { %4429 = vmatpush3.msra.mxu1 %v2344_v10 }
 0x668   : > { %4430 = vmatprep.subr.mxu1 %v2342_v45 }
 0x669   : > { %4407 = vmatpush3.xpose.msk.msra.mxu0 %vm801_vm1, %v2137_v49  ;;  %4431 = vmatpush3.msra.mxu1 %v2342_v45  ;;  %v2340_v32 = vpop.permute.xlu1 %2339  ;;  %v2112_v45 = vld [vmem:[#allocation9 + $0xd0] sm:$0xff] }
 0x66a   : > { %4408 = vmatprep.subr.msk.mxu0 %vm801_vm1, %v5948_v44  ;;  %4432 = vmatprep.subr.mxu1 %v2340_v32 }
 0x66b   : > { %4433 = vmatpush3.msra.mxu1 %v2340_v32  ;;  %v2115_v32 = vld [vmem:[#allocation9 + $0xe8] sm:$0xff] }
 0x66d   : > { %4409 = vmatpush3.xpose.msk.msra.mxu0 %vm801_vm1, %v5948_v44 }
 0x670   : > { %4411 = vmatmul.mubr.msk.f32.vlgmr.msra.gmra.mxu0 %vm801_vm1, %v2121_v58  ;;  %v2111_v58 = vld [vmem:[#allocation9 + $0xc8] sm:$0xff] }
 0x671   : > { %4413 = vmatprep.mubr.msk.f32.mxu0 %vm801_vm1, %v2123_v12 }
 0x674   : > { %4414 = vmatmul.mubr.msk.f32.gmra.mxu0 %vm801_vm1, %v2125_v53  ;;  %v2110_v53 = vld [vmem:[#allocation9 + $0xc0] sm:$0xff] }
 0x675   : > { %4416 = vmatprep.mubr.msk.f32.mxu0 %vm801_vm1, %v2127_v18  ;;  %v2113_v18 = vld [vmem:[#allocation9 + $0xd8] sm:$0xff] }
 0x678   : > { %4417 = vmatmul.mubr.msk.f32.gmra.mxu0 %vm801_vm1, %v2129_v14 }
 0x679   : > { %4419 = vmatprep.mubr.msk.f32.mxu0 %vm801_vm1, %v2131_v28 }
 0x67c   : > { %4420 = vmatmul.mubr.msk.f32.gmra.mxu0 %vm801_vm1, %v2133_v31 }
 0x6fc   : > { %v6022_v20 = vpop.f32.mrf.mxu0 }
 0x6fe   : > { %v6024_v33 = vpop.f32.mrf.mxu0 }
 0x704   : > { %v6026_v61 = vpop.f32.mrf.mxu0 }
 0x706   : > { %v6028_v34 = vpop.f32.mrf.mxu0 }
 0x708   : > { %v6030_v27 = vpop.f32.mrf.mxu0 }
 0x70a   : > { %v6032_v56 = vpop.f32.mrf.mxu0 }
 0x70c   : > { %v6034_v51 = vpop.f32.mrf.mxu0 }
 0x70e   : > { %v6036_v54 = vpop.f32.mrf.mxu0 }
 0x710   : > { %v6038_v8 = vpop.f32.mrf.mxu0 }
 0x712   : > { %v6040_v48 = vpop.f32.mrf.mxu0 }
 0x714   : > { %v6042_v21 = vpop.f32.mrf.mxu0 }
 0x716   : > { %v6044_v57 = vpop.f32.mrf.mxu0 }
 0x718   : > { %v6046_v30 = vpop.f32.mrf.mxu0 }
 0x71a   : > { %v6048_v44 = vpop.f32.mrf.mxu0 }
 0x71c   : > { %v6050_v29 = vpop.f32.mrf.mxu0 }
 0x71e   : > { %v6052_v49 = vpop.f32.mrf.mxu0 }
 0x730   : > { %v4412_v55 = vpop.f32.mrf.mxu0 }
 0x731   : > { %v6054_v12 = vadd.f32 %v4412_v55, %v2111_v58 }
 0x732   : > { %v2248_v14 = vpop.f32.mrf.mxu0 }
 0x733   : > { %v6056_v31 = vadd.f32 %v2248_v14, %v2110_v53  ;;  %v2290_v28 = vsel %vm939_vm2, %v6054_v12, -inf }
 0x734   : > { %2291 = vmax.xlane.f32.xlu1 %v2290_v28  ;;  %v4415_v13 = vpop.f32.mrf.mxu0  ;;  %v2114_v28 = vld [vmem:[#allocation9 + $0xe0] sm:$0xff] }
 0x735   : > { %v6060_v60 = vadd.f32 %v4415_v13, %v2113_v18  ;;  %v2287_v35 = vsel %vm939_vm2, %v6056_v31, -inf  ;;  %v2117_v18 = vld [vmem:[#allocation9 + $0xf8] sm:$0xff] }
 0x736   : > { %2288 = vmax.xlane.f32.xlu0 %v2287_v35  ;;  %v2258_v10 = vpop.f32.mrf.mxu0 }
 0x737   : > { %v6064_v55 = vadd.f32 %v2258_v10, %v2112_v45  ;;  %v2296_v53 = vsel %vm939_vm2, %v6060_v60, -inf }
 0x738   : > { %v4418_v58 = vpop.f32.mrf.mxu0 }
 0x739   : > { %v6066_v11 = vadd.f32 %v4418_v58, %v2115_v32  ;;  %v2293_v10 = vsel %vm939_vm2, %v6064_v55, -inf  ;;  %v2116_v32 = vld [vmem:[#allocation9 + $0xf0] sm:$0xff] }
 0x73a   : > { %2297 = vmax.xlane.f32.xlu0 %v2296_v53  ;;  %v2268_v14 = vpop.f32.mrf.mxu0 }
 0x73b   : > { %v2302_v13 = vsel %vm939_vm2, %v6066_v11, -inf  ;;  %v6072_v7 = vadd.f32 %v2268_v14, %v2114_v28  ;;  %v1571_v28 = vsel %vm939_vm2, %v5900_v26, 0.0  ;;  %v2031_v26 = vsel %vm939_vm2, %v5962_v39, 0.0 }
 0x73c   : > { %2303 = vmax.xlane.f32.xlu1 %v2302_v13  ;;  %v4421_v35 = vpop.f32.mrf.mxu0  ;;  %v2049_v39 = vsel %vm939_vm2, %v5996_v23, 0.0 }
 0x73d   : > { %v6074_v5 = vadd.f32 %v4421_v35, %v2117_v18  ;;  %v2299_v13 = vsel %vm939_vm2, %v6072_v7, -inf  ;;  %v1577_v18 = vsel %vm939_vm2, %v5922_v43, 0.0  ;;  %v1568_v35 = vsel %vm939_vm2, %v5893_v16, 0.0 }
 0x73e   : > { %2294 = vmax.xlane.f32.xlu0 %v2293_v10  ;;  %v2278_v45 = vpop.f32.mrf.mxu0  ;;  %v2037_v10 = vsel %vm939_vm2, %v5974_v52, 0.0  ;;  %v2043_v16 = vsel %vm939_vm2, %v5985_v15, 0.0  ;;  %v1574_v43 = vsel %vm939_vm2, %v5912_v6, 0.0  ;;  %v1580_v52 = vsel %vm939_vm2, %v5930_v36, 0.0 }
 0x73f   : > { %v2308_v58 = vsel %vm939_vm2, %v6074_v5, -inf  ;;  %v6080_v53 = vadd.f32 %v2278_v45, %v2116_v32  ;;  %v2040_v6 = vsel %vm939_vm2, %v5976_v59, 0.0 }
 0x740   : > { %2309 = vmax.xlane.f32.xlu1 %v2308_v58 }
 0x741   : > { %v2305_v14 = vsel %vm939_vm2, %v6080_v53, -inf }
 0x742   : > { %2300 = vmax.xlane.f32.xlu0 %v2299_v13 }
 0x746   : > { %2306 = vmax.xlane.f32.xlu0 %v2305_v14 }
 0x751   : > { %2335 = vrot.lane.b32.xlu1 %v5451_v40, %s5162_s21  ;;  %v2028_v40 = vsel %vm939_vm2, %v5954_v41, 0.0  ;;  %v1589_v41 = vsel %vm939_vm2, %v5952_v38, 0.0  ;;  %v1586_v38 = vsel %vm939_vm2, %v5945_v47, 0.0 }
 0x75c   : > { %2337 = vrot.lane.b32.xlu0 %v5469_v50, %s5162_s21  ;;  %v1583_v50 = vsel %vm939_vm2, %v5939_v9, 0.0  ;;  %v2034_v9 = vsel %vm939_vm2, %v5964_v46, 0.0  ;;  %v2046_v46 = vsel %vm939_vm2, %v5987_v25, 0.0 }
 0x775   : > { %1572 = vadd.xlane.f32.xlu1 %v1571_v28 }
 0x779   : > { %1578 = vadd.xlane.f32.xlu1 %v1577_v18 }
 0x77b   : > { %1569 = vadd.xlane.f32.xlu0 %v1568_v35 }
 0x77d   : > { %2038 = vadd.xlane.f32.xlu1 %v2037_v10 }
 0x77f   : > { %2029 = vadd.xlane.f32.xlu0 %v2028_v40 }
 0x781   : > { %1584 = vadd.xlane.f32.xlu1 %v1583_v50 }
 0x783   : > { %2032 = vadd.xlane.f32.xlu0 %v2031_v26 }
 0x785   : > { %2044 = vadd.xlane.f32.xlu1 %v2043_v16 }
 0x787   : > { %1575 = vadd.xlane.f32.xlu0 %v1574_v43 }
 0x789   : > { %1590 = vadd.xlane.f32.xlu1 %v1589_v41 }
 0x78b   : > { %2035 = vadd.xlane.f32.xlu0 %v2034_v9 }
 0x78d   : > { %2050 = vadd.xlane.f32.xlu1 %v2049_v39 }
 0x78f   : > { %1581 = vadd.xlane.f32.xlu0 %v1580_v52 }
 0x793   : > { %2041 = vadd.xlane.f32.xlu0 %v2040_v6 }
 0x797   : > { %1587 = vadd.xlane.f32.xlu0 %v1586_v38 }
 0x79b   : > { %2047 = vadd.xlane.f32.xlu0 %v2046_v46 }
 0x7bd   : > { %v2292_v15 = vpop.xlane.xlu1 %2291 }
 0x7be   : > { %v2312_v23 = vsub.f32 %v6054_v12, %v2292_v15 }
 0x7bf   : > { %v2289_v45 = vpop.xlane.xlu0 %2288 }
 0x7c0   : > { %v2321_v32 = vmul.f32 1.442695, %v2312_v23  ;;  %v2311_v36 = vsub.f32 %v6056_v31, %v2289_v45 }
 0x7c2   : > { %4817 = vpow2.f32 %v2321_v32  ;;  %v2319_v58 = vmul.f32 1.442695, %v2311_v36 }
 0x7c3   : > { %v2298_v13 = vpop.xlane.xlu0 %2297 }
 0x7c4   : > { %4819 = vpow2.f32 %v2319_v58  ;;  %v2314_v59 = vsub.f32 %v6060_v60, %v2298_v13 }
 0x7c5   : > { %v2304_v14 = vpop.xlane.xlu1 %2303 }
 0x7c6   : > { %v2325_v47 = vmul.f32 1.442695, %v2314_v59  ;;  %v2316_v28 = vsub.f32 %v6066_v11, %v2304_v14  ;;  %v1144_v59 = vsel %vm939_vm2, %v5653_v2, 0.0  ;;  %v1141_v14 = vsel %vm939_vm2, %v5651_v63, 0.0 }
 0x7c7   : > { %v2295_v18 = vpop.xlane.xlu0 %2294  ;;  %v1153_v2 = vsel %vm939_vm2, %v5713_v22, 0.0  ;;  %v1159_v63 = vsel %vm939_vm2, %v5729_v37, 0.0 }
 0x7c8   : > { %4821 = vpow2.f32 %v2325_v47  ;;  %v2329_v25 = vmul.f32 1.442695, %v2316_v28  ;;  %v2313_v35 = vsub.f32 %v6064_v55, %v2295_v18  ;;  %v1150_v47 = vsel %vm939_vm2, %v5709_v19, 0.0 }
 0x7c9   : > { %v2310_v12 = vpop.xlane.xlu1 %2309  ;;  %v1147_v28 = vsel %vm939_vm2, %v5705_v17, 0.0  ;;  %v1156_v18 = vsel %vm939_vm2, %v5717_v24, 0.0 }
 0x7ca   : > { %4823 = vpow2.f32 %v2329_v25  ;;  %v2323_v10 = vmul.f32 1.442695, %v2313_v35  ;;  %v2318_v31 = vsub.f32 %v6074_v5, %v2310_v12  ;;  %v1162_v25 = vsel %vm939_vm2, %v5732_v42, 0.0 }
 0x7cb   : > { %v2301_v40 = vpop.xlane.xlu0 %2300 }
 0x7cc   : > { %4825 = vpow2.f32 %v2323_v10  ;;  %v2333_v50 = vmul.f32 1.442695, %v2318_v31  ;;  %v2315_v26 = vsub.f32 %v6072_v7, %v2301_v40 }
 0x7cd   : > { %v2336_v52 = vpop.permute.xlu1 %2335 }
 0x7ce   : > { %4827 = vpow2.f32 %v2333_v50  ;;  %v2327_v60 = vmul.f32 1.442695, %v2315_v26 }
 0x7cf   : > { %v4818_v16 = vpop.eup %4817  ;;  %v2307_v43 = vpop.xlane.xlu0 %2306 }
 0x7d0   : > { %4829 = vpow2.f32 %v2327_v60  ;;  %v2317_v11 = vsub.f32 %v6080_v53, %v2307_v43  ;;  %v2491_v41 = vsel %vm939_vm2, %v4818_v16, 0.0 }
 0x7d1   : > { %v4820_v55 = vpop.eup %4819  ;;  %2492 = vadd.xlane.f32.xlu1 %v2491_v41 }
 0x7d2   : > { %v2331_v9 = vmul.f32 1.442695, %v2317_v11  ;;  %4438 = vmatprep.mubr.msk.f32.mxu1 %vm939_vm2, %v4820_v55  ;;  %v2488_v5 = vsel %vm939_vm2, %v4820_v55, 0.0 }
 0x7d3   : > { %2489 = vadd.xlane.f32.xlu0 %v2488_v5  ;;  %v2338_v39 = vpop.permute.xlu0 %2337 }
 0x7d4   : > { %4831 = vpow2.f32 %v2331_v9  ;;  %4434 = vmatprep.subr.mxu1 %v2338_v39 }
 0x7d5   : > { %v4822_v7 = vpop.eup %4821  ;;  %4435 = vmatpush3.msra.mxu1 %v2338_v39 }
 0x7d6   : > { %4436 = vmatprep.subr.mxu1 %v2336_v52  ;;  %v2497_v6 = vsel %vm939_vm2, %v4822_v7, 0.0 }
 0x7d7   : > { %v4824_v53 = vpop.eup %4823  ;;  %2498 = vadd.xlane.f32.xlu1 %v2497_v6  ;;  %4437 = vmatpush3.msra.mxu1 %v2336_v52 }
 0x7d8   : > { %4439 = vmatmul.mubr.msk.f32.vlgmr.msra.gmra.mxu1 %vm939_vm2, %v4818_v16  ;;  %v2503_v15 = vsel %vm939_vm2, %v4824_v53, 0.0 }
 0x7d9   : > { %v4826_v38 = vpop.eup %4825 }
 0x7da   : > { %4441 = vmatprep.mubr.msk.f32.mxu1 %vm939_vm2, %v4826_v38  ;;  %v2494_v46 = vsel %vm939_vm2, %v4826_v38, 0.0 }
 0x7db   : > { %v4828_v23 = vpop.eup %4827  ;;  %2495 = vadd.xlane.f32.xlu0 %v2494_v46  ;;  %2504 = vadd.xlane.f32.xlu1 %v2503_v15 }
 0x7dc   : > { %4442 = vmatmul.mubr.msk.f32.gmra.mxu1 %vm939_vm2, %v4822_v7  ;;  %v2509_v36 = vsel %vm939_vm2, %v4828_v23, 0.0 }
 0x7dd   : > { %v4830_v45 = vpop.eup %4829 }
 0x7de   : > { %4444 = vmatprep.mubr.msk.f32.mxu1 %vm939_vm2, %v4830_v45  ;;  %v2500_v32 = vsel %vm939_vm2, %v4830_v45, 0.0 }
 0x7df   : > { %2501 = vadd.xlane.f32.xlu0 %v2500_v32  ;;  %2510 = vadd.xlane.f32.xlu1 %v2509_v36  ;;  %v2579_v32 = vld [vmem:[#allocation7 + $0x10] sm:$0xff] }
 0x7e0   : > { %4445 = vmatmul.mubr.msk.f32.gmra.mxu1 %vm939_vm2, %v4824_v53 }
 0x7e1   : > { %v4832_v58 = vpop.eup %4831 }
 0x7e2   : > { %4447 = vmatprep.mubr.msk.f32.mxu1 %vm939_vm2, %v4832_v58  ;;  %v2506_v13 = vsel %vm939_vm2, %v4832_v58, 0.0 }
 0x7e3   : > { %2507 = vadd.xlane.f32.xlu0 %v2506_v13  ;;  %1145 = vadd.xlane.f32.xlu1 %v1144_v59 }
 0x7e4   : > { %4448 = vmatmul.mubr.msk.f32.gmra.mxu1 %vm939_vm2, %v4828_v23 }
 0x7e7   : > { %1142 = vadd.xlane.f32.xlu0 %v1141_v14  ;;  %1151 = vadd.xlane.f32.xlu1 %v1150_v47 }
 0x7eb   : > { %1148 = vadd.xlane.f32.xlu0 %v1147_v28  ;;  %1157 = vadd.xlane.f32.xlu1 %v1156_v18 }
 0x7ef   : > { %1154 = vadd.xlane.f32.xlu0 %v1153_v2  ;;  %1163 = vadd.xlane.f32.xlu1 %v1162_v25 }
 0x7f3   : > { %1160 = vadd.xlane.f32.xlu0 %v1159_v63 }
 0x7fe   : > { %v1573_v19 = vpop.xlane.xlu1 %1572 }
 0x7ff   : > { %4833 = vrcp.f32 %v1573_v19 }
 0x802   : > { %v1579_v17 = vpop.xlane.xlu1 %1578 }
 0x804   : > { %v1570_v35 = vpop.xlane.xlu0 %1569 }
 0x805   : > { %4835 = vrcp.f32 %v1570_v35 }
 0x806   : > { %v2039_v24 = vpop.xlane.xlu1 %2038 }
 0x808   : > { %v2030_v12 = vpop.xlane.xlu0 %2029 }
 0x809   : > { %4837 = vrcp.f32 %v2030_v12 }
 0x80a   : > { %v1585_v42 = vpop.xlane.xlu1 %1584 }
 0x80c   : > { %v4834_v10 = vpop.eup %4833  ;;  %v2033_v31 = vpop.xlane.xlu0 %2032 }
 0x80d   : > { %4839 = vrcp.f32 %v2033_v31  ;;  %v1601_v22 = vmul.f32 %v4834_v10, %v6022_v20 }
 0x80e   : > { %4841 = vrcp.f32 %v1579_v17  ;;  %v2045_v26 = vpop.xlane.xlu1 %2044 }
 0x80f   : > { %1618 = vrot.lane.b32.xlu1 %v1601_v22, %s5163_s22 }
 0x810   : > { %v1576_v37 = vpop.xlane.xlu0 %1575 }
 0x811   : > { %4843 = vrcp.f32 %v1576_v37 }
 0x812   : > { %v4836_v40 = vpop.eup %4835  ;;  %4845 = vrcp.f32 %v2039_v24  ;;  %v1591_v41 = vpop.xlane.xlu1 %1590 }
 0x813   : > { %v1600_v50 = vmul.f32 %v4836_v40, %v6024_v33 }
 0x814   : > { %v2036_v60 = vpop.xlane.xlu0 %2035 }
 0x815   : > { %4847 = vrcp.f32 %v2036_v60  ;;  %1616 = vrot.lane.b32.xlu0 %v1600_v50, %s5163_s22 }
 0x816   : > { %v4838_v16 = vpop.eup %4837  ;;  %4849 = vrcp.f32 %v1585_v42  ;;  %v2051_v52 = vpop.xlane.xlu1 %2050 }
 0x817   : > { %v2060_v20 = vmul.f32 %v4838_v16, %v6040_v48 }
 0x818   : > { %v1582_v43 = vpop.xlane.xlu0 %1581 }
 0x819   : > { %4851 = vrcp.f32 %v1582_v43  ;;  %2076 = vrot.lane.b32.xlu1 %v2060_v20, %s5164_s30 }
 0x81a   : > { %v4840_v11 = vpop.eup %4839  ;;  %4853 = vrcp.f32 %v2045_v26 }
 0x81b   : > { %v2061_v55 = vmul.f32 %v4840_v11, %v6038_v8  ;;  %v4842_v33 = vpop.eup %4841 }
 0x81c   : > { %v2042_v9 = vpop.xlane.xlu0 %2041  ;;  %v1603_v48 = vmul.f32 %v4842_v33, %v6026_v61  ;;  %v6631_v33 = vld [vmem:[#allocation24_spill] sm:$0xff] }
 0x81d   : > { %4855 = vrcp.f32 %v2042_v9  ;;  %2078 = vrot.lane.b32.xlu1 %v2061_v55, %s5164_s30 }
 0x81e   : > { %v4844_v5 = vpop.eup %4843  ;;  %4857 = vrcp.f32 %v1591_v41  ;;  %v6630_v41 = vld [vmem:[#allocation23_spill] sm:$0xff] }
 0x81f   : > { %v1602_v39 = vmul.f32 %v4844_v5, %v6028_v34  ;;  %v4846_v7 = vpop.eup %4845 }
 0x820   : > { %v1588_v6 = vpop.xlane.xlu0 %1587  ;;  %v2063_v38 = vmul.f32 %v4846_v7, %v6042_v21  ;;  %v2578_v7 = vld [vmem:[#allocation7 + $0x8] sm:$0xff] }
 0x821   : > { %4859 = vrcp.f32 %v1588_v6  ;;  %1620 = vrot.lane.b32.xlu0 %v1602_v39, %s5163_s22  ;;  %1622 = vrot.lane.b32.xlu1 %v1603_v48, %s5163_s22 }
 0x822   : > { %v4848_v8 = vpop.eup %4847  ;;  %4861 = vrcp.f32 %v2051_v52 }
 0x823   : > { %v2062_v53 = vmul.f32 %v4848_v8, %v6044_v57  ;;  %v4850_v46 = vpop.eup %4849  ;;  %v2580_v57 = vld [vmem:[#allocation7 + $0x18] sm:$0xff]  ;;  %v2577_v8 = vld [vmem:[#allocation7] sm:$0xff] }
 0x824   : > { %v2048_v15 = vpop.xlane.xlu0 %2047  ;;  %v1605_v23 = vmul.f32 %v4850_v46, %v6030_v27  ;;  %4450 = vmatprep.subr.mxu1 %v2580_v57 }
 0x825   : > { %4863 = vrcp.f32 %v2048_v15  ;;  %2080 = vrot.lane.b32.xlu0 %v2062_v53, %s5164_s30  ;;  %2082 = vrot.lane.b32.xlu1 %v2063_v38, %s5164_s30 }
 0x826   : > { %v4852_v61 = vpop.eup %4851  ;;  %4451 = vmatpush3.msra.mxu1 %v2580_v57 }
 0x827   : > { %v1604_v34 = vmul.f32 %v4852_v61, %v6032_v56  ;;  %v4854_v45 = vpop.eup %4853  ;;  %4452 = vmatprep.subr.mxu1 %v2579_v32 }
 0x828   : > { %v2065_v58 = vmul.f32 %v4854_v45, %v6046_v30  ;;  %4453 = vmatpush3.msra.mxu1 %v2579_v32 }
 0x829   : > { %1624 = vrot.lane.b32.xlu0 %v1604_v34, %s5163_s22  ;;  %1626 = vrot.lane.b32.xlu1 %v1605_v23, %s5163_s22 }
 0x82a   : > { %v4856_v21 = vpop.eup %4855  ;;  %4454 = vmatprep.subr.mxu1 %v2578_v7 }
 0x82b   : > { %v2064_v36 = vmul.f32 %v4856_v21, %v6048_v44  ;;  %v4858_v13 = vpop.eup %4857  ;;  %4455 = vmatpush3.msra.mxu1 %v2578_v7 }
 0x82c   : > { %v1607_v59 = vmul.f32 %v4858_v13, %v6034_v51  ;;  %4456 = vmatprep.subr.mxu1 %v2577_v8 }
 0x82d   : > { %2084 = vrot.lane.b32.xlu0 %v2064_v36, %s5164_s30  ;;  %2086 = vrot.lane.b32.xlu1 %v2065_v58, %s5164_s30 }
 0x82e   : > { %v4860_v27 = vpop.eup %4859  ;;  %4457 = vmatpush3.msra.mxu1 %v2577_v8  ;;  %v4935_v8 = vld [vmem:[%s5374_s24 + $0x18] sm:$0xff] }
 0x82f   : > { %v1606_v56 = vmul.f32 %v4860_v27, %v6036_v54  ;;  %v4862_v14 = vpop.eup %4861 }
 0x830   : > { %v2067_v47 = vmul.f32 %v4862_v14, %v6050_v29 }
 0x831   : > { %1628 = vrot.lane.b32.xlu0 %v1606_v56, %s5163_s22  ;;  %1630 = vrot.lane.b32.xlu1 %v1607_v59, %s5163_s22 }
 0x832   : > { %v4864_v44 = vpop.eup %4863 }
 0x833   : > { %v2066_v30 = vmul.f32 %v4864_v44, %v6052_v49 }
 0x835   : > { %2088 = vrot.lane.b32.xlu0 %v2066_v30, %s5164_s30  ;;  %2090 = vrot.lane.b32.xlu1 %v2067_v47, %s5164_s30  ;;  %s507_s30 = scalar_lea.vmem [#allocation13], %s3812_s20  ;;  %s5077_s20 = scalar_lea.vmem %s5076_s25, 512 }
 0x85a   : > { %v2493_v28 = vpop.xlane.xlu1 %2492 }
 0x85c   : > { %v2490_v18 = vpop.xlane.xlu0 %2489 }
 0x860   : > { %v2499_v2 = vpop.xlane.xlu1 %2498 }
 0x864   : > { %v2496_v54 = vpop.xlane.xlu0 %2495  ;;  %v2505_v25 = vpop.xlane.xlu1 %2504 }
 0x868   : > { %v6194_v51 = vpop.xlane.xlu0 %2501  ;;  %v6196_v63 = vpop.xlane.xlu1 %2510 }
 0x86c   : > { %v6198_v19 = vpop.xlane.xlu0 %2507  ;;  %v1146_v17 = vpop.xlane.xlu1 %1145 }
 0x86d   : > { %4865 = vrcp.f32 %v1146_v17 }
 0x870   : > { %v1143_v49 = vpop.xlane.xlu0 %1142  ;;  %v1152_v35 = vpop.xlane.xlu1 %1151 }
 0x871   : > { %4867 = vrcp.f32 %v1143_v49 }
 0x872   : > { %4869 = vrcp.f32 %v1152_v35 }
 0x874   : > { %v1149_v29 = vpop.xlane.xlu0 %1148  ;;  %v1158_v24 = vpop.xlane.xlu1 %1157 }
 0x875   : > { %4871 = vrcp.f32 %v1149_v29 }
 0x876   : > { %4873 = vrcp.f32 %v1158_v24 }
 0x878   : > { %v1155_v12 = vpop.xlane.xlu0 %1154  ;;  %v1164_v10 = vpop.xlane.xlu1 %1163 }
 0x879   : > { %4875 = vrcp.f32 %v1155_v12 }
 0x87a   : > { %4877 = vrcp.f32 %v1164_v10  ;;  %v4866_v31 = vpop.eup %4865 }
 0x87b   : > { %v1174_v42 = vmul.f32 %v4866_v31, %v5758_v62 }
 0x87c   : > { %v1161_v22 = vpop.xlane.xlu0 %1160 }
 0x87d   : > { %4879 = vrcp.f32 %v1161_v22  ;;  %1182 = vst.msk [vmem:[#allocation2 + $0x8] sm:$0xff] %vm801_vm1, %v1174_v42 }
 0x87e   : > { %v4868_v37 = vpop.eup %4867  ;;  %4881 = vrcp.f32 %v2493_v28 }
 0x87f   : > { %v4870_v40 = vpop.eup %4869  ;;  %v1173_v50 = vmul.f32 %v4868_v37, %v5760_v0  ;;  %4883 = vrcp.f32 %v2490_v18 }
 0x880   : > { %v1176_v26 = vmul.f32 %v4870_v40, %v5762_v1  ;;  %4885 = vrcp.f32 %v2499_v2 }
 0x881   : > { %v1619_v60 = vpop.permute.xlu1 %1618  ;;  %1181 = vst.msk [vmem:[#allocation2] sm:$0xff] %vm801_vm1, %v1173_v50  ;;  %4887 = vrcp.f32 %v2496_v54 }
 0x882   : > { %v4872_v16 = vpop.eup %4871  ;;  %1642 = vst.msk [vmem:[#allocation2 + $0x8] sm:$0xff] %vm1640_vm3, %v1619_v60  ;;  %4889 = vrcp.f32 %v2505_v25 }
 0x883   : > { %1184 = vst.msk [vmem:[#allocation2 + $0x18] sm:$0xff] %vm801_vm1, %v1176_v26  ;;  %v4874_v20 = vpop.eup %4873  ;;  %v1175_v62 = vmul.f32 %v4872_v16, %v5764_v3  ;;  %4891 = vrcp.f32 %v6194_v51 }
 0x884   : > { %v1178_v43 = vmul.f32 %v4874_v20, %v5766_v4  ;;  %v6632_v4 = vld [vmem:[#allocation25_spill] sm:$0xff]  ;;  %4893 = vrcp.f32 %v6196_v63 }
 0x885   : > { %1183 = vst.msk [vmem:[#allocation2 + $0x10] sm:$0xff] %vm801_vm1, %v1175_v62  ;;  %4895 = vrcp.f32 %v6198_v19 }
 0x886   : > { %v4876_v11 = vpop.eup %4875  ;;  %1186 = vst.msk [vmem:[#allocation2 + $0x28] sm:$0xff] %vm801_vm1, %v1178_v43 }
 0x887   : > { %v4878_v0 = vpop.eup %4877  ;;  %v1617_v1 = vpop.permute.xlu0 %1616  ;;  %v1177_v55 = vmul.f32 %v4876_v11, %v6630_v41 }
 0x888   : > { %1641 = vst.msk [vmem:[#allocation2] sm:$0xff] %vm1640_vm3, %v1617_v1  ;;  %v1180_v9 = vmul.f32 %v4878_v0, %v6631_v33  ;;  %v3920_v1 = vld [vmem:[%s6593_s4] ss:$0 sm:$0xff] }
 0x889   : > { %1185 = vst.msk [vmem:[#allocation2 + $0x20] sm:$0xff] %vm801_vm1, %v1177_v55 }
 0x88a   : > { %v4880_v5 = vpop.eup %4879  ;;  %1188 = vst.msk [vmem:[#allocation2 + $0x38] sm:$0xff] %vm801_vm1, %v1180_v9  ;;  %v4933_v9 = vld [vmem:[%s5374_s24 + $0x8] sm:$0xff] }
 0x88b   : > { %v2077_v3 = vpop.permute.xlu1 %2076  ;;  %v1179_v39 = vmul.f32 %v4880_v5, %v6632_v4  ;;  %v4882_v46 = vpop.eup %4881 }
 0x88c   : > { %2101 = vst.msk [vmem:[#allocation2] sm:$0xff] %vm2100_vm4, %v2077_v3  ;;  %v4884_v34 = vpop.eup %4883 }
 0x88d   : > { %1187 = vst.msk [vmem:[#allocation2 + $0x30] sm:$0xff] %vm801_vm1, %v1179_v39  ;;  %v4886_v21 = vpop.eup %4885  ;;  %v4934_v39 = vld [vmem:[%s5374_s24] sm:$0xff] }
 0x88e   : > { %v4888_v13 = vpop.eup %4887 }
 0x88f   : > { %v2079_v48 = vpop.permute.xlu1 %2078  ;;  %v4890_v44 = vpop.eup %4889 }
 0x890   : > { %2102 = vst.msk [vmem:[#allocation2 + $0x8] sm:$0xff] %vm2100_vm4, %v2079_v48  ;;  %v4892_v28 = vpop.eup %4891 }
 0x891   : > { %v4894_v51 = vpop.eup %4893 }
 0x892   : > { %v4896_v17 = vpop.eup %4895 }
 0x893   : > { %v1621_v52 = vpop.permute.xlu0 %1620  ;;  %v1623_v6 = vpop.permute.xlu1 %1622 }
 0x894   : > { %1643 = vst.msk [vmem:[#allocation2 + $0x10] sm:$0xff] %vm1640_vm3, %v1621_v52  ;;  %1644 = vst.msk [vmem:[#allocation2 + $0x18] sm:$0xff] %vm1640_vm3, %v1623_v6 }
 0x897   : > { %v2081_v53 = vpop.permute.xlu0 %2080  ;;  %v2083_v38 = vpop.permute.xlu1 %2082 }
 0x898   : > { %2103 = vst.msk [vmem:[#allocation2 + $0x10] sm:$0xff] %vm2100_vm4, %v2081_v53  ;;  %2104 = vst.msk [vmem:[#allocation2 + $0x18] sm:$0xff] %vm2100_vm4, %v2083_v38  ;;  %v4440_v15 = vpop.f32.mrf.mxu1 }
 0x899   : > { %v2521_v61 = vmul.f32 %v4882_v46, %v4440_v15 }
 0x89a   : > { %v2449_v23 = vpop.f32.mrf.mxu1 }
 0x89b   : > { %v2520_v45 = vmul.f32 %v4884_v34, %v2449_v23  ;;  %v1625_v57 = vpop.permute.xlu0 %1624  ;;  %2538 = vrot.lane.b32.xlu1 %v2521_v61, %s5165_s16  ;;  %v1627_v32 = vpop.permute.xlu1 %1626  ;;  %v4936_v23 = vld [vmem:[%s5374_s24 + $0x10] sm:$0xff] }
 0x89c   : > { %1645 = vst.msk [vmem:[#allocation2 + $0x20] sm:$0xff] %vm1640_vm3, %v1625_v57  ;;  %1646 = vst.msk [vmem:[#allocation2 + $0x28] sm:$0xff] %vm1640_vm3, %v1627_v32  ;;  %v4443_v36 = vpop.f32.mrf.mxu1  ;;  %v4937_v57 = vld [vmem:[%s5374_s24 + $0x28] sm:$0xff] }
 0x89d   : > { %v2523_v58 = vmul.f32 %v4886_v21, %v4443_v36  ;;  %2536 = vrot.lane.b32.xlu0 %v2520_v45, %s5165_s16 }
 0x89e   : > { %v2459_v27 = vpop.f32.mrf.mxu1 }
 0x89f   : > { %v2522_v56 = vmul.f32 %v4888_v13, %v2459_v27  ;;  %v2085_v59 = vpop.permute.xlu0 %2084  ;;  %2542 = vrot.lane.b32.xlu1 %v2523_v58, %s5165_s16  ;;  %v2087_v14 = vpop.permute.xlu1 %2086 }
 0x8a0   : > { %2105 = vst.msk [vmem:[#allocation2 + $0x20] sm:$0xff] %vm2100_vm4, %v2085_v59  ;;  %2106 = vst.msk [vmem:[#allocation2 + $0x28] sm:$0xff] %vm2100_vm4, %v2087_v14  ;;  %v4446_v30 = vpop.f32.mrf.mxu1  ;;  %v4938_v59 = vld [vmem:[%s5374_s24 + $0x20] sm:$0xff] }
 0x8a1   : > { %v2525_v47 = vmul.f32 %v4890_v44, %v4446_v30  ;;  %2540 = vrot.lane.b32.xlu0 %v2522_v56, %s5165_s16  ;;  %v4939_v44 = vld [vmem:[%s5374_s24 + $0x38] sm:$0xff] }
 0x8a2   : > { %v2469_v18 = vpop.f32.mrf.mxu1 }
 0x8a3   : > { %v2524_v2 = vmul.f32 %v4892_v28, %v2469_v18  ;;  %v1629_v54 = vpop.permute.xlu0 %1628  ;;  %2546 = vrot.lane.b32.xlu1 %v2525_v47, %s5165_s16  ;;  %v1631_v25 = vpop.permute.xlu1 %1630 }
 0x8a4   : > { %1647 = vst.msk [vmem:[#allocation2 + $0x30] sm:$0xff] %vm1640_vm3, %v1629_v54  ;;  %1648 = vst.msk [vmem:[#allocation2 + $0x38] sm:$0xff] %vm1640_vm3, %v1631_v25  ;;  %v4449_v63 = vpop.f32.mrf.mxu1 }
 0x8a5   : > { %v2527_v19 = vmul.f32 %v4894_v51, %v4449_v63  ;;  %2544 = vrot.lane.b32.xlu0 %v2524_v2, %s5165_s16  ;;  %v4940_v2 = vld [vmem:[%s5374_s24 + $0x30] sm:$0xff]  ;;  %s6548_s24 = scalar_lea.sflag [#allocation6], %s505_s17 }
 0x8a6   : > { %v2479_v49 = vpop.f32.mrf.mxu1 }
 0x8a7   : > { %v2526_v35 = vmul.f32 %v4896_v17, %v2479_v49  ;;  %v2089_v29 = vpop.permute.xlu0 %2088  ;;  %2550 = vrot.lane.b32.xlu1 %v2527_v19, %s5165_s16  ;;  %v2091_v24 = vpop.permute.xlu1 %2090 }
 0x8a8   : > { %2107 = vst.msk [vmem:[#allocation2 + $0x30] sm:$0xff] %vm2100_vm4, %v2089_v29  ;;  %2108 = vst.msk [vmem:[#allocation2 + $0x38] sm:$0xff] %vm2100_vm4, %v2091_v24 }
 0x8a9   : > { %2548 = vrot.lane.b32.xlu0 %v2526_v35, %s5165_s16  ;;  %s3686_s16 = sshll.u32 %s507_s30, 4  ;;  %s6539_s16 = int_to_ptr.vmem [resolvable:$true] %s3686_s16 }
 0x8aa   : > { %p5078_p7 = scmp.lt.s32.totalorder %s6539_s16, %s5076_s25 }
 0x90d   : > { %v2539_v12 = vpop.permute.xlu1 %2538 }
 0x90e   : > { %2562 = vst.msk [vmem:[#allocation2 + $0x8] sm:$0xff] %vm2560_vm5, %v2539_v12 }
 0x90f   : > { %v2537_v10 = vpop.permute.xlu0 %2536 }
 0x910   : > { %2561 = vst.msk [vmem:[#allocation2] sm:$0xff] %vm2560_vm5, %v2537_v10 }
 0x911   : > { %v2543_v31 = vpop.permute.xlu1 %2542 }
 0x912   : > { %2564 = vst.msk [vmem:[#allocation2 + $0x18] sm:$0xff] %vm2560_vm5, %v2543_v31 }
 0x913   : > { %v2541_v22 = vpop.permute.xlu0 %2540 }
 0x914   : > { %2563 = vst.msk [vmem:[#allocation2 + $0x10] sm:$0xff] %vm2560_vm5, %v2541_v22 }
 0x915   : > { %v2547_v42 = vpop.permute.xlu1 %2546  ;;  %v2570_v50 = vld [vmem:[#allocation2 + $0x8] sm:$0xff] }
 0x916   : > { %2566 = vst.msk [vmem:[#allocation2 + $0x28] sm:$0xff] %vm2560_vm5, %v2547_v42 }
 0x917   : > { %v2545_v37 = vpop.permute.xlu0 %2544  ;;  %v2569_v40 = vld [vmem:[#allocation2] sm:$0xff] }
 0x918   : > { %2565 = vst.msk [vmem:[#allocation2 + $0x20] sm:$0xff] %vm2560_vm5, %v2545_v37  ;;  %4458 = vmatprep.mubr.msk.f32.mxu1 %vm523_vm0, %v2569_v40 }
 0x919   : > { %4459 = vmatmul.mubr.msk.f32.vlgmr.msra.gmra.mxu1 %vm523_vm0, %v2570_v50  ;;  %v2551_v26 = vpop.permute.xlu1 %2550  ;;  %v2572_v20 = vld [vmem:[#allocation2 + $0x18] sm:$0xff] }
 0x91a   : > { %2568 = vst.msk [vmem:[#allocation2 + $0x38] sm:$0xff] %vm2560_vm5, %v2551_v26 }
 0x91b   : > { %v2549_v60 = vpop.permute.xlu0 %2548  ;;  %v2571_v16 = vld [vmem:[#allocation2 + $0x10] sm:$0xff] }
 0x91c   : > { %2567 = vst.msk [vmem:[#allocation2 + $0x30] sm:$0xff] %vm2560_vm5, %v2549_v60  ;;  %4461 = vmatprep.mubr.msk.f32.mxu1 %vm523_vm0, %v2571_v16 }
 0x91d   : > { %4462 = vmatmul.mubr.msk.f32.gmra.mxu1 %vm523_vm0, %v2572_v20  ;;  %v2574_v43 = vld [vmem:[#allocation2 + $0x28] sm:$0xff] }
 0x91f   : > { %v2573_v62 = vld [vmem:[#allocation2 + $0x20] sm:$0xff] }
 0x920   : > { %4464 = vmatprep.mubr.msk.f32.mxu1 %vm523_vm0, %v2573_v62 }
 0x921   : > { %4465 = vmatmul.mubr.msk.f32.gmra.mxu1 %vm523_vm0, %v2574_v43  ;;  %v2576_v0 = vld [vmem:[#allocation2 + $0x38] sm:$0xff] }
 0x923   : > { %v2575_v11 = vld [vmem:[#allocation2 + $0x30] sm:$0xff] }
 0x924   : > { %4467 = vmatprep.mubr.msk.f32.mxu1 %vm523_vm0, %v2575_v11 }
 0x925   : > { %4468 = vmatmul.mubr.msk.f32.gmra.mxu1 %vm523_vm0, %v2576_v0 }
 0x9d9   : > { %v4460_v41 = vpop.f32.mrf.mxu1 }
 0x9da   : > { %v2684_v55 = vadd.f32 %v4460_v41, %v3920_v1 }
 0x9db   : > { %v2678_v33 = vpop.f32.mrf.mxu1 }
 0x9dc   : > { %v6263_v5 = vadd.f32 %v4933_v9, %v2684_v55  ;;  %v2679_v3 = vadd.f32 %v3920_v1, %v2678_v33 }
 0x9dd   : > { %v4463_v4 = vpop.f32.mrf.mxu1 }
 0x9de   : > { %v6266_v48 = vadd.f32 %v4934_v39, %v2679_v3  ;;  %v2694_v7 = vadd.f32 %v4463_v4, %v3920_v1  ;;  %v2728_v52 = vsel %vm523_vm0, %v6263_v5, 0.0 }
 0x9df   : > { %2729 = vadd.xlane.f32.xlu1 %v2728_v52  ;;  %v2688_v6 = vpop.f32.mrf.mxu1 }
 0x9e0   : > { %v6271_v53 = vadd.f32 %v4935_v8, %v2694_v7  ;;  %v2689_v38 = vadd.f32 %v3920_v1, %v2688_v6  ;;  %v2725_v46 = vsel %vm523_vm0, %v6266_v48, 0.0 }
 0x9e1   : > { %2726 = vadd.xlane.f32.xlu0 %v2725_v46  ;;  %v4466_v15 = vpop.f32.mrf.mxu1 }
 0x9e2   : > { %v2704_v61 = vadd.f32 %v4466_v15, %v3920_v1  ;;  %v6276_v45 = vadd.f32 %v4936_v23, %v2689_v38  ;;  %v2734_v36 = vsel %vm523_vm0, %v6271_v53, 0.0  ;;  %v2832_v23 = vld [vmem:[#allocation10 + $0x18] sm:$0xff] }
 0x9e3   : > { %v2698_v34 = vpop.f32.mrf.mxu1  ;;  %4470 = vmatprep.subr.mxu0 %v2832_v23 }
 0x9e4   : > { %v6279_v32 = vadd.f32 %v4937_v57, %v2704_v61  ;;  %v2699_v21 = vadd.f32 %v3920_v1, %v2698_v34  ;;  %v2731_v28 = vsel %vm523_vm0, %v6276_v45, 0.0  ;;  %4471 = vmatpush3.msra.mxu0 %v2832_v23  ;;  %v2831_v57 = vld [vmem:[#allocation10 + $0x10] sm:$0xff]  ;;  %v3044_v23 = vld [vmem:[#allocation12 + $0x18] sm:$0xff] }
 0x9e5   : > { %2735 = vadd.xlane.f32.xlu0 %v2734_v36  ;;  %v4469_v58 = vpop.f32.mrf.mxu1  ;;  %4472 = vmatprep.subr.mxu0 %v2831_v57  ;;  %v2829_v36 = vld [vmem:[#allocation10] sm:$0xff] }
 0x9e6   : > { %v2714_v13 = vadd.f32 %v4469_v58, %v3920_v1  ;;  %v2740_v27 = vsel %vm523_vm0, %v6279_v32, 0.0  ;;  %v6286_v14 = vadd.f32 %v4938_v59, %v2699_v21  ;;  %4473 = vmatpush3.msra.mxu0 %v2831_v57  ;;  %v2830_v21 = vld [vmem:[#allocation10 + $0x8] sm:$0xff]  ;;  %v3043_v57 = vld [vmem:[#allocation12 + $0x10] sm:$0xff] }
 0x9e7   : > { %2741 = vadd.xlane.f32.xlu1 %v2740_v27  ;;  %v2708_v56 = vpop.f32.mrf.mxu1  ;;  %4474 = vmatprep.subr.mxu0 %v2830_v21 }
 0x9e8   : > { %v6289_v30 = vadd.f32 %v4939_v44, %v2714_v13  ;;  %v2709_v47 = vadd.f32 %v3920_v1, %v2708_v56  ;;  %v2737_v25 = vsel %vm523_vm0, %v6286_v14, 0.0  ;;  %4475 = vmatpush3.msra.mxu0 %v2830_v21  ;;  %v3042_v21 = vld [vmem:[#allocation12 + $0x8] sm:$0xff] }
 0x9e9   : > { %2732 = vadd.xlane.f32.xlu0 %v2731_v28  ;;  %4476 = vmatprep.subr.mxu0 %v2829_v36 }
 0x9ea   : > { %v2746_v18 = vsel %vm523_vm0, %v6289_v30, 0.0  ;;  %v6296_v54 = vadd.f32 %v4940_v2, %v2709_v47  ;;  %4477 = vmatpush3.msra.mxu0 %v2829_v36  ;;  %v3041_v36 = vld [vmem:[#allocation12] sm:$0xff] }
 0x9eb   : > { %2747 = vadd.xlane.f32.xlu1 %v2746_v18 }
 0x9ec   : > { %v2743_v51 = vsel %vm523_vm0, %v6296_v54, 0.0 }
 0x9ed   : > { %2738 = vadd.xlane.f32.xlu0 %v2737_v25 }
 0x9f1   : > { %2744 = vadd.xlane.f32.xlu0 %v2743_v51 }
 0xa68   : > { %v2730_v63 = vpop.xlane.xlu1 %2729 }
 0xa69   : > { %v2750_v19 = vmul.f32 0.03125, %v2730_v63 }
 0xa6a   : > { %v2727_v17 = vpop.xlane.xlu0 %2726 }
 0xa6b   : > { %v6303_v49 = vsub.f32 %v6263_v5, %v2750_v19  ;;  %v2749_v35 = vmul.f32 0.03125, %v2727_v17 }
 0xa6d   : > { %v6306_v29 = vsub.f32 %v6266_v48, %v2749_v35  ;;  %v2766_v24 = vmul.f32 %v6303_v49, %v6303_v49 }
 0xa6e   : > { %v2736_v12 = vpop.xlane.xlu0 %2735 }
 0xa6f   : > { %v2752_v10 = vmul.f32 0.03125, %v2736_v12  ;;  %v2776_v31 = vsel %vm523_vm0, %v2766_v24, 0.0  ;;  %v2765_v22 = vmul.f32 %v6306_v29, %v6306_v29 }
 0xa70   : > { %2777 = vadd.xlane.f32.xlu1 %v2776_v31  ;;  %v2742_v42 = vpop.xlane.xlu1 %2741 }
 0xa71   : > { %v6314_v37 = vsub.f32 %v6271_v53, %v2752_v10  ;;  %v2754_v40 = vmul.f32 0.03125, %v2742_v42  ;;  %v2773_v50 = vsel %vm523_vm0, %v2765_v22, 0.0 }
 0xa72   : > { %v2733_v26 = vpop.xlane.xlu0 %2732  ;;  %2774 = vadd.xlane.f32.xlu0 %v2773_v50 }
 0xa73   : > { %v6318_v60 = vsub.f32 %v6279_v32, %v2754_v40  ;;  %v2751_v16 = vmul.f32 0.03125, %v2733_v26  ;;  %v2768_v20 = vmul.f32 %v6314_v37, %v6314_v37 }
 0xa74   : > { %v2748_v62 = vpop.xlane.xlu1 %2747 }
 0xa75   : > { %v6323_v43 = vsub.f32 %v6276_v45, %v2751_v16  ;;  %v2756_v11 = vmul.f32 0.03125, %v2748_v62  ;;  %v2782_v0 = vsel %vm523_vm0, %v2768_v20, 0.0  ;;  %v2770_v1 = vmul.f32 %v6318_v60, %v6318_v60 }
 0xa76   : > { %v2739_v41 = vpop.xlane.xlu0 %2738  ;;  %2783 = vadd.xlane.f32.xlu1 %v2782_v0 }
 0xa77   : > { %v6329_v55 = vsub.f32 %v6289_v30, %v2756_v11  ;;  %v2753_v33 = vmul.f32 0.03125, %v2739_v41  ;;  %v2767_v9 = vmul.f32 %v6323_v43, %v6323_v43  ;;  %v2788_v39 = vsel %vm523_vm0, %v2770_v1, 0.0 }
 0xa79   : > { %v6334_v3 = vsub.f32 %v6286_v14, %v2753_v33  ;;  %v2779_v4 = vsel %vm523_vm0, %v2767_v9, 0.0  ;;  %v2772_v7 = vmul.f32 %v6329_v55, %v6329_v55 }
 0xa7a   : > { %2780 = vadd.xlane.f32.xlu0 %v2779_v4  ;;  %v2745_v52 = vpop.xlane.xlu0 %2744  ;;  %2789 = vadd.xlane.f32.xlu1 %v2788_v39 }
 0xa7b   : > { %v2755_v6 = vmul.f32 0.03125, %v2745_v52  ;;  %v2769_v8 = vmul.f32 %v6334_v3, %v6334_v3  ;;  %v2794_v15 = vsel %vm523_vm0, %v2772_v7, 0.0  ;;  %v3056_v7 = vld [vmem:[#allocation12 + $0x78] sm:$0xff]  ;;  %v3053_v52 = vld [vmem:[#allocation12 + $0x60] sm:$0xff] }
 0xa7c   : > { %4490 = vmatprep.subr.mxu1 %v3056_v7 }
 0xa7d   : > { %v6343_v38 = vsub.f32 %v6296_v54, %v2755_v6  ;;  %v2785_v46 = vsel %vm523_vm0, %v2769_v8, 0.0  ;;  %4491 = vmatpush3.msra.mxu1 %v3056_v7  ;;  %v3052_v6 = vld [vmem:[#allocation12 + $0x58] sm:$0xff]  ;;  %v3050_v8 = vld [vmem:[#allocation12 + $0x48] sm:$0xff] }
 0xa7e   : > { %2786 = vadd.xlane.f32.xlu0 %v2785_v46  ;;  %2795 = vadd.xlane.f32.xlu1 %v2794_v15  ;;  %v3048_v46 = vld [vmem:[#allocation12 + $0x38] sm:$0xff]  ;;  %v3047_v15 = vld [vmem:[#allocation12 + $0x30] sm:$0xff] }
 0xa7f   : > { %v2771_v61 = vmul.f32 %v6343_v38, %v6343_v38 }
 0xa81   : > { %v2791_v34 = vsel %vm523_vm0, %v2771_v61, 0.0  ;;  %v3046_v61 = vld [vmem:[#allocation12 + $0x28] sm:$0xff] }
 0xa82   : > { %2792 = vadd.xlane.f32.xlu0 %v2791_v34  ;;  %v3045_v34 = vld [vmem:[#allocation12 + $0x20] sm:$0xff] }
 0xaf9   : > { %v2778_v58 = vpop.xlane.xlu1 %2777 }
 0xafa   : > { %v2798_v13 = vmul.f32 0.03125, %v2778_v58  ;;  %v3929_v58 = vld [vmem:[%s6596_s7] ss:$0 sm:$0xff] }
 0xafb   : > { %v2775_v27 = vpop.xlane.xlu0 %2774 }
 0xafc   : > { %v2806_v56 = vadd.f32 1e-05, %v2798_v13  ;;  %v2797_v59 = vmul.f32 0.03125, %v2775_v27 }
 0xafe   : > { %v2805_v44 = vadd.f32 1e-05, %v2797_v59  ;;  %4897 = vrsqrt.f32 %v2806_v56 }
 0xaff   : > { %v2784_v47 = vpop.xlane.xlu1 %2783 }
 0xb00   : > { %4899 = vrsqrt.f32 %v2805_v44  ;;  %v2800_v28 = vmul.f32 0.03125, %v2784_v47 }
 0xb02   : > { %v2808_v18 = vadd.f32 1e-05, %v2800_v28 }
 0xb03   : > { %v2781_v2 = vpop.xlane.xlu0 %2780  ;;  %v2790_v25 = vpop.xlane.xlu1 %2789 }
 0xb04   : > { %v2799_v51 = vmul.f32 0.03125, %v2781_v2  ;;  %v2802_v63 = vmul.f32 0.03125, %v2790_v25  ;;  %4901 = vrsqrt.f32 %v2808_v18 }
 0xb06   : > { %v2807_v19 = vadd.f32 1e-05, %v2799_v51  ;;  %v2810_v17 = vadd.f32 1e-05, %v2802_v63 }
 0xb07   : > { %v2787_v35 = vpop.xlane.xlu0 %2786  ;;  %v2796_v24 = vpop.xlane.xlu1 %2795 }
 0xb08   : > { %4903 = vrsqrt.f32 %v2807_v19  ;;  %v2801_v12 = vmul.f32 0.03125, %v2787_v35  ;;  %v2804_v10 = vmul.f32 0.03125, %v2796_v24 }
 0xb09   : > { %4905 = vrsqrt.f32 %v2810_v17 }
 0xb0a   : > { %v2809_v31 = vadd.f32 1e-05, %v2801_v12  ;;  %v2812_v22 = vadd.f32 1e-05, %v2804_v10 }
 0xb0b   : > { %v2793_v42 = vpop.xlane.xlu0 %2792  ;;  %v4898_v40 = vpop.eup %4897 }
 0xb0c   : > { %4907 = vrsqrt.f32 %v2809_v31  ;;  %v2803_v50 = vmul.f32 0.03125, %v2793_v42  ;;  %v2822_v62 = vmul.f32 %v4898_v40, %v6303_v49 }
 0xb0d   : > { %v4900_v26 = vpop.eup %4899  ;;  %4909 = vrsqrt.f32 %v2812_v22 }
 0xb0e   : > { %v2811_v16 = vadd.f32 1e-05, %v2803_v50  ;;  %v2821_v20 = vmul.f32 %v4900_v26, %v6306_v29 }
 0xb10   : > { %4911 = vrsqrt.f32 %v2811_v16  ;;  %4478 = vmatprep.mubr.msk.f32.mxu0 %vm523_vm0, %v2821_v20 }
 0xb11   : > { %4479 = vmatmul.mubr.msk.f32.vlgmr.msra.gmra.mxu0 %vm523_vm0, %v2822_v62  ;;  %v4902_v11 = vpop.eup %4901 }
 0xb12   : > { %v2824_v41 = vmul.f32 %v4902_v11, %v6314_v37 }
 0xb15   : > { %v4904_v0 = vpop.eup %4903 }
 0xb16   : > { %v2823_v1 = vmul.f32 %v4904_v0, %v6323_v43  ;;  %v4906_v33 = vpop.eup %4905 }
 0xb17   : > { %v2826_v29 = vmul.f32 %v4906_v33, %v6318_v60  ;;  %v3054_v60 = vld [vmem:[#allocation12 + $0x68] sm:$0xff] }
 0xb18   : > { %4481 = vmatprep.mubr.msk.f32.mxu0 %vm523_vm0, %v2823_v1 }
 0xb19   : > { %v4908_v9 = vpop.eup %4907  ;;  %4482 = vmatmul.mubr.msk.f32.gmra.mxu0 %vm523_vm0, %v2824_v41 }
 0xb1a   : > { %v2825_v49 = vmul.f32 %v4908_v9, %v6334_v3  ;;  %v4910_v4 = vpop.eup %4909  ;;  %v3055_v3 = vld [vmem:[#allocation12 + $0x70] sm:$0xff] }
 0xb1b   : > { %v2828_v37 = vmul.f32 %v4910_v4, %v6329_v55  ;;  %4492 = vmatprep.subr.mxu1 %v3055_v3  ;;  %v3051_v55 = vld [vmem:[#allocation12 + $0x50] sm:$0xff] }
 0xb1c   : > { %4484 = vmatprep.mubr.msk.f32.mxu0 %vm523_vm0, %v2825_v49  ;;  %4493 = vmatpush3.msra.mxu1 %v3055_v3 }
 0xb1d   : > { %v4912_v39 = vpop.eup %4911  ;;  %4485 = vmatmul.mubr.msk.f32.gmra.mxu0 %vm523_vm0, %v2826_v29  ;;  %4494 = vmatprep.subr.mxu1 %v3054_v60 }
 0xb1e   : > { %v2827_v43 = vmul.f32 %v4912_v39, %v6343_v38  ;;  %4495 = vmatpush3.msra.mxu1 %v3054_v60  ;;  %v3049_v38 = vld [vmem:[#allocation12 + $0x40] sm:$0xff] }
 0xb1f   : > { %4496 = vmatprep.subr.mxu1 %v3053_v52 }
 0xb20   : > { %4487 = vmatprep.mubr.msk.f32.mxu0 %vm523_vm0, %v2827_v43  ;;  %4497 = vmatpush3.msra.mxu1 %v3053_v52 }
 0xb21   : > { %4488 = vmatmul.mubr.msk.f32.gmra.mxu0 %vm523_vm0, %v2828_v37  ;;  %4498 = vmatprep.subr.mxu1 %v3052_v6 }
 0xb22   : > { %4499 = vmatpush3.msra.mxu1 %v3052_v6 }
 0xb23   : > { %4500 = vmatprep.subr.mxu1 %v3051_v55 }
 0xb24   : > { %4501 = vmatpush3.msra.mxu1 %v3051_v55 }
 0xb25   : > { %4502 = vmatprep.subr.mxu1 %v3050_v8 }
 0xb26   : > { %4503 = vmatpush3.msra.mxu1 %v3050_v8 }
 0xb27   : > { %4504 = vmatprep.subr.mxu1 %v3049_v38 }
 0xb28   : > { %4505 = vmatpush3.msra.mxu1 %v3049_v38 }
 0xb29   : > { %4506 = vmatprep.subr.mxu1 %v3048_v46 }
 0xb2a   : > { %4507 = vmatpush3.msra.mxu1 %v3048_v46 }
 0xb2b   : > { %4508 = vmatprep.subr.mxu1 %v3047_v15 }
 0xb2c   : > { %4509 = vmatpush3.msra.mxu1 %v3047_v15 }
 0xb2d   : > { %4510 = vmatprep.subr.mxu1 %v3046_v61 }
 0xb2e   : > { %4511 = vmatpush3.msra.mxu1 %v3046_v61 }
 0xb2f   : > { %4512 = vmatprep.subr.mxu1 %v3045_v34 }
 0xb30   : > { %4513 = vmatpush3.msra.mxu1 %v3045_v34 }
 0xb31   : > { %4514 = vmatprep.subr.mxu1 %v3044_v23 }
 0xb32   : > { %4515 = vmatpush3.msra.mxu1 %v3044_v23 }
 0xb33   : > { %4516 = vmatprep.subr.mxu1 %v3043_v57 }
 0xb34   : > { %4517 = vmatpush3.msra.mxu1 %v3043_v57 }
 0xb35   : > { %4518 = vmatprep.subr.mxu1 %v3042_v21 }
 0xb36   : > { %4519 = vmatpush3.msra.mxu1 %v3042_v21 }
 0xb37   : > { %4520 = vmatprep.subr.mxu1 %v3041_v36 }
 0xb38   : > { %4521 = vmatpush3.msra.mxu1 %v3041_v36 }
 0xbd1   : > { %v4480_v13 = vpop.f32.mrf.mxu0 }
 0xbd2   : > { %v6369_v27 = vadd.f32 %v4480_v13, %v3929_v58 }
 0xbd3   : > { %v2930_v56 = vpop.f32.mrf.mxu0 }
 0xbd4   : > { %v2978_v59 = vmul.f32 0.044715, %v6369_v27  ;;  %v2931_v44 = vadd.f32 %v3929_v58, %v2930_v56 }
 0xbd6   : > { %v2986_v47 = vmul.f32 %v2978_v59, %v6369_v27  ;;  %v2977_v28 = vmul.f32 0.044715, %v2931_v44 }
 0xbd8   : > { %v2994_v18 = vmul.f32 %v2986_v47, %v6369_v27  ;;  %v2985_v2 = vmul.f32 %v2977_v28, %v2931_v44  ;;  %v2969_v47 = vmul.f32 0.5, %v2931_v44 }
 0xbd9   : > { %v4483_v25 = vpop.f32.mrf.mxu0 }
 0xbda   : > { %v3002_v51 = vadd.f32 %v2994_v18, %v6369_v27  ;;  %v6375_v63 = vadd.f32 %v4483_v25, %v3929_v58  ;;  %v2993_v19 = vmul.f32 %v2985_v2, %v2931_v44  ;;  %v2970_v18 = vmul.f32 0.5, %v6369_v27 }
 0xbdb   : > { %v2940_v17 = vpop.f32.mrf.mxu0 }
 0xbdc   : > { %v3010_v35 = vmul.f32 0.7978846, %v3002_v51  ;;  %v2980_v24 = vmul.f32 0.044715, %v6375_v63  ;;  %v2941_v12 = vadd.f32 %v3929_v58, %v2940_v17  ;;  %v3001_v10 = vadd.f32 %v2993_v19, %v2931_v44 }
 0xbdd   : > { %v4486_v31 = vpop.f32.mrf.mxu0 }
 0xbde   : > { %4913 = vtanh.f32 %v3010_v35  ;;  %v2988_v22 = vmul.f32 %v2980_v24, %v6375_v63  ;;  %v2979_v42 = vmul.f32 0.044715, %v2941_v12  ;;  %v6379_v40 = vadd.f32 %v4486_v31, %v3929_v58 }
 0xbdf   : > { %v2950_v50 = vpop.f32.mrf.mxu0  ;;  %v3009_v26 = vmul.f32 0.7978846, %v3001_v10  ;;  %v2971_v35 = vmul.f32 0.5, %v2941_v12  ;;  %v2972_v10 = vmul.f32 0.5, %v6375_v63 }
 0xbe0   : > { %v2987_v16 = vmul.f32 %v2979_v42, %v2941_v12  ;;  %v2982_v20 = vmul.f32 0.044715, %v6379_v40  ;;  %v2951_v62 = vadd.f32 %v3929_v58, %v2950_v50  ;;  %v2996_v11 = vmul.f32 %v2988_v22, %v6375_v63 }
 0xbe1   : > { %v4489_v0 = vpop.f32.mrf.mxu0  ;;  %4915 = vtanh.f32 %v3009_v26 }
 0xbe2   : > { %v2990_v1 = vmul.f32 %v2982_v20, %v6379_v40  ;;  %v2981_v41 = vmul.f32 0.044715, %v2951_v62  ;;  %v6384_v33 = vadd.f32 %v4489_v0, %v3929_v58  ;;  %v2995_v9 = vmul.f32 %v2987_v16, %v2941_v12 }
 0xbe3   : > { %v2960_v49 = vpop.f32.mrf.mxu0  ;;  %v3004_v29 = vadd.f32 %v2996_v11, %v6375_v63  ;;  %v2973_v26 = vmul.f32 0.5, %v2951_v62  ;;  %v2974_v20 = vmul.f32 0.5, %v6379_v40 }
 0xbe4   : > { %v2989_v4 = vmul.f32 %v2981_v41, %v2951_v62  ;;  %v2984_v39 = vmul.f32 0.044715, %v6384_v33  ;;  %v2961_v43 = vadd.f32 %v3929_v58, %v2960_v49  ;;  %v3003_v37 = vadd.f32 %v2995_v9, %v2941_v12 }
 0xbe5   : > { %v3012_v7 = vmul.f32 0.7978846, %v3004_v29  ;;  %v2998_v3 = vmul.f32 %v2990_v1, %v6379_v40  ;;  %v2976_v63 = vmul.f32 0.5, %v6384_v33 }
 0xbe6   : > { %v2992_v60 = vmul.f32 %v2984_v39, %v6384_v33  ;;  %v2983_v52 = vmul.f32 0.044715, %v2961_v43  ;;  %v3011_v6 = vmul.f32 0.7978846, %v3003_v37  ;;  %v2997_v55 = vmul.f32 %v2989_v4, %v2951_v62 }
 0xbe7   : > { %4917 = vtanh.f32 %v3012_v7  ;;  %v3006_v8 = vadd.f32 %v2998_v3, %v6379_v40  ;;  %v2975_v12 = vmul.f32 0.5, %v2961_v43  ;;  %v3945_v40 = vld [vmem:[%s6601_s12 + $0x20] sm:$0xff] }
 0xbe8   : > { %v2991_v38 = vmul.f32 %v2983_v52, %v2961_v43  ;;  %4919 = vtanh.f32 %v3011_v6  ;;  %v3005_v46 = vadd.f32 %v2997_v55, %v2951_v62  ;;  %v3000_v15 = vmul.f32 %v2992_v60, %v6384_v33  ;;  %v3177_v62 = vld [vmem:[%s6601_s12] sm:$0xff] }
 0xbe9   : > { %v3014_v61 = vmul.f32 0.7978846, %v3006_v8  ;;  %4550 = vmatprep.mubr.msk.f32.mxu0 %vm939_vm2, %v3177_v62  ;;  %v3938_v3 = vld [vmem:[%s6598_s9] ss:$0 sm:$0xff] }
 0xbea   : > { %v3013_v34 = vmul.f32 0.7978846, %v3005_v46  ;;  %v2999_v23 = vmul.f32 %v2991_v38, %v2961_v43  ;;  %v3008_v57 = vadd.f32 %v3000_v15, %v6384_v33  ;;  %v3580_v62 = vld [vmem:[%s6599_s10 + $0x40] sm:$0xff] }
 0xbeb   : > { %v4914_v21 = vpop.eup %4913  ;;  %4921 = vtanh.f32 %v3014_v61 }
 0xbec   : > { %4923 = vtanh.f32 %v3013_v34  ;;  %v3007_v36 = vadd.f32 %v2999_v23, %v2961_v43  ;;  %v3016_v58 = vmul.f32 0.7978846, %v3008_v57  ;;  %v3026_v56 = vadd.f32 1.0, %v4914_v21 }
 0xbee   : > { %v4916_v13 = vpop.eup %4915  ;;  %v3015_v59 = vmul.f32 0.7978846, %v3007_v36  ;;  %4925 = vtanh.f32 %v3016_v58  ;;  %v3034_v25 = vmul.f32 %v3026_v56, %v2970_v18  ;;  %v3942_v36 = vld [vmem:[%s6601_s12 + $0x18] sm:$0xff]  ;;  %v3949_v58 = vld [vmem:[%s6601_s12 + $0x30] sm:$0xff] }
 0xbef   : > { %v3025_v28 = vadd.f32 1.0, %v4916_v13  ;;  %v3950_v13 = vld [vmem:[%s6601_s12 + $0x38] sm:$0xff] }
 0xbf0   : > { %4927 = vtanh.f32 %v3015_v59 }
 0xbf1   : > { %v3033_v2 = vmul.f32 %v3025_v28, %v2969_v47 }
 0xbf3   : > { %4522 = vmatprep.mubr.f32.mxu1 %v3033_v2 }
 0xbf4   : > { %v4918_v51 = vpop.eup %4917  ;;  %4523 = vmatmul.mubr.f32.vlgmr.msra.gmra.mxu1 %v3034_v25 }
 0xbf5   : > { %v4920_v19 = vpop.eup %4919  ;;  %v3028_v17 = vadd.f32 1.0, %v4918_v51 }
 0xbf6   : > { %v3027_v24 = vadd.f32 1.0, %v4920_v19 }
 0xbf7   : > { %v3036_v50 = vmul.f32 %v3028_v17, %v2972_v10 }
 0xbf8   : > { %v4922_v31 = vpop.eup %4921  ;;  %v3035_v22 = vmul.f32 %v3027_v24, %v2971_v35 }
 0xbf9   : > { %v4924_v42 = vpop.eup %4923  ;;  %v3030_v44 = vadd.f32 1.0, %v4922_v31 }
 0xbfa   : > { %4525 = vmatprep.mubr.f32.mxu1 %v3035_v22  ;;  %v3029_v27 = vadd.f32 1.0, %v4924_v42 }
 0xbfb   : > { %v4926_v16 = vpop.eup %4925  ;;  %4526 = vmatmul.mubr.f32.gmra.mxu1 %v3036_v50  ;;  %v3038_v1 = vmul.f32 %v3030_v44, %v2974_v20  ;;  %v3587_v50 = vld [vmem:[%s6599_s10 + $0x78] sm:$0xff]  ;;  %v3586_v44 = vld [vmem:[%s6599_s10 + $0x70] sm:$0xff] }
 0xbfc   : > { %v3037_v11 = vmul.f32 %v3029_v27, %v2973_v26  ;;  %v3032_v41 = vadd.f32 1.0, %v4926_v16  ;;  %v3585_v26 = vld [vmem:[%s6599_s10 + $0x68] sm:$0xff]  ;;  %v3584_v27 = vld [vmem:[%s6599_s10 + $0x60] sm:$0xff] }
 0xbfd   : > { %v4928_v0 = vpop.eup %4927 }
 0xbfe   : > { %4528 = vmatprep.mubr.f32.mxu1 %v3037_v11  ;;  %v3031_v9 = vadd.f32 1.0, %v4928_v0  ;;  %v3040_v29 = vmul.f32 %v3032_v41, %v2976_v63  ;;  %v3583_v63 = vld [vmem:[%s6599_s10 + $0x58] sm:$0xff] }
 0xbff   : > { %4529 = vmatmul.mubr.f32.gmra.mxu1 %v3038_v1 }
 0xc00   : > { %v3039_v49 = vmul.f32 %v3031_v9, %v2975_v12 }
 0xc02   : > { %4531 = vmatprep.mubr.f32.mxu1 %v3039_v49  ;;  %v3582_v49 = vld [vmem:[%s6599_s10 + $0x50] sm:$0xff] }
 0xc03   : > { %4532 = vmatmul.mubr.f32.gmra.mxu1 %v3040_v29  ;;  %v3581_v29 = vld [vmem:[%s6599_s10 + $0x48] sm:$0xff] }
 0xc04   : > { %4588 = vmatprep.mubr.msk.f32.mxu1 %vm939_vm2, %v3945_v40  ;;  %v3579_v40 = vld [vmem:[%s6599_s10 + $0x38] sm:$0xff] }
 0xcb4   : > { %v4524_v4 = vpop.f32.mrf.mxu1 }
 0xcb6   : > { %v3130_v39 = vpop.f32.mrf.mxu1 }
 0xcbb   : > { %v4527_v43 = vpop.f32.mrf.mxu1 }
 0xcbc   : > { %v3146_v61 = vadd.f32 %v4527_v43, %v3938_v3  ;;  %v3576_v43 = vld [vmem:[%s6599_s10 + $0x20] sm:$0xff] }
 0xcbd   : > { %v3140_v33 = vpop.f32.mrf.mxu1 }
 0xcbe   : > { %v3172_v23 = vadd.f32 %v3146_v61, %v6271_v53 }
 0xcbf   : > { %v4530_v37 = vpop.f32.mrf.mxu1 }
 0xcc0   : > { %v3156_v55 = vadd.f32 %v4530_v37, %v3938_v3  ;;  %v3574_v37 = vld [vmem:[%s6599_s10 + $0x10] sm:$0xff] }
 0xcc1   : > { %v3150_v7 = vpop.f32.mrf.mxu1 }
 0xcc2   : > { %v3151_v46 = vadd.f32 %v3938_v3, %v3150_v7  ;;  %v6419_v34 = vadd.f32 %v3156_v55, %v6279_v32  ;;  %v3136_v32 = vadd.f32 %v4524_v4, %v3938_v3  ;;  %v3578_v4 = vld [vmem:[%s6599_s10 + $0x30] sm:$0xff]  ;;  %v3573_v7 = vld [vmem:[%s6599_s10 + $0x8] sm:$0xff] }
 0xcc3   : > { %v4533_v60 = vpop.f32.mrf.mxu1 }
 0xcc4   : > { %v3166_v52 = vadd.f32 %v4533_v60, %v3938_v3  ;;  %v3170_v21 = vadd.f32 %v3136_v32, %v6263_v5  ;;  %v3946_v5 = vld [vmem:[%s6601_s12 + $0x28] sm:$0xff] }
 0xcc5   : > { %v3160_v6 = vpop.f32.mrf.mxu1 }
 0xcc6   : > { %v6409_v8 = vadd.f32 %v3166_v52, %v6289_v30  ;;  %v3161_v38 = vadd.f32 %v3938_v3, %v3160_v6  ;;  %v3141_v30 = vadd.f32 %v3938_v3, %v3140_v33  ;;  %v3575_v33 = vld [vmem:[%s6599_s10 + $0x18] sm:$0xff] }
 0xcc8   : > { %v6412_v15 = vadd.f32 %v3161_v38, %v6296_v54  ;;  %4534 = vmatprep.subr.mxu0 %v6409_v8  ;;  %4572 = vmatprep.subr.mxu1 %v6409_v8  ;;  %v6426_v54 = vadd.f32 %v3151_v46, %v6286_v14  ;;  %v3131_v14 = vadd.f32 %v3938_v3, %v3130_v39  ;;  %v3577_v39 = vld [vmem:[%s6599_s10 + $0x28] sm:$0xff]  ;;  %v3572_v3 = vld [vmem:[%s6599_s10] sm:$0xff] }
 0xcc9   : > { %4535 = vmatpush3.msra.mxu0 %v6409_v8  ;;  %4573 = vmatpush3.msra.mxu1 %v6409_v8  ;;  %v3171_v57 = vadd.f32 %v3141_v30, %v6276_v45  ;;  %v3178_v45 = vld [vmem:[%s6601_s12 + $0x8] sm:$0xff]  ;;  %v3953_v30 = vld [vmem:[%s6600_s11] ss:$0 sm:$0xff] }
 0xcca   : > { %4536 = vmatprep.subr.mxu0 %v6412_v15  ;;  %4574 = vmatprep.subr.mxu1 %v6412_v15  ;;  %v3169_v53 = vadd.f32 %v3131_v14, %v6266_v48  ;;  %v3941_v48 = vld [vmem:[%s6601_s12 + $0x10] sm:$0xff] }
 0xccb   : > { %4537 = vmatpush3.msra.mxu0 %v6412_v15  ;;  %4575 = vmatpush3.msra.mxu1 %v6412_v15 }
 0xccc   : > { %4538 = vmatprep.subr.mxu0 %v6419_v34  ;;  %4576 = vmatprep.subr.mxu1 %v6419_v34 }
 0xccd   : > { %4539 = vmatpush3.msra.mxu0 %v6419_v34  ;;  %4577 = vmatpush3.msra.mxu1 %v6419_v34 }
 0xcce   : > { %4540 = vmatprep.subr.mxu0 %v6426_v54  ;;  %4578 = vmatprep.subr.mxu1 %v6426_v54 }
 0xccf   : > { %4541 = vmatpush3.msra.mxu0 %v6426_v54  ;;  %4579 = vmatpush3.msra.mxu1 %v6426_v54 }
 0xcd0   : > { %4542 = vmatprep.subr.mxu0 %v3172_v23  ;;  %4580 = vmatprep.subr.mxu1 %v3172_v23 }
 0xcd1   : > { %4543 = vmatpush3.msra.mxu0 %v3172_v23  ;;  %4581 = vmatpush3.msra.mxu1 %v3172_v23 }
 0xcd2   : > { %4544 = vmatprep.subr.mxu0 %v3171_v57  ;;  %4582 = vmatprep.subr.mxu1 %v3171_v57 }
 0xcd3   : > { %4545 = vmatpush3.msra.mxu0 %v3171_v57  ;;  %4583 = vmatpush3.msra.mxu1 %v3171_v57 }
 0xcd4   : > { %4546 = vmatprep.subr.mxu0 %v3170_v21  ;;  %4584 = vmatprep.subr.mxu1 %v3170_v21 }
 0xcd5   : > { %4547 = vmatpush3.msra.mxu0 %v3170_v21  ;;  %4585 = vmatpush3.msra.mxu1 %v3170_v21 }
 0xcd6   : > { %4548 = vmatprep.subr.mxu0 %v3169_v53  ;;  %4586 = vmatprep.subr.mxu1 %v3169_v53 }
 0xcd7   : > { %4549 = vmatpush3.msra.mxu0 %v3169_v53  ;;  %4587 = vmatpush3.msra.mxu1 %v3169_v53 }
 0xcd8   : > { %4551 = vmatmul.mubr.msk.f32.vlgmr.msra.gmra.mxu0 %vm939_vm2, %v3178_v45  ;;  %4553 = vmatprep.subr.mxu0 %v6409_v8 }
 0xcd9   : > { %4554 = vmatpush3.msra.mxu0 %v6409_v8  ;;  %4589 = vmatmul.mubr.msk.f32.vlgmr.msra.gmra.mxu1 %vm939_vm2, %v3946_v5 }
 0xcda   : > { %4555 = vmatprep.subr.mxu0 %v6412_v15  ;;  %4569 = vmatprep.mubr.msk.f32.mxu0 %vm939_vm2, %v3941_v48 }
 0xcdb   : > { %4556 = vmatpush3.msra.mxu0 %v6412_v15  ;;  %4610 = vmatprep.subr.mxu1 %v3587_v50 }
 0xcdc   : > { %4557 = vmatprep.subr.mxu0 %v6419_v34  ;;  %4611 = vmatpush3.msra.mxu1 %v3587_v50 }
 0xcdd   : > { %4558 = vmatpush3.msra.mxu0 %v6419_v34  ;;  %4612 = vmatprep.subr.mxu1 %v3586_v44 }
 0xcde   : > { %4559 = vmatprep.subr.mxu0 %v6426_v54  ;;  %4613 = vmatpush3.msra.mxu1 %v3586_v44 }
 0xcdf   : > { %4560 = vmatpush3.msra.mxu0 %v6426_v54  ;;  %4614 = vmatprep.subr.mxu1 %v3585_v26 }
 0xce0   : > { %4561 = vmatprep.subr.mxu0 %v3172_v23  ;;  %4615 = vmatpush3.msra.mxu1 %v3585_v26 }
 0xce1   : > { %4562 = vmatpush3.msra.mxu0 %v3172_v23  ;;  %4616 = vmatprep.subr.mxu1 %v3584_v27 }
 0xce2   : > { %4563 = vmatprep.subr.mxu0 %v3171_v57  ;;  %4617 = vmatpush3.msra.mxu1 %v3584_v27 }
 0xce3   : > { %4564 = vmatpush3.msra.mxu0 %v3171_v57  ;;  %4618 = vmatprep.subr.mxu1 %v3583_v63 }
 0xce4   : > { %4565 = vmatprep.subr.mxu0 %v3170_v21  ;;  %4619 = vmatpush3.msra.mxu1 %v3583_v63 }
 0xce5   : > { %4566 = vmatpush3.msra.mxu0 %v3170_v21  ;;  %4620 = vmatprep.subr.mxu1 %v3582_v49 }
 0xce6   : > { %4567 = vmatprep.subr.mxu0 %v3169_v53  ;;  %4621 = vmatpush3.msra.mxu1 %v3582_v49 }
 0xce7   : > { %4568 = vmatpush3.msra.mxu0 %v3169_v53  ;;  %4622 = vmatprep.subr.mxu1 %v3581_v29 }
 0xce8   : > { %4570 = vmatmul.mubr.msk.f32.vlgmr.msra.gmra.mxu0 %vm939_vm2, %v3942_v36  ;;  %4591 = vmatprep.subr.mxu0 %v6409_v8 }
 0xce9   : > { %4592 = vmatpush3.msra.mxu0 %v6409_v8  ;;  %4607 = vmatprep.mubr.msk.f32.mxu0 %vm939_vm2, %v3949_v58 }
 0xcea   : > { %4593 = vmatprep.subr.mxu0 %v6412_v15  ;;  %4623 = vmatpush3.msra.mxu1 %v3581_v29 }
 0xceb   : > { %4594 = vmatpush3.msra.mxu0 %v6412_v15  ;;  %4624 = vmatprep.subr.mxu1 %v3580_v62 }
 0xcec   : > { %4595 = vmatprep.subr.mxu0 %v6419_v34  ;;  %4625 = vmatpush3.msra.mxu1 %v3580_v62 }
 0xced   : > { %4596 = vmatpush3.msra.mxu0 %v6419_v34  ;;  %4626 = vmatprep.subr.mxu1 %v3579_v40 }
 0xcee   : > { %4597 = vmatprep.subr.mxu0 %v6426_v54  ;;  %4627 = vmatpush3.msra.mxu1 %v3579_v40 }
 0xcef   : > { %4598 = vmatpush3.msra.mxu0 %v6426_v54  ;;  %4628 = vmatprep.subr.mxu1 %v3578_v4 }
 0xcf0   : > { %4599 = vmatprep.subr.mxu0 %v3172_v23  ;;  %4629 = vmatpush3.msra.mxu1 %v3578_v4 }
 0xcf1   : > { %4600 = vmatpush3.msra.mxu0 %v3172_v23  ;;  %4630 = vmatprep.subr.mxu1 %v3577_v39 }
 0xcf2   : > { %4601 = vmatprep.subr.mxu0 %v3171_v57  ;;  %4631 = vmatpush3.msra.mxu1 %v3577_v39 }
 0xcf3   : > { %4602 = vmatpush3.msra.mxu0 %v3171_v57  ;;  %4632 = vmatprep.subr.mxu1 %v3576_v43 }
 0xcf4   : > { %4603 = vmatprep.subr.mxu0 %v3170_v21  ;;  %4633 = vmatpush3.msra.mxu1 %v3576_v43 }
 0xcf5   : > { %4604 = vmatpush3.msra.mxu0 %v3170_v21  ;;  %4634 = vmatprep.subr.mxu1 %v3575_v33 }
 0xcf6   : > { %4605 = vmatprep.subr.mxu0 %v3169_v53  ;;  %4635 = vmatpush3.msra.mxu1 %v3575_v33 }
 0xcf7   : > { %4606 = vmatpush3.msra.mxu0 %v3169_v53  ;;  %4636 = vmatprep.subr.mxu1 %v3574_v37 }
 0xcf8   : > { %4608 = vmatmul.mubr.msk.f32.vlgmr.msra.gmra.mxu0 %vm939_vm2, %v3950_v13  ;;  %4637 = vmatpush3.msra.mxu1 %v3574_v37 }
 0xcf9   : > { %4638 = vmatprep.subr.mxu1 %v3573_v7 }
 0xcfa   : > { %4639 = vmatpush3.msra.mxu1 %v3573_v7 }
 0xcfb   : > { %4640 = vmatprep.subr.mxu1 %v3572_v3 }
 0xcfc   : > { %4641 = vmatpush3.msra.mxu1 %v3572_v3 }
 0xd98   : > { %v4552_v56 = vpop.f32.mrf.mxu0 }
 0xd99   : > { %3261 = vst.msk [vmem:[#allocation3 + $0x8] sm:$0xff] %vm523_vm0, %v4552_v56  ;;  %v4590_v59 = vpop.f32.mrf.mxu1 }
 0xd9a   : > { %v3251_v47 = vpop.f32.mrf.mxu0  ;;  %3445 = vrot.lane.b32.xlu1 %v4590_v59, %s5153_s27 }
 0xd9b   : > { %3260 = vst.msk [vmem:[#allocation3] sm:$0xff] %vm523_vm0, %v3251_v47  ;;  %v3432_v28 = vpop.f32.mrf.mxu1 }
 0xd9e   : > { %3443 = vrot.lane.b32.xlu1 %v3432_v28, %s5153_s27 }
 0xda8   : > { %v4571_v18 = vpop.f32.mrf.mxu0 }
 0xda9   : > { %3350 = vrot.lane.b32.xlu1 %v4571_v18, %s5166_s14 }
 0xdaa   : > { %v3337_v2 = vpop.f32.mrf.mxu0 }
 0xdab   : > { %3348 = vrot.lane.b32.xlu0 %v3337_v2, %s5166_s14  ;;  %s3959_s14 = sshll.u32 %s5260_s29, 8  ;;  %s5071_s29 = scalar_lea.vmem %s6539_s16, 256 }
 0xdac   : > { %s6545_s19 = scalar_lea.hbm %s6602_s13, %s3959_s14  ;;  %p5072_p4 = scmp.ne.s32.totalorder %s6539_s16, %s5071_s29 }
 0xdad   : > { %p5079_p11 = scmp.lt.s32.totalorder %s5077_s20, %s5071_s29 }
 0xdae   : > { %p5073_p9 = pnand %p5072_p4, %p5277_p5 }
 0xdaf   : > { %p5080_p13 = por %p5079_p11, %p5078_p7 }
 0xdb0   : > { %p5074_p8 = pneg %p5073_p9 }
 0xdb2   : > { %p5081_p0 = pnand %p5080_p13, %p5074_p8 }
 0xdb8   : > { %v4609_v25 = vpop.f32.mrf.mxu0 }
 0xdb9   : > { %3540 = vrot.lane.b32.xlu1 %v4609_v25, %s5152_s15 }
 0xdba   : > { %v3527_v51 = vpop.f32.mrf.mxu0 }
 0xdbb   : > { %3538 = vrot.lane.b32.xlu0 %v3527_v51, %s5152_s15 }
 0xe0c   : > { %v3446_v19 = vpop.permute.xlu1 %3445 }
 0xe10   : > { %v3444_v17 = vpop.permute.xlu1 %3443 }
 0xe1b   : > { %v3351_v35 = vpop.permute.xlu1 %3350 }
 0xe1c   : > { %3356 = vst.msk [vmem:[#allocation3 + $0x8] sm:$0xff] %vm3354_vm6, %v3351_v35 }
 0xe1d   : > { %v3349_v24 = vpop.permute.xlu0 %3348  ;;  %3451 = vst.msk [vmem:[#allocation3 + $0x8] sm:$0xff] %vm3449_vm7, %v3446_v19 }
 0xe1e   : > { %3355 = vst.msk [vmem:[#allocation3] sm:$0xff] %vm3354_vm6, %v3349_v24 }
 0xe1f   : > { %3450 = vst.msk [vmem:[#allocation3] sm:$0xff] %vm3449_vm7, %v3444_v17 }
 0xe2b   : > { %v3541_v10 = vpop.permute.xlu1 %3540 }
 0xe2c   : > { %3546 = vst.msk [vmem:[#allocation3 + $0x8] sm:$0xff] %vm3544_vm8, %v3541_v10 }
 0xe2d   : > { %v3539_v31 = vpop.permute.xlu0 %3538 }
 0xe2e   : > { %3545 = vst.msk [vmem:[#allocation3] sm:$0xff] %vm3544_vm8, %v3539_v31 }
 0xe33   : > { %v3548_v22 = vld [vmem:[#allocation3 + $0x8] sm:$0xff] }
 0xe34   : > { %3551 = vadd.xlane.f32.xlu1 %v3548_v22 }
 0xe35   : > { %v3547_v42 = vld [vmem:[#allocation3] sm:$0xff] }
 0xe36   : > { %3549 = vadd.xlane.f32.xlu0 %v3547_v42 }
 0xebd   : > { %v3552_v16 = vpop.xlane.xlu1 %3551 }
 0xebe   : > { %v3555_v11 = vmul.f32 0.0078125, %v3552_v16 }
 0xebf   : > { %v3550_v20 = vpop.xlane.xlu0 %3549 }
 0xec0   : > { %v3554_v0 = vmul.f32 0.0078125, %v3550_v20  ;;  %v3557_v41 = vsub.f32 %v3548_v22, %v3555_v11 }
 0xec2   : > { %v3556_v1 = vsub.f32 %v3547_v42, %v3554_v0  ;;  %v3559_v9 = vmul.f32 %v3557_v41, %v3557_v41 }
 0xec4   : > { %v3558_v12 = vmul.f32 %v3556_v1, %v3556_v1 }
 0xec6   : > { %3560 = vadd.xlane.f32.xlu0 %v3558_v12 }
 0xeca   : > { %3562 = vadd.xlane.f32.xlu0 %v3559_v9 }
 0xf4f   : > { %v3561_v60 = vpop.xlane.xlu0 %3560 }
 0xf50   : > { %v3564_v52 = vmul.f32 0.0078125, %v3561_v60 }
 0xf52   : > { %v3566_v6 = vadd.f32 1e-05, %v3564_v52 }
 0xf53   : > { %v3563_v55 = vpop.xlane.xlu0 %3562 }
 0xf54   : > { %4929 = vrsqrt.f32 %v3566_v6  ;;  %v3565_v8 = vmul.f32 0.0078125, %v3563_v55 }
 0xf56   : > { %v3567_v38 = vadd.f32 1e-05, %v3565_v8 }
 0xf58   : > { %4931 = vrsqrt.f32 %v3567_v38 }
 0xf61   : > { %v4930_v46 = vpop.eup %4929 }
 0xf62   : > { %v3570_v15 = vmul.f32 %v4930_v46, %v3556_v1 }
 0xf64   : > { %4642 = vmatprep.mubr.f32.mxu1 %v3570_v15 }
 0xf65   : > { %v4932_v61 = vpop.eup %4931 }
 0xf66   : > { %v3571_v34 = vmul.f32 %v4932_v61, %v3557_v41 }
 0xf68   : > { %4643 = vmatmul.mubr.f32.vlgmr.msra.gmra.mxu1 %v3571_v34 }
0x1028   : > { %v4644_v54 = vpop.f32.mrf.mxu1 }
0x1029   : > { %v3667_v32 = vadd.f32 %v4644_v54, %v3953_v30 }
0x102a   : > { %v3661_v23 = vpop.f32.mrf.mxu1 }
0x102b   : > { %3671 = vst.msk [vmem:[%s507_s30 + $0x8] sm:$0xff] %vm939_vm2, %v3667_v32  ;;  %v3662_v14 = vadd.f32 %v3953_v30, %v3661_v23 }
0x102d   : > { %3670 = vst.msk [vmem:[%s507_s30] sm:$0xff] %vm939_vm2, %v3662_v14 }
0x102e   : > { %5084 = shalt.err (!%p5081_p0)
}
0x102f   : > { %s5085_s17 = scalar_lea.hbm %s6545_s19, 256  ;;  %s5089_s30 = scalar_lea.hbm %s6602_s13, 512 }
0x1030   : > { %p5086_p3 = scmp.ne.s32.totalorder %s6545_s19, %s5085_s17  ;;  %p5090_p12 = scmp.lt.s32.totalorder %s6545_s19, %s6602_s13 }
0x1031   : > { %p5091_p10 = scmp.lt.s32.totalorder %s5089_s30, %s5085_s17 }
0x1032   : > { %p5087_p1 = pnand %p5086_p3, %p5277_p5 }
0x1033   : > { %p5092_p4 = por %p5091_p10, %p5090_p12 }
0x1034   : > { %p5088_p2 = pneg %p5087_p1 }
0x1036   : > { %p5093_p9 = pnand %p5092_p4, %p5088_p2 }
0x1038   : > { %5096 = shalt.err (!%p5093_p9)
}
0x1039   : > { %s5168_s27 = smov 128  }
0x103a   : > { %4665 = dma.vmem_to_hbm [thread:$0]  (%p5277_p5), %s6539_s16, 256, %s6545_s19, %s6548_s24, %s5168_s27, %s5168_s27, %s5163_s22  }
0x103b PF: > { %s6633_s29 = sld [smem:[#allocation18_spill]]  ;;  %p4697_p8 = scmp.ge.s32.totalorder %s5143_s28, 2 }
0x103d   : > { %p4684_p7 = pnand %p4697_p8, %p5281_p6 }
0x103f   : > { %p4685_p11 = pneg %p4684_p7 }
0x1041   : > { %s3701_s25 = sand.u32 1, %s6633_s29  }
0x1042   : > { %s3702_s20 = scalar_lea.sflag [#allocation6], %s3701_s25 }
0x1043   : > { %5126 = dma.done.wait (%p4685_p11), %s3702_s20, 256  }
0x1044   : > { %5128 = vsyncadd (%p4685_p11), %s3702_s20, 4294967040  ;;  %s6635_s28 = sld [smem:[#allocation20_spill]]  ;;  %s6638_s25 = smov %s5135_s26 }
0x1045   : > { %s6636_s18 = sld [smem:[#allocation19_spill]] }
0x1046   : > { %s6637_s27 = sld [smem:[#allocation21_spill]] }
0x104a   : > { %p26_p13 = scmp.ge.s32.totalorder %s6635_s28, 4  }
0x104b   : > { %s6639_s26 = smov %s6636_s18 }
0x104c   :  { %28 = sbr.rel (!%p26_p13) target bundleno = 8 (0x8), region = 134 }
0x1051   :  { %3707 = vsyncpa [#allocation5], 1 }
0x1052   :  { %3709 = vsyncpa [#allocation5 + $0x1], 1 }
0x1053   :  { %3710 = vsyncpa [#allocation8], 1 }
0x1054   :  { %3711 = vsyncpa [#allocation11], 1 }
0x1055   :  { %3712 = vsyncpa [#allocation6], 1 }
0x1056   :  { %3714 = vsyncpa [#allocation6 + $0x1], 1 }

</bundles_post_ra>
